<compile_context>
chip_gen: v5e
topology: v5e:2x2
jax: 0.10.0
libtpu: 0.0.40
codegen_flags: <defaults>
</compile_context>

<pallas_src>
import numpy as np
import jax
import jax.numpy as jnp
from jax import lax
from jax.experimental import pallas as pl
from jax.experimental.pallas import tpu as pltpu


# ----------------------------------------------------------------------------
# DFT matrices
# ----------------------------------------------------------------------------
def _dft_mats(n):
    """Return (C, S): C[j,k]=cos(2*pi*j*k/n)/sqrt(n), S likewise with sin.

    Forward ortho-DFT matrix:  F    = C - i*S
    Inverse ortho-DFT matrix:  Finv = C + i*S

    Entries of S whose angle is an exact multiple of pi are set to exactly 0
    so that the imaginary part of the purely-real self-conjugate bins of a
    real input comes out as an exact (signed) zero -> deterministic atan2
    branch.
    """
    j = np.arange(n)
    prod = np.outer(j, j)
    ang = 2.0 * np.pi * prod / n
    scale = 1.0 / np.sqrt(n)
    c = np.cos(ang) * scale
    s = np.sin(ang) * scale
    s[(2 * prod) % n == 0] = 0.0          # sin(k*pi) == 0 exactly
    return (jnp.asarray(c, dtype=jnp.float32),
            jnp.asarray(s, dtype=jnp.float32))


# ----------------------------------------------------------------------------
# Pallas kernel: one block of P planes per grid step
# ----------------------------------------------------------------------------
def _fourier_kernel(x_ref, cw2_ref, ch2_ref, cwi_ref, alpha_ref, beta_ref,
                    o_ref):
    P, H, W = x_ref.shape
    f32 = jnp.float32

    # ---- forward fft along W:  one flat GEMM, [X@Cw | X@Sw] ----------------
    x2 = x_ref[...].reshape(P * H, W)                      # (P*H, W)
    t1 = jnp.dot(x2, cw2_ref[...], preferred_element_type=f32)   # (P*H, 2W)
    t1 = t1.reshape(P, H, 2 * W)                           # [A_re | -A_im]

    # ---- forward fft along H:  one batched GEMM for {Ch,Sh} x {re,-im} -----
    ch2 = jnp.broadcast_to(ch2_ref[...], (P,) + ch2_ref.shape)   # (P, 2H, H)
    u = jnp.einsum('pkh,phn->pkn', ch2, t1,
                   preferred_element_type=f32)             # (P, 2H, 2W)
    y_re = u[:, :H, :W] - u[:, H:, W:]                     # Ch@A_re - Sh@(X@Sw)
    y_im = -(u[:, :H, W:] + u[:, H:, :W])                  # -(Ch@(X@Sw)+Sh@A_re)

    # ---- amplitude / phase with multiplicative + additive noise ------------
    alpha = alpha_ref[...]                                 # (P, 1, W)
    beta = beta_ref[...]
    amp = jnp.sqrt(y_re * y_re + y_im * y_im)              # torch.abs
    # normalize -0.0 -> +0.0 so the atan2 branch (+pi vs -pi) at the
    # purely-real bins is deterministic and matches the reference.
    y_im = jnp.where(y_im == 0.0, 0.0, y_im)
    ph = jnp.arctan2(y_im, y_re)                           # torch.angle
    amp_n = alpha * amp + beta
    ph_n = alpha * ph + beta
    r = amp_n * jnp.cos(ph_n)                              # Re of noisy spectrum
    s = amp_n * jnp.sin(ph_n)                              # Im of noisy spectrum

    # ---- inverse fft along H (Finv = C + iS): one batched GEMM -------------
    t2 = jnp.concatenate([r, s], axis=-1)                  # (P, H, 2W)
    v = jnp.einsum('pkh,phn->pkn', ch2, t2,
                   preferred_element_type=f32)             # (P, 2H, 2W)
    v_re = v[:, :H, :W] - v[:, H:, W:]                     # Ch@r - Sh@s
    v_im = v[:, :H, W:] + v[:, H:, :W]                     # Ch@s + Sh@r

    # ---- inverse fft along W, real part only: one flat GEMM ----------------
    vc = jnp.concatenate([v_re, v_im], axis=-1).reshape(P * H, 2 * W)
    out = jnp.dot(vc, cwi_ref[...], preferred_element_type=f32)  # (P*H, W)
    o_ref[...] = out.reshape(P, H, W)


# ----------------------------------------------------------------------------
# Wrapper
# ----------------------------------------------------------------------------
def fourier_transform_module(x, alpha, beta, *, p_blk=None):
    """x: (B, C, H, W) float32.  alpha, beta: (B, C) float32 noise params."""
    B, C, H, W = x.shape
    P = B * C
    ch, sh = _dft_mats(H)
    cw, sw = _dft_mats(W)
    cw2 = jnp.concatenate([cw, sw], axis=1)                # (W, 2W)  forward W
    ch2 = jnp.concatenate([ch, sh], axis=0)                # (2H, H)  both H
    cwi = jnp.concatenate([cw, -sw], axis=0)               # (2W, W)  inverse W

    if p_blk is None:
        plane_bytes = H * W * 4
        # ~16 plane-sized f32 slabs live in the kernel + double-buffered I/O
        # blocks; keep the per-step footprint well inside the scoped VMEM
        # limit (sized with v7x's 64 MiB physical VMEM in mind).
        p_blk = max(1, min(P, (8 * 1024 * 1024) // (16 * plane_bytes)))
        if P >= 2:                                         # >=2 grid steps so
            p_blk = min(p_blk, pl.cdiv(P, 2))              # both v7x TCs work
    nb = pl.cdiv(P, p_blk)
    P_pad = nb * p_blk

    x_flat = x.reshape(P, H, W)
    a_flat = alpha.reshape(P).astype(jnp.float32)
    b_flat = beta.reshape(P).astype(jnp.float32)
    if P_pad != P:
        x_flat = jnp.pad(x_flat, ((0, P_pad - P), (0, 0), (0, 0)))
        a_flat = jnp.pad(a_flat, (0, P_pad - P))
        b_flat = jnp.pad(b_flat, (0, P_pad - P))
    # per-plane noise scalars as small lane-replicated VMEM blocks (no
    # per-plane SMEM scalar reads inside the body).
    a_vec = jnp.broadcast_to(a_flat[:, None, None], (P_pad, 1, W))
    b_vec = jnp.broadcast_to(b_flat[:, None, None], (P_pad, 1, W))

    out = pl.pallas_call(
        _fourier_kernel,
        out_shape=jax.ShapeDtypeStruct((P_pad, H, W), jnp.float32),
        grid=(nb,),
        in_specs=[
            pl.BlockSpec((p_blk, H, W), lambda i: (i, 0, 0)),   # x planes
            pl.BlockSpec((W, 2 * W), lambda i: (0, 0)),         # [Cw | Sw]
            pl.BlockSpec((2 * H, H), lambda i: (0, 0)),         # [Ch ; Sh]
            pl.BlockSpec((2 * W, W), lambda i: (0, 0)),         # [Cw ; -Sw]
            pl.BlockSpec((p_blk, 1, W), lambda i: (i, 0, 0)),   # alpha
            pl.BlockSpec((p_blk, 1, W), lambda i: (i, 0, 0)),   # beta
        ],
        out_specs=pl.BlockSpec((p_blk, H, W), lambda i: (i, 0, 0)),
        compiler_params=pltpu.CompilerParams(
            dimension_semantics=("parallel",),
            vmem_limit_bytes=32 * 1024 * 1024),
    )(x_flat, cw2, ch2, cwi, a_vec, b_vec)
    return out[:P].reshape(B, C, H, W)


# ----------------------------------------------------------------------------
# Pure-JAX reference (mirrors the PyTorch forward, given alpha/beta)
# ----------------------------------------------------------------------------
def _matrix_fft2(x, ch, sh, cw, sw):
    """Ortho fft2 of a real array over its last two axes via the explicit
    DFT matrices (F = C - i*S).  Returns (real, imag)."""
    hi = lax.Precision.HIGHEST
    xa = jnp.einsum('...hw,wk->...hk', x, cw, precision=hi)
    xb = jnp.einsum('...hw,wk->...hk', x, sw, precision=hi)
    y_re = (jnp.einsum('uh,...hw->...uw', ch, xa, precision=hi)
            - jnp.einsum('uh,...hw->...uw', sh, xb, precision=hi))
    y_im = -(jnp.einsum('uh,...hw->...uw', ch, xb, precision=hi)
             + jnp.einsum('uh,...hw->...uw', sh, xa, precision=hi))
    return y_re, y_im


def _matrix_ifft2_real(re, im, ch, sh, cw, sw):
    """Real part of the ortho ifft2 (Finv = C + i*S) of re + i*im."""
    hi = lax.Precision.HIGHEST
    v_re = (jnp.einsum('uh,...hw->...uw', ch, re, precision=hi)
            - jnp.einsum('uh,...hw->...uw', sh, im, precision=hi))
    v_im = (jnp.einsum('uh,...hw->...uw', ch, im, precision=hi)
            + jnp.einsum('uh,...hw->...uw', sh, re, precision=hi))
    return (jnp.einsum('...hw,wk->...hk', v_re, cw, precision=hi)
            - jnp.einsum('...hw,wk->...hk', v_im, sw, precision=hi))


def _reference(x, alpha, beta, ch, sh, cw, sw):
    """Mirror of FourierTransformModule.forward (alpha/beta supplied).  Uses
    the same ortho-DFT formulation as the kernel so the atan2 branch at the
    purely-real self-conjugate bins is identical on both sides."""
    y_re, y_im = _matrix_fft2(x, ch, sh, cw, sw)
    amp = jnp.sqrt(y_re * y_re + y_im * y_im)
    y_im = jnp.where(y_im == 0.0, 0.0, y_im)
    ph = jnp.arctan2(y_im, y_re)
    a4 = alpha[:, :, None, None]
    b4 = beta[:, :, None, None]
    amp_n = a4 * amp + b4
    ph_n = a4 * ph + b4
    r = amp_n * jnp.cos(ph_n)
    s = amp_n * jnp.sin(ph_n)
    return _matrix_ifft2_real(r, s, ch, sh, cw, sw).astype(jnp.float32)


# ----------------------------------------------------------------------------
if __name__ == "__main__":
    B, C, H, W = 2, 4, 16, 16

    # Module __init__ defaults + the clamping done in forward().
    a_param = jnp.float32(0.5)
    b_param = jnp.float32(0.8)
    beta_mean_param = jnp.float32(0.1)
    beta_std_param = jnp.float32(0.05)
    a_c = jnp.clip(a_param, 0.0, 1.0)
    b_c = jnp.clip(b_param, a_c, 1.0)
    beta_mean_c = jnp.clip(beta_mean_param, 0.0, 0.5)
    beta_std_c = jnp.clip(beta_std_param, 0.0, 0.2)

    key = jax.random.PRNGKey(0)
    kx, ka, kb = jax.random.split(key, 3)
    x = jax.random.normal(kx, (B, C, H, W), dtype=jnp.float32)
    # Per-(batch, channel) noise with the same semantics as torch.rand/randn.
    alpha = a_c + (b_c - a_c) * jax.random.uniform(ka, (B, C), dtype=jnp.float32)
    beta = (jax.random.normal(kb, (B, C), dtype=jnp.float32) * beta_std_c
            + beta_mean_c)

    out = jax.block_until_ready(jax.jit(fourier_transform_module)(x, alpha, beta))

    # ---- validation --------------------------------------------------------
    ch, sh = _dft_mats(H)
    cw, sw = _dft_mats(W)

    # (1) the explicit ortho-DFT matrices reproduce jnp.fft.fft2(norm='ortho')
    #     (well-conditioned check, validates the DFT formulation itself).
    y_re, y_im = _matrix_fft2(x, ch, sh, cw, sw)
    xf = jnp.fft.fft2(x, norm="ortho")
    np.testing.assert_allclose(np.asarray(y_re), np.asarray(jnp.real(xf)),
                               rtol=1e-4, atol=1e-4)
    np.testing.assert_allclose(np.asarray(y_im), np.asarray(jnp.imag(xf)),
                               rtol=1e-4, atol=1e-4)

    # (2) kernel vs. pure-JAX reference of the full noisy forward pass.
    ref = _reference(x, alpha, beta, ch, sh, cw, sw)
    np.testing.assert_allclose(np.asarray(out), np.asarray(ref),
                               rtol=1e-3, atol=2e-3)
    print("KERNEL_OK")
</pallas_src>

<mosaic_0001>
module attributes {stable_mosaic.version = 11 : i64} {
  func.func @_fourier_kernel(%arg0: i32, %arg1: memref<4x16x16xf32, #tpu.memory_space<vmem>>, %arg2: memref<16x32xf32, #tpu.memory_space<vmem>>, %arg3: memref<32x16xf32, #tpu.memory_space<vmem>>, %arg4: memref<32x16xf32, #tpu.memory_space<vmem>>, %arg5: memref<4x1x16xf32, #tpu.memory_space<vmem>>, %arg6: memref<4x1x16xf32, #tpu.memory_space<vmem>>, %arg7: memref<4x16x16xf32, #tpu.memory_space<vmem>>) attributes {dimension_semantics = [#tpu.dimension_semantics<parallel>], iteration_bounds = array<i64: 2>, scalar_prefetch = 0 : i64, scratch_operands = 0 : i64, tpu.core_type = #tpu.core_type<tc>, window_params = [{transform_indices = @transform_0, window_bounds = array<i64: 4, 16, 16>}, {pipeline_mode = #tpu.pipeline_mode<synchronous>, transform_indices = @transform_1, window_bounds = array<i64: 16, 32>}, {pipeline_mode = #tpu.pipeline_mode<synchronous>, transform_indices = @transform_2, window_bounds = array<i64: 32, 16>}, {pipeline_mode = #tpu.pipeline_mode<synchronous>, transform_indices = @transform_3, window_bounds = array<i64: 32, 16>}, {transform_indices = @transform_4, window_bounds = array<i64: 4, 1, 16>}, {transform_indices = @transform_5, window_bounds = array<i64: 4, 1, 16>}, {transform_indices = @transform_6, window_bounds = array<i64: 4, 16, 16>}]} {
    %c0 = arith.constant 0 : index
    %c0_0 = arith.constant 0 : index
    %c0_1 = arith.constant 0 : index
    %0 = vector.load %arg1[%c0, %c0_0, %c0_1] : memref<4x16x16xf32, #tpu.memory_space<vmem>>, vector<4x16x16xf32>
    %1 = vector.shape_cast %0 : vector<4x16x16xf32> to vector<64x16xf32>
    %c0_2 = arith.constant 0 : index
    %c0_3 = arith.constant 0 : index
    %2 = vector.load %arg2[%c0_2, %c0_3] : memref<16x32xf32, #tpu.memory_space<vmem>>, vector<16x32xf32>
    %cst = arith.constant dense<0.000000e+00> : vector<64x32xf32>
    %3 = tpu.matmul %1, %2, %cst {dimension_numbers = #tpu.dot_dimension_numbers<[1], [0], [0], [1], [0, 0, 1, 1], [], []>} : vector<64x16xf32>, vector<16x32xf32>, vector<64x32xf32> -> vector<64x32xf32>
    %4 = vector.shape_cast %3 : vector<64x32xf32> to vector<4x16x32xf32>
    %c0_4 = arith.constant 0 : index
    %c0_5 = arith.constant 0 : index
    %5 = vector.load %arg3[%c0_4, %c0_5] : memref<32x16xf32, #tpu.memory_space<vmem>>, vector<32x16xf32>
    %6 = vector.shape_cast %5 : vector<32x16xf32> to vector<1x32x16xf32>
    %7 = vector.broadcast %6 : vector<1x32x16xf32> to vector<4x32x16xf32>
    "tpu.trace_start"() <{level = 10 : i32, message = "pkh,phn->pkn"}> : () -> ()
    %cst_6 = arith.constant dense<0.000000e+00> : vector<4x32x32xf32>
    %8 = tpu.matmul %7, %4, %cst_6 {dimension_numbers = #tpu.dot_dimension_numbers<[2], [1], [1], [2], [0, 0, 0, 1, 1, 2], [0], [0]>} : vector<4x32x16xf32>, vector<4x16x32xf32>, vector<4x32x32xf32> -> vector<4x32x32xf32>
    "tpu.trace_stop"() : () -> ()
    %9 = vector.extract_strided_slice %8 {offsets = [0, 0, 0], sizes = [4, 16, 16], strides = [1, 1, 1]} : vector<4x32x32xf32> to vector<4x16x16xf32>
    %10 = vector.extract_strided_slice %8 {offsets = [0, 16, 16], sizes = [4, 16, 16], strides = [1, 1, 1]} : vector<4x32x32xf32> to vector<4x16x16xf32>
    %11 = arith.subf %9, %10 : vector<4x16x16xf32>
    %12 = vector.extract_strided_slice %8 {offsets = [0, 0, 16], sizes = [4, 16, 16], strides = [1, 1, 1]} : vector<4x32x32xf32> to vector<4x16x16xf32>
    %13 = vector.extract_strided_slice %8 {offsets = [0, 16, 0], sizes = [4, 16, 16], strides = [1, 1, 1]} : vector<4x32x32xf32> to vector<4x16x16xf32>
    %14 = arith.addf %12, %13 : vector<4x16x16xf32>
    %cst_7 = arith.constant 0.000000e+00 : f32
    %15 = vector.broadcast %cst_7 : f32 to vector<4x16x16xf32>
    %16 = arith.subf %15, %14 : vector<4x16x16xf32>
    %c0_8 = arith.constant 0 : index
    %c0_9 = arith.constant 0 : index
    %c0_10 = arith.constant 0 : index
    %17 = vector.load %arg5[%c0_8, %c0_9, %c0_10] : memref<4x1x16xf32, #tpu.memory_space<vmem>>, vector<4x1x16xf32>
    %c0_11 = arith.constant 0 : index
    %c0_12 = arith.constant 0 : index
    %c0_13 = arith.constant 0 : index
    %18 = vector.load %arg6[%c0_11, %c0_12, %c0_13] : memref<4x1x16xf32, #tpu.memory_space<vmem>>, vector<4x1x16xf32>
    %19 = arith.mulf %11, %11 : vector<4x16x16xf32>
    %20 = arith.mulf %16, %16 : vector<4x16x16xf32>
    %21 = arith.addf %19, %20 : vector<4x16x16xf32>
    %22 = math.sqrt %21 : vector<4x16x16xf32>
    %cst_14 = arith.constant 0.000000e+00 : f32
    %23 = vector.broadcast %cst_14 : f32 to vector<4x16x16xf32>
    %24 = arith.cmpf oeq, %16, %23 : vector<4x16x16xf32>
    %cst_15 = arith.constant 0.000000e+00 : f32
    %25 = vector.broadcast %cst_15 : f32 to vector<4x16x16xf32>
    %26 = arith.select %24, %25, %16 : vector<4x16x16xi1>, vector<4x16x16xf32>
    %27 = math.atan2 %26, %11 : vector<4x16x16xf32>
    %28 = vector.broadcast %17 : vector<4x1x16xf32> to vector<4x16x16xf32>
    %29 = arith.mulf %28, %22 : vector<4x16x16xf32>
    %30 = vector.broadcast %18 : vector<4x1x16xf32> to vector<4x16x16xf32>
    %31 = arith.addf %29, %30 : vector<4x16x16xf32>
    %32 = vector.broadcast %17 : vector<4x1x16xf32> to vector<4x16x16xf32>
    %33 = arith.mulf %32, %27 : vector<4x16x16xf32>
    %34 = vector.broadcast %18 : vector<4x1x16xf32> to vector<4x16x16xf32>
    %35 = arith.addf %33, %34 : vector<4x16x16xf32>
    %36 = math.cos %35 : vector<4x16x16xf32>
    %37 = arith.mulf %31, %36 : vector<4x16x16xf32>
    %38 = math.sin %35 : vector<4x16x16xf32>
    %39 = arith.mulf %31, %38 : vector<4x16x16xf32>
    %40 = tpu.concatenate %37, %39 in 2 : vector<4x16x16xf32>, vector<4x16x16xf32> -> vector<4x16x32xf32>
    "tpu.trace_start"() <{level = 10 : i32, message = "pkh,phn->pkn"}> : () -> ()
    %cst_16 = arith.constant dense<0.000000e+00> : vector<4x32x32xf32>
    %41 = tpu.matmul %7, %40, %cst_16 {dimension_numbers = #tpu.dot_dimension_numbers<[2], [1], [1], [2], [0, 0, 0, 1, 1, 2], [0], [0]>} : vector<4x32x16xf32>, vector<4x16x32xf32>, vector<4x32x32xf32> -> vector<4x32x32xf32>
    "tpu.trace_stop"() : () -> ()
    %42 = vector.extract_strided_slice %41 {offsets = [0, 0, 0], sizes = [4, 16, 16], strides = [1, 1, 1]} : vector<4x32x32xf32> to vector<4x16x16xf32>
    %43 = vector.extract_strided_slice %41 {offsets = [0, 16, 16], sizes = [4, 16, 16], strides = [1, 1, 1]} : vector<4x32x32xf32> to vector<4x16x16xf32>
    %44 = arith.subf %42, %43 : vector<4x16x16xf32>
    %45 = vector.extract_strided_slice %41 {offsets = [0, 0, 16], sizes = [4, 16, 16], strides = [1, 1, 1]} : vector<4x32x32xf32> to vector<4x16x16xf32>
    %46 = vector.extract_strided_slice %41 {offsets = [0, 16, 0], sizes = [4, 16, 16], strides = [1, 1, 1]} : vector<4x32x32xf32> to vector<4x16x16xf32>
    %47 = arith.addf %45, %46 : vector<4x16x16xf32>
    %48 = tpu.concatenate %44, %47 in 2 : vector<4x16x16xf32>, vector<4x16x16xf32> -> vector<4x16x32xf32>
    %49 = vector.shape_cast %48 : vector<4x16x32xf32> to vector<64x32xf32>
    %c0_17 = arith.constant 0 : index
    %c0_18 = arith.constant 0 : index
    %50 = vector.load %arg4[%c0_17, %c0_18] : memref<32x16xf32, #tpu.memory_space<vmem>>, vector<32x16xf32>
    %cst_19 = arith.constant dense<0.000000e+00> : vector<64x16xf32>
    %51 = tpu.matmul %49, %50, %cst_19 {dimension_numbers = #tpu.dot_dimension_numbers<[1], [0], [0], [1], [0, 0, 1, 1], [], []>} : vector<64x32xf32>, vector<32x16xf32>, vector<64x16xf32> -> vector<64x16xf32>
    %52 = vector.shape_cast %51 : vector<64x16xf32> to vector<4x16x16xf32>
    %c0_20 = arith.constant 0 : index
    %c0_21 = arith.constant 0 : index
    %c0_22 = arith.constant 0 : index
    %53 = vector.load %arg7[%c0_20, %c0_21, %c0_22] : memref<4x16x16xf32, #tpu.memory_space<vmem>>, vector<4x16x16xf32>
    tpu.vector_store %arg7[%c0_20, %c0_21, %c0_22], %52 {strides = array<i32>} : memref<4x16x16xf32, #tpu.memory_space<vmem>>, vector<4x16x16xf32>,
    return
  }
  func.func @transform_0(%arg0: i32) -> (i32, i32, i32) {
    %c0_i32 = arith.constant 0 : i32
    %c0_i32_0 = arith.constant 0 : i32
    %c0_i32_1 = arith.constant 0 : i32
    return %arg0, %c0_i32, %c0_i32_0 : i32, i32, i32
  }
  func.func @transform_1(%arg0: i32) -> (i32, i32) {
    %c0_i32 = arith.constant 0 : i32
    %c0_i32_0 = arith.constant 0 : i32
    %c0_i32_1 = arith.constant 0 : i32
    return %c0_i32, %c0_i32_0 : i32, i32
  }
  func.func @transform_2(%arg0: i32) -> (i32, i32) {
    %c0_i32 = arith.constant 0 : i32
    %c0_i32_0 = arith.constant 0 : i32
    %c0_i32_1 = arith.constant 0 : i32
    return %c0_i32, %c0_i32_0 : i32, i32
  }
  func.func @transform_3(%arg0: i32) -> (i32, i32) {
    %c0_i32 = arith.constant 0 : i32
    %c0_i32_0 = arith.constant 0 : i32
    %c0_i32_1 = arith.constant 0 : i32
    return %c0_i32, %c0_i32_0 : i32, i32
  }
  func.func @transform_4(%arg0: i32) -> (i32, i32, i32) {
    %c0_i32 = arith.constant 0 : i32
    %c0_i32_0 = arith.constant 0 : i32
    %c0_i32_1 = arith.constant 0 : i32
    return %arg0, %c0_i32, %c0_i32_0 : i32, i32, i32
  }
  func.func @transform_5(%arg0: i32) -> (i32, i32, i32) {
    %c0_i32 = arith.constant 0 : i32
    %c0_i32_0 = arith.constant 0 : i32
    %c0_i32_1 = arith.constant 0 : i32
    return %arg0, %c0_i32, %c0_i32_0 : i32, i32, i32
  }
  func.func @transform_6(%arg0: i32) -> (i32, i32, i32) {
    %c0_i32 = arith.constant 0 : i32
    %c0_i32_0 = arith.constant 0 : i32
    %c0_i32_1 = arith.constant 0 : i32
    return %arg0, %c0_i32, %c0_i32_0 : i32, i32, i32
  }
}

</mosaic_0001>

<bundles_post_ra>
// kernel: fourier_transform_module.1
= control target key start
LH: loop header
LB: loop body
LE: loop exit
PB: predicated region body
PF: predicated region fallthrough
CT: control target
= control target key end

     0   :  { %11 = vsyncpa [#allocation3], 0  ;;  %s7389_s0 = inlined_call_operand.hbm [shape: f32[8,16,16], index: 0, kind: input, shape index: {}]   ;;  %s7390_s1 = inlined_call_operand.vmem [shape: f32[16,32], index: 1, kind: input, shape index: {}]   ;;  %s7391_s2 = inlined_call_operand.hbm [shape: f32[32,16], index: 2, kind: input, shape index: {}]   ;;  %s7392_s3 = inlined_call_operand.hbm [shape: f32[32,16], index: 3, kind: input, shape index: {}]   ;;  %s7393_s4 = inlined_call_operand.vmem [shape: f32[8,1,16], index: 4, kind: input, shape index: {}]   ;;  %s7394_s5 = inlined_call_operand.vmem [shape: f32[8,1,16], index: 5, kind: input, shape index: {}]   ;;  %s7395_s6 = inlined_call_operand.hbm [shape: f32[8,16,16], index: 6, kind: output, shape index: {}]  }
   0x1   :  { %13 = vsyncpa [#allocation3 + $0x1], 0 }
   0x2   :  { %14 = vsyncpa [#allocation6], 0 }
   0x3   :  { %15 = vsyncpa [#allocation4], 0 }
   0x4   :  { %17 = vsyncpa [#allocation4 + $0x1], 0  ;;  %s4829_s21 = smov 0   ;;  %s4831_s22 = smov 0  }
   0x5   :  { %s4833_s23 = smov 0   ;;  %s4835_s24 = smov 0  }
   0x6 LB: > { %s4850_s25 = sadd.s32 4294967295, %s4775_s24   ;;  %s4339_s26 = sadd.s32 4294967294, %s4775_s24   ;;  %s4775_s24 = sphi %s4835_s24, %s7645_s24   ;;  %s4771_s23 = sphi %s4833_s23, %s7644_s23   ;;  %s4767_s22 = sphi %s4831_s22, %s7643_s22   ;;  %s4763_s21 = sphi %s4829_s21, %s7642_s21  }
   0x7   : > { %p43_p0 = scmp.ne.s32.totalorder %s4767_s22, %s4763_s21  ;;  %p44_p1 = scmp.eq.s32.totalorder %s4850_s25, 0 }
   0x8   : > { %p182_p2 = scmp.eq.s32.totalorder %s4850_s25, 1  ;;  %p188_p3 = scmp.eq.s32.totalorder %s4339_s26, 1 }
   0x9   : > { %p4859_p4 = por %p44_p1, %p43_p0  ;;  %p4340_p5 = scmp.ge.s32.totalorder %s4775_s24, 1 }
   0xa   : > { %p4864_p6 = por %p188_p3, %p43_p0  ;;  %p195_p7 = scmp.lt.s32.totalorder %s4775_s24, 3 }
   0xb   : > { %s209_s7 = sshll.u32 %s7391_s2, 4  ;;  %s4777_s9 = smov [#allocation5]   ;;  %s210_s7 = int_to_ptr.hbm [resolvable:$true] %s209_s7 }
   0xc   : > { %p4872_p8 = pnand %p4340_p5, %p195_p7  ;;  %s211_s10 = sshll.u32 %s4777_s9, 4  ;;  %s212_s10 = int_to_ptr.vmem [resolvable:$true] %s211_s10 }
   0xd   : > { %s223_s13 = sshll.u32 %s7392_s3, 4  ;;  %s7396_s14 = smov 128   ;;  %s224_s13 = int_to_ptr.hbm [resolvable:$true] %s223_s13 }
   0xe   : > { %p4473_p9 = pneg %p4872_p8  ;;  %s7397_s15 = smov 8  }
   0xf   : > { %s4780_s16 = smov [#allocation7]   ;;  %s4891_s18 = sadd.s32 1, %s4775_s24  }
  0x10   : > { %p4474_p10 = pnand %p4473_p9, %p44_p1  ;;  %s225_s17 = sshll.u32 %s4780_s16, 4  ;;  %s226_s17 = int_to_ptr.vmem [resolvable:$true] %s225_s17 }
  0x11   : > { %s30_s19 = sadd.s32 1, %s4771_s23  ;;  %s27_s20 = ssub.s32 %s4775_s24, %s4891_s18 }
  0x12   : > { %4476 = dma.hbm_to_vmem [thread:$0]  (!%p4474_p10), %s210_s7, 512, %s212_s10, [#allocation6], %s7396_s14, %s7396_s14, %s7397_s15  }
  0x13   : > { %4479 = dma.hbm_to_vmem [thread:$0]  (!%p4474_p10), %s224_s13, 512, %s226_s17, [#allocation6], %s7396_s14, %s7396_s14, %s7397_s15  }
  0x14   : > { %p37_p12 = scmp.ne.s32.totalorder %s4771_s23, %s4767_s22  ;;  %p28_p13 = scmp.eq.s32.totalorder %s27_s20, 0 }
  0x15   : > { %p38_p0 = scmp.eq.s32.totalorder %s4775_s24, 0  ;;  %p4490_p5 = scmp.lt.s32.totalorder %s4775_s24, 2 }
  0x16   : > { %p4901_p3 = por %p182_p2, %p37_p12  ;;  %s239_s30 = sand.u32 1, %s4771_s23  }
  0x17   : > { %s4907_s29 = scalar_select %p28_p13, %s4771_s23, %s30_s19  }
  0x18   : > { %p39_p7 = por %p38_p0, %p37_p12  ;;  %s4344_s7 = sshll.u32 %s239_s30, 6 }
  0x19   : > { %s4458_s9 = sshll.u32 %s4775_s24, 6  ;;  %s243_s13 = scalar_lea.vmem [#allocation2], %s4344_s7 }
  0x1a   : > { %s249_s12 = scalar_lea.hbm %s7389_s0, %s4458_s9  ;;  %s252_s16 = sshll.u32 %s243_s13, 4  ;;  %s253_s16 = int_to_ptr.vmem [resolvable:$true] %s252_s16 }
  0x1b   : > { %s250_s17 = sshll.u32 %s249_s12, 4  ;;  %p4914_p2 = pnand %p4490_p5, %p39_p7  ;;  %s251_s17 = int_to_ptr.hbm [resolvable:$true] %s250_s17 }
  0x1c   : > { %s240_s19 = scalar_lea.sflag [#allocation3], %s239_s30  ;;  %s4675_s14 = sshra.s32 %s251_s17, 4  ;;  %s4676_s14 = int_to_ptr.hbm [resolvable:$true] %s4675_s14 }
  0x1d   : > { %s4677_s15 = scalar_lea.hbm %s4676_s14, 64  ;;  %p4679_p10 = pneg %p4914_p2 }
  0x1e   : > { %p4678_p9 = scmp.ne.s32.totalorder %s4676_s14, %s4677_s15  ;;  %s4682_s10 = scalar_lea.hbm %s7389_s0, 128 }
  0x1f   : > { %p4683_p0 = scmp.lt.s32.totalorder %s4676_s14, %s7389_s0  ;;  %p4684_p5 = scmp.lt.s32.totalorder %s4682_s10, %s4677_s15 }
  0x20   : > { %p4680_p12 = pnand %p4679_p10, %p4678_p9 }
  0x21   : > { %p4685_p7 = por %p4684_p5, %p4683_p0 }
  0x22   : > { %p4681_p13 = pneg %p4680_p12 }
  0x24   : > { %p4686_p11 = pnand %p4685_p7, %p4681_p13 }
  0x26   : > { %4689 = shalt.err (!%p4686_p11)
}
  0x27   : > { %s7471_s30 = smov 8   ;;  %s7472_s13 = smov 128  }
  0x28   : > { %4483 = dma.hbm_to_vmem [thread:$0]  (!%p4914_p2), %s251_s17, 1024, %s253_s16, %s240_s19, %s7472_s13, %s7472_s13, %s7471_s30  }
  0x29   : > { %280 = sbr.rel (%p4872_p8) target bundleno = 1631 (0x65f), region = 44 }
  0x2e   : > { %s4934_s9 = sand.u32 1, %s4767_s22  }
  0x2f   : > { %s4349_s14 = sshll.u32 %s4934_s9, 6  ;;  %s283_s15 = scalar_lea.sflag [#allocation3], %s4934_s9 }
  0x30   : > { %s286_s7 = scalar_lea.vmem [#allocation2], %s4349_s14 }
  0x31   : > { %4750 = dma.done.wait (%p4859_p4), %s283_s15, 1024  }
  0x32   : > { %4752 = vsyncadd (%p4859_p4), %s283_s15, 4294966272 }
  0x33   : > { %4754 = dma.done.wait (%p44_p1), [#allocation6], 1024  }
  0x34   : > { %4756 = vsyncadd (%p44_p1), [#allocation6], 4294966272  ;;  %v355_v0 = vld [vmem:[%s7390_s1 + $0x8] sm:$0xff]  ;;  %v354_v1 = vld [vmem:[%s7390_s1] sm:$0xff]  ;;  %vm7409_vm0 = vcmask 130048   ;;  %s4781_s27 = smov 16  }
  0x35   : > { %395 = vmatpush.msra.mxu0 %v355_v0  ;;  %v346_v2 = vld [vmem:[%s286_s7] sm:$0xff]  ;;  %v347_v3 = vld [vmem:[%s286_s7 + $0x8] sm:$0xff]  ;;  %v348_v4 = vld [vmem:[%s286_s7 + $0x10] sm:$0xff]  ;;  %s4782_s19 = smov 112   ;;  %s4353_s10 = sshll.u32 %s4850_s25, 2 }
  0x36   : > { %v349_v5 = vld [vmem:[%s286_s7 + $0x18] sm:$0xff]  ;;  %v350_v6 = vld [vmem:[%s286_s7 + $0x20] sm:$0xff]  ;;  %v351_v7 = vld [vmem:[%s286_s7 + $0x28] sm:$0xff]  ;;  %p336_p1 = scmp.lt.s32.totalorder %s4353_s10, 7  ;;  %s333_s8 = scalar_lea.vmem [#allocation8], %s4349_s14 }
  0x37   : > { %396 = vmatpush.msra.mxu0 %v354_v1  ;;  %v352_v8 = vld [vmem:[%s286_s7 + $0x30] sm:$0xff]  ;;  %v353_v9 = vld [vmem:[%s286_s7 + $0x38] sm:$0xff]  ;;  %v422_v12 = vld [vmem:[#allocation5] sm:$0xff]  ;;  %s4460_s14 = sshll.u32 %s4850_s25, 6  ;;  %s4725_s13 = scalar_lea.hbm %s7395_s6, 128 }
  0x38   : > { %4355 = vmatmul.msk.f32.vlgmr.msra.gmra.mxu0 %vm7409_vm0, %v346_v2  ;;  %v423_v14 = vld [vmem:[#allocation5 + $0x8] sm:$0xff]  ;;  %v424_v16 = vld [vmem:[#allocation5 + $0x10] sm:$0xff]  ;;  %v425_v18 = vld [vmem:[#allocation5 + $0x18] sm:$0xff]  ;;  %s7647_s10 = smov (!%p336_p1, %s4353_s10), 7  ;;  %s4225_s20 = scalar_lea.hbm %s7395_s6, %s4460_s14 }
  0x39   : > { %s5228_s30 = scalar_lea.vmem %s7393_s4, %s7647_s10  ;;  %s5242_s7 = scalar_lea.vmem %s7394_s5, %s7647_s10 }
  0x3a   : > { %s4213_s10 = scalar_lea.sflag [#allocation4], %s4934_s9 }
  0x40   : > { %4356 = vmatmul.msk.f32.gmra.mxu0 %vm7409_vm0, %v347_v3 }
  0x48   : > { %4357 = vmatmul.msk.f32.gmra.mxu0 %vm7409_vm0, %v348_v4 }
  0x50   : > { %4358 = vmatmul.msk.f32.gmra.mxu0 %vm7409_vm0, %v349_v5 }
  0x58   : > { %4359 = vmatmul.msk.f32.gmra.mxu0 %vm7409_vm0, %v350_v6 }
  0x60   : > { %4360 = vmatmul.msk.f32.gmra.mxu0 %vm7409_vm0, %v351_v7 }
  0x68   : > { %4361 = vmatmul.msk.f32.gmra.mxu0 %vm7409_vm0, %v352_v8 }
  0x70   : > { %4362 = vmatmul.msk.f32.gmra.mxu0 %vm7409_vm0, %v353_v9 }
  0xb5   : > { %v398_v10 = vpop.f32.mrf.mxu0 }
  0xbd   : > { %v401_v11 = vpop.f32.mrf.mxu0 }
  0xbe   : > { %452 = vmatpush.msra.mxu1 %v401_v11 }
  0xc0   : > { %453 = vmatpush.msra.mxu1 %v398_v10 }
  0xc1   : > { %4363 = vmatmul.msk.f32.vlgmr.msra.gmra.mxu1 %vm7409_vm0, %v422_v12 }
  0xc5   : > { %v404_v13 = vpop.f32.mrf.mxu0 }
  0xc9   : > { %4364 = vmatmul.msk.f32.gmra.mxu1 %vm7409_vm0, %v423_v14 }
  0xcd   : > { %v407_v15 = vpop.f32.mrf.mxu0 }
  0xce   : > { %481 = vmatpush.msra.mxu3 %v407_v15 }
  0xd0   : > { %482 = vmatpush.msra.mxu3 %v404_v13 }
  0xd1   : > { %4365 = vmatmul.msk.f32.gmra.mxu1 %vm7409_vm0, %v424_v16  ;;  %4367 = vmatmul.msk.f32.vlgmr.msra.gmra.mxu3 %vm7409_vm0, %v422_v12 }
  0xd5   : > { %v410_v17 = vpop.f32.mrf.mxu0 }
  0xd9   : > { %4366 = vmatmul.msk.f32.gmra.mxu1 %vm7409_vm0, %v425_v18  ;;  %4368 = vmatmul.msk.f32.gmra.mxu3 %vm7409_vm0, %v423_v14 }
  0xdd   : > { %v413_v19 = vpop.f32.mrf.mxu0 }
  0xde   : > { %510 = vmatpush.msrb.mxu3 %v413_v19 }
  0xe0   : > { %511 = vmatpush.msrb.mxu3 %v410_v17 }
  0xe1   : > { %4369 = vmatmul.msk.f32.gmra.mxu3 %vm7409_vm0, %v424_v16 }
  0xe5   : > { %v416_v20 = vpop.f32.mrf.mxu0 }
  0xe9   : > { %4370 = vmatmul.msk.f32.gmra.mxu3 %vm7409_vm0, %v425_v18 }
  0xed   : > { %v419_v21 = vpop.f32.mrf.mxu0 }
  0xee   : > { %539 = vmatpush.msrb.mxu1 %v419_v21 }
  0xf0   : > { %540 = vmatpush.msrb.mxu1 %v416_v20 }
  0xf1   : > { %4371 = vmatmul.msk.f32.vlgmr.msrb.gmra.mxu3 %vm7409_vm0, %v422_v12  ;;  %4375 = vmatmul.msk.f32.vlgmr.msrb.gmra.mxu1 %vm7409_vm0, %v422_v12 }
  0xf9   : > { %4372 = vmatmul.msk.f32.gmra.mxu3 %vm7409_vm0, %v423_v14  ;;  %4376 = vmatmul.msk.f32.gmra.mxu1 %vm7409_vm0, %v423_v14 }
 0x101   : > { %4373 = vmatmul.msk.f32.gmra.mxu3 %vm7409_vm0, %v424_v16  ;;  %4377 = vmatmul.msk.f32.gmra.mxu1 %vm7409_vm0, %v424_v16 }
 0x109   : > { %4374 = vmatmul.msk.f32.gmra.mxu3 %vm7409_vm0, %v425_v18  ;;  %4378 = vmatmul.msk.f32.gmra.mxu1 %vm7409_vm0, %v425_v18 }
 0x13e   : > { %v4978_v22 = vpop.f32.mrf.mxu1 }
 0x146   : > { %v458_v23 = vpop.f32.mrf.mxu1 }
 0x14e   : > { %v461_v24 = vpop.f32.mrf.mxu1 }
 0x154   : > { %v4980_v25 = vpop.f32.mrf.mxu3 }
 0x156   : > { %v464_v26 = vpop.f32.mrf.mxu1 }
 0x157   : > { %596 = vrot.lane.b32.xlu2 %v464_v26, %s4781_s27  ;;  %564 = vrot.lane.b32.xlu0 %v464_v26, %s4782_s19 }
 0x15c   : > { %v4984_v27 = vpop.f32.mrf.mxu3 }
 0x15f   : > { %594 = vrot.lane.b32.xlu2 %v461_v24, %s4781_s27  ;;  %562 = vrot.lane.b32.xlu0 %v461_v24, %s4782_s19 }
 0x164   : > { %v490_v28 = vpop.f32.mrf.mxu3 }
 0x16c   : > { %v493_v29 = vpop.f32.mrf.mxu3 }
 0x16d   : > { %568 = vrot.lane.b32.xlu1 %v493_v29, %s4782_s19 }
 0x16e   : > { %v4994_v32 = vpop.f32.mrf.mxu1 }
 0x174   : > { %v4989_v30 = vpop.f32.mrf.mxu3 }
 0x175   : > { %566 = vrot.lane.b32.xlu1 %v490_v28, %s4782_s19 }
 0x176   : > { %v4997_v34 = vpop.f32.mrf.mxu1 }
 0x17c   : > { %v4992_v31 = vpop.f32.mrf.mxu3 }
 0x17e   : > { %v548_v36 = vpop.f32.mrf.mxu1 }
 0x184   : > { %v519_v33 = vpop.f32.mrf.mxu3 }
 0x185   : > { %570 = vrot.lane.b32.xlu1 %v519_v33, %s4782_s19 }
 0x186   : > { %v551_v41 = vpop.f32.mrf.mxu1 }
 0x18c   : > { %v522_v35 = vpop.f32.mrf.mxu3 }
 0x18d   : > { %600 = vrot.lane.b32.xlu1 %v493_v29, %s4781_s27  ;;  %572 = vrot.lane.b32.xlu0 %v522_v35, %s4782_s19 }
 0x195   : > { %574 = vrot.lane.b32.xlu1 %v548_v36, %s4782_s19 }
 0x19d   : > { %604 = vrot.lane.b32.xlu1 %v522_v35, %s4781_s27 }
 0x1b1   : > { %v597_v53 = vpop.permute.xlu2 %596 }
 0x1b2   : > { %v619_v54 = vadd.f32 %v597_v53, %v458_v23 }
 0x1b4   : > { %v5042_v55 = vsub.f32 0.0, %v619_v54 }
 0x1b6   : > { %vm795_vm1 = vcmp.eq.f32.partialorder %v5042_v55, 0.0 }
 0x1b7   : > { %v5046_v57 = vsel %vm795_vm1, 0.0, %v5042_v55 }
 0x1b8   : > { %v5049_v58 = vand.u32 2147483647, %v5046_v57  ;;  %vm950_vm2 = vcmp.ne.f32.partialorder %v5046_v57, %v5046_v57 }
 0x1b9   : > { %v595_v56 = vpop.permute.xlu2 %594 }
 0x1ba   : > { %vm956_vm6 = vcmp.eq.s32.totalorder %v5049_v58, inf  ;;  %v618_v11 = vadd.f32 %v595_v56, %v4978_v22 }
 0x1bc   : > { %v5089_v19 = vsub.f32 0.0, %v618_v11 }
 0x1c9   : > { %v565_v37 = vpop.permute.xlu0 %564 }
 0x1ca   : > { %v5003_v38 = vsub.f32 %v458_v23, %v565_v37 }
 0x1cc   : > { %7473 = vst [vmem:[#allocation12_spill] sm:$0xff] %v5003_v38  ;;  %820 = vrot.lane.b32.xlu2 %v5003_v38, %s4781_s27 }
 0x1d1   : > { %v563_v39 = vpop.permute.xlu0 %562 }
 0x1d2   : > { %v5008_v40 = vsub.f32 %v4978_v22, %v563_v39 }
 0x1d4   : > { %7474 = vst [vmem:[#allocation13_spill] sm:$0xff] %v5008_v40  ;;  %598 = vrot.lane.b32.xlu2 %v490_v28, %s4781_s27  ;;  %818 = vrot.lane.b32.xlu0 %v5008_v40, %s4781_s27 }
 0x1dc   : > { %576 = vrot.lane.b32.xlu0 %v551_v41, %s4782_s19 }
 0x1df   : > { %v569_v42 = vpop.permute.xlu1 %568 }
 0x1e0   : > { %v5015_v43 = vsub.f32 %v4984_v27, %v569_v42 }
 0x1e2   : > { %7475 = vst [vmem:[#allocation14_spill] sm:$0xff] %v5015_v43  ;;  %824 = vrot.lane.b32.xlu2 %v5015_v43, %s4781_s27 }
 0x1e7   : > { %v567_v44 = vpop.permute.xlu1 %566 }
 0x1e8   : > { %v5020_v45 = vsub.f32 %v4980_v25, %v567_v44 }
 0x1ea   : > { %7476 = vst [vmem:[#allocation15_spill] sm:$0xff] %v5020_v45  ;;  %602 = vrot.lane.b32.xlu2 %v519_v33, %s4781_s27  ;;  %822 = vrot.lane.b32.xlu0 %v5020_v45, %s4781_s27 }
 0x1f2   : > { %608 = vrot.lane.b32.xlu2 %v551_v41, %s4781_s27 }
 0x1f7   : > { %v571_v46 = vpop.permute.xlu1 %570 }
 0x1f8   : > { %v5027_v47 = vsub.f32 %v4989_v30, %v571_v46 }
 0x1fa   : > { %7477 = vst [vmem:[#allocation16_spill] sm:$0xff] %v5027_v47  ;;  %826 = vrot.lane.b32.xlu1 %v5027_v47, %s4781_s27 }
 0x1ff   : > { %v601_v48 = vpop.permute.xlu1 %600  ;;  %v573_v49 = vpop.permute.xlu0 %572 }
 0x200   : > { %v5032_v50 = vsub.f32 %v4992_v31, %v573_v49  ;;  %v621_v0 = vadd.f32 %v601_v48, %v4984_v27 }
 0x202   : > { %7478 = vst [vmem:[#allocation17_spill] sm:$0xff] %v5032_v50  ;;  %828 = vrot.lane.b32.xlu0 %v5032_v50, %s4781_s27  ;;  %v5073_v2 = vsub.f32 0.0, %v621_v0 }
 0x204   : > { %vm797_vm8 = vcmp.eq.f32.partialorder %v5073_v2, 0.0 }
 0x205   : > { %v5077_v9 = vsel %vm797_vm8, 0.0, %v5073_v2 }
 0x206   : > { %v5083_v15 = vand.u32 2147483647, %v5077_v9  ;;  %vm1070_vm14 = vcmp.ne.f32.partialorder %v5077_v9, %v5077_v9 }
 0x207   : > { %v575_v51 = vpop.permute.xlu1 %574 }
 0x208   : > { %v5037_v52 = vsub.f32 %v4994_v32, %v575_v51 }
 0x20a   : > { %7479 = vst [vmem:[#allocation18_spill] sm:$0xff] %v5037_v52  ;;  %830 = vrot.lane.b32.xlu2 %v5037_v52, %s4781_s27  ;;  %606 = vrot.lane.b32.xlu0 %v548_v36, %s4781_s27 }
 0x226   : > { %v5051_v59 = vpop.permute.xlu2 %820 }
 0x227   : > { %v5056_v60 = vand.u32 2147483647, %v5051_v59  ;;  %vm949_vm3 = vcmp.ne.f32.partialorder %v5051_v59, %v5051_v59 }
 0x228   : > { %vm5060_vm4 = vmor %vm949_vm3, %vm950_vm2  ;;  %vm1076_vm2 = vcmp.eq.s32.totalorder %v5083_v15, inf }
 0x229   : > { %v905_v62 = vmax.f32 %v5056_v60, %v5049_v58  ;;  %vm955_vm5 = vcmp.eq.s32.totalorder %v5056_v60, inf  ;;  %v904_v13 = vmin.f32 %v5056_v60, %v5049_v58 }
 0x22a   : > { %vm5068_vm7 = vmand %vm955_vm5, %vm956_vm6  ;;  %vm794_vm5 = vcmp.eq.f32.partialorder %v5089_v19, 0.0 }
 0x22b   : > { %4571 = vrcp.f32 %v905_v62  ;;  %v917_v6 = vand.u32 2147483648, %v905_v62  ;;  %v915_v8 = vand.u32 2147483647, %v905_v62  ;;  %vm911_vm10 = vweird.f32 %v905_v62 }
 0x22c   : > { %v5117_v28 = vsel %vm794_vm5, 0.0, %v5089_v19 }
 0x22d   : > { %v918_v12 = vor.u32 1.1754944e-38, %v917_v6  ;;  %vm916_vm12 = vcmp.eq.f32.partialorder %v915_v8, 8.507059e+37  ;;  %v5123_v37 = vand.u32 2147483647, %v5117_v28  ;;  %vm890_vm6 = vcmp.ne.f32.partialorder %v5117_v28, %v5117_v28 }
 0x22e   : > { %v599_v5 = vpop.permute.xlu2 %598 }
 0x22f   : > { %v620_v49 = vadd.f32 %v599_v5, %v4980_v25 }
 0x231   : > { %v4572_v1 = vpop.eup %4571 }
 0x232   : > { %v907_v3 = vmul.f32 %v4572_v1, %v905_v62  ;;  %vm912_vm9 = vweird.f32 %v4572_v1 }
 0x233   : > { %vm913_vm11 = vmor %vm911_vm10, %vm912_vm9 }
 0x234   : > { %v908_v4 = vsub.f32 1.0, %v907_v3 }
 0x236   : > { %v909_v7 = vmul.f32 %v4572_v1, %v908_v4  ;;  %v5147_v4 = vsub.f32 0.0, %v620_v49 }
 0x238   : > { %v910_v10 = vadd.f32 %v4572_v1, %v909_v7  ;;  %vm796_vm5 = vcmp.eq.f32.partialorder %v5147_v4, 0.0 }
 0x23a   : > { %v914_v14 = vsel %vm913_vm11, %v4572_v1, %v910_v10 }
 0x23b   : > { %v919_v16 = vsel %vm916_vm12, %v918_v12, %v914_v14  ;;  %vm896_vm12 = vcmp.eq.s32.totalorder %v5123_v37, inf }
 0x23c   : > { %v5085_v17 = vmul.f32 %v919_v16, %v904_v13  ;;  %v5087_v18 = vpop.permute.xlu2 %824 }
 0x23d   : > { %v5092_v20 = vand.u32 2147483647, %v5087_v18  ;;  %vm1069_vm13 = vcmp.ne.f32.partialorder %v5087_v18, %v5087_v18 }
 0x23e   : > { %v5100_v21 = vmul.f32 %v5085_v17, %v5085_v17  ;;  %vm5102_vm15 = vmor %vm1069_vm13, %vm1070_vm14 }
 0x23f   : > { %v1025_v23 = vmax.f32 %v5092_v20, %v5083_v15  ;;  %vm1075_vm1 = vcmp.eq.s32.totalorder %v5092_v20, inf  ;;  %v1024_v8 = vmin.f32 %v5092_v20, %v5083_v15 }
 0x240   : > { %v922_v24 = vmul.f32 0.002785687, %v5100_v21  ;;  %vm5111_vm3 = vmand %vm1075_vm1, %vm1076_vm2 }
 0x241   : > { %4573 = vrcp.f32 %v1025_v23  ;;  %v1037_v51 = vand.u32 2147483648, %v1025_v23  ;;  %v1035_v62 = vand.u32 2147483647, %v1025_v23  ;;  %vm1031_vm13 = vweird.f32 %v1025_v23 }
 0x242   : > { %v923_v27 = vadd.f32 -0.015866, %v922_v24 }
 0x243   : > { %v1038_v5 = vor.u32 1.1754944e-38, %v1037_v51  ;;  %vm1036_vm2 = vcmp.eq.f32.partialorder %v1035_v62, 8.507059e+37  ;;  %v605_v62 = vpop.permute.xlu1 %604 }
 0x244   : > { %v924_v29 = vmul.f32 %v923_v27, %v5100_v21 }
 0x246   : > { %v925_v33 = vadd.f32 0.04247222, %v924_v29  ;;  %v5120_v35 = vpop.permute.xlu0 %818 }
 0x247   : > { %v4574_v36 = vpop.eup %4573  ;;  %v5126_v39 = vand.u32 2147483647, %v5120_v35  ;;  %vm889_vm8 = vcmp.ne.f32.partialorder %v5120_v35, %v5120_v35 }
 0x248   : > { %v926_v41 = vmul.f32 %v925_v33, %v5100_v21  ;;  %v1027_v42 = vmul.f32 %v4574_v36, %v1025_v23  ;;  %vm5136_vm9 = vmor %vm889_vm8, %vm890_vm6  ;;  %vm1032_vm10 = vweird.f32 %v4574_v36 }
 0x249   : > { %v845_v44 = vmax.f32 %v5126_v39, %v5123_v37  ;;  %vm895_vm11 = vcmp.eq.s32.totalorder %v5126_v39, inf  ;;  %vm1033_vm1 = vmor %vm1031_vm13, %vm1032_vm10 }
 0x24a   : > { %v927_v46 = vadd.f32 -0.074975304, %v926_v41  ;;  %v1028_v48 = vsub.f32 1.0, %v1027_v42  ;;  %vm5143_vm14 = vmand %vm895_vm11, %vm896_vm12 }
 0x24b   : > { %4575 = vrcp.f32 %v845_v44  ;;  %v855_v29 = vand.u32 2147483647, %v845_v44  ;;  %v857_v33 = vand.u32 2147483648, %v845_v44  ;;  %vm851_vm8 = vweird.f32 %v845_v44 }
 0x24c   : > { %v928_v54 = vmul.f32 %v927_v46, %v5100_v21  ;;  %v1029_v56 = vmul.f32 %v4574_v36, %v1028_v48  ;;  %v5167_v46 = vsel %vm796_vm5, 0.0, %v5147_v4 }
 0x24d   : > { %vm856_vm11 = vcmp.eq.f32.partialorder %v855_v29, 8.507059e+37  ;;  %vm1010_vm12 = vcmp.ne.f32.partialorder %v5167_v46, %v5167_v46 }
 0x24e   : > { %v929_v0 = vadd.f32 0.1064488, %v928_v54  ;;  %v1030_v1 = vadd.f32 %v4574_v36, %v1029_v56  ;;  %v577_v3 = vpop.permute.xlu0 %576  ;;  %v844_v54 = vmin.f32 %v5126_v39, %v5123_v37  ;;  %v858_v56 = vor.u32 1.1754944e-38, %v857_v33 }
 0x24f   : > { %v5150_v6 = vsub.f32 %v4997_v34, %v577_v3 }
 0x250   : > { %v930_v7 = vmul.f32 %v929_v0, %v5100_v21  ;;  %v1034_v10 = vsel %vm1033_vm1, %v4574_v36, %v1030_v1 }
 0x251   : > { %7492 = vst [vmem:[#allocation19_spill] sm:$0xff] %v5150_v6  ;;  %v4576_v11 = vpop.eup %4575  ;;  %v1039_v12 = vsel %vm1036_vm2, %v1038_v5, %v1034_v10  ;;  %832 = vrot.lane.b32.xlu1 %v5150_v6, %s4781_s27  ;;  %v5174_v5 = vand.u32 2147483647, %v5167_v46 }
 0x252   : > { %v931_v13 = vadd.f32 -0.14207031, %v930_v7  ;;  %v5157_v14 = vmul.f32 %v1039_v12, %v1024_v8  ;;  %v847_v16 = vmul.f32 %v4576_v11, %v845_v44  ;;  %vm852_vm6 = vweird.f32 %v4576_v11  ;;  %v603_v7 = vpop.permute.xlu2 %602 }
 0x253   : > { %vm853_vm10 = vmor %vm851_vm8, %vm852_vm6  ;;  %vm1016_vm2 = vcmp.eq.s32.totalorder %v5174_v5, inf  ;;  %vm939_vm8 = vcmp.gt.f32.partialorder %v5049_v58, %v5056_v60 }
 0x254   : > { %v932_v23 = vmul.f32 %v931_v13, %v5100_v21  ;;  %v5163_v24 = vmul.f32 %v5157_v14, %v5157_v14  ;;  %v848_v27 = vsub.f32 1.0, %v847_v16  ;;  %v623_v16 = vadd.f32 %v605_v62, %v4992_v31 }
 0x256   : > { %v933_v36 = vadd.f32 0.19993454, %v932_v23  ;;  %v1042_v41 = vmul.f32 0.002785687, %v5163_v24  ;;  %v849_v42 = vmul.f32 %v4576_v11, %v848_v27  ;;  %v622_v27 = vadd.f32 %v603_v7, %v4989_v30 }
 0x257   : > { %v5209_v30 = vsub.f32 0.0, %v623_v16 }
 0x258   : > { %v934_v48 = vmul.f32 %v933_v36, %v5100_v21  ;;  %v1043_v49 = vadd.f32 -0.015866, %v1042_v41  ;;  %v850_v51 = vadd.f32 %v4576_v11, %v849_v42 }
 0x25a   : > { %v935_v0 = vadd.f32 -0.33333147, %v934_v48  ;;  %v1044_v1 = vmul.f32 %v1043_v49, %v5163_v24  ;;  %v854_v3 = vsel %vm853_vm10, %v4576_v11, %v850_v51  ;;  %vm942_vm10 = vcmp.lt.f32.partialorder %v5051_v59, 0.0 }
 0x25b   : > { %v859_v8 = vsel %vm856_vm11, %v858_v56, %v854_v3  ;;  %vm945_vm11 = vcmp.lt.s32.totalorder %v5051_v59, 0 }
 0x25c   : > { %v936_v10 = vmul.f32 %v935_v0, %v5100_v21  ;;  %v1045_v12 = vadd.f32 0.04247222, %v1044_v1  ;;  %v5177_v44 = vmul.f32 %v859_v8, %v844_v54  ;;  %v5179_v13 = vpop.permute.xlu0 %822  ;;  %v5217_v54 = vsub.f32 0.0, %v622_v27 }
 0x25d   : > { %v5185_v11 = vand.u32 2147483647, %v5179_v13  ;;  %vm1009_vm13 = vcmp.ne.f32.partialorder %v5179_v13, %v5179_v13  ;;  %v7406_v8 = vmov 0.0  }
 0x25e   : > { %v937_v23 = vmul.f32 %v936_v10, %v5085_v17  ;;  %v1046_v21 = vmul.f32 %v1045_v12, %v5163_v24  ;;  %v5194_v29 = vmul.f32 %v5177_v44, %v5177_v44  ;;  %vm5196_vm1 = vmor %vm1009_vm13, %vm1010_vm12  ;;  %vm947_vm12 = vcmp.eq.f32.partialorder %v5046_v57, 0.0 }
 0x25f   : > { %v5202_v33 = vmax.f32 %v5185_v11, %v5174_v5  ;;  %vm1015_vm5 = vcmp.eq.s32.totalorder %v5185_v11, inf  ;;  %vm799_vm13 = vcmp.eq.f32.partialorder %v5209_v30, 0.0  ;;  %v946_v10 = vsel %vm945_vm11, 3.1415927, %v7406_v8 }
 0x260   : > { %v938_v36 = vadd.f32 %v937_v23, %v5085_v17  ;;  %v1047_v41 = vadd.f32 -0.074975304, %v1046_v21  ;;  %v862_v42 = vmul.f32 0.002785687, %v5194_v29  ;;  %vm5212_vm6 = vmand %vm1015_vm5, %vm1016_vm2  ;;  %vm798_vm2 = vcmp.eq.f32.partialorder %v5217_v54, 0.0 }
 0x261   : > { %4577 = vrcp.f32 %v5202_v33  ;;  %v7398_v12 = vmov 0.7853982  }
 0x262   : > { %v940_v49 = vsub.f32 1.5707964, %v938_v36  ;;  %v1048_v51 = vmul.f32 %v1047_v41, %v5163_v24  ;;  %v863_v17 = vadd.f32 -0.015866, %v862_v42  ;;  %v954_v16 = vsel %vm942_vm10, 2.3561945, %v7398_v12 }
 0x263   : > { %v5249_v42 = vsel %vm798_vm2, 0.0, %v5217_v54 }
 0x264   : > { %v941_v56 = vsel %vm939_vm8, %v940_v49, %v938_v36  ;;  %v1049_v62 = vadd.f32 0.1064488, %v1048_v51  ;;  %v864_v0 = vmul.f32 %v863_v17, %v5194_v29  ;;  %v5265_v63 = vand.u32 2147483647, %v5249_v42 }
 0x265   : > { %v943_v1 = vsub.f32 3.1415927, %v941_v56 }
 0x266   : > { %v1050_v58 = vmul.f32 %v1049_v62, %v5163_v24  ;;  %v865_v60 = vadd.f32 0.04247222, %v864_v0  ;;  %v977_v62 = vand.u32 2147483648, %v5202_v33 }
 0x267   : > { %v4578_v3 = vpop.eup %4577  ;;  %v944_v7 = vsel %vm942_vm10, %v943_v1, %v941_v56  ;;  %v975_v56 = vand.u32 2147483647, %v5202_v33  ;;  %vm1062_vm10 = vcmp.lt.f32.partialorder %v5087_v18, 0.0 }
 0x268   : > { %v948_v23 = vsel %vm947_vm12, %v946_v10, %v944_v7  ;;  %v1051_v21 = vadd.f32 -0.14207031, %v1050_v58  ;;  %v866_v27 = vmul.f32 %v865_v60, %v5194_v29  ;;  %v967_v36 = vmul.f32 %v4578_v3, %v5202_v33 }
 0x269   : > { %v952_v41 = vsel %vm5060_vm4, nan, %v948_v23  ;;  %vm972_vm5 = vweird.f32 %v4578_v3  ;;  %v5262_v7 = vsel %vm799_vm13, 0.0, %v5209_v30  ;;  %vm971_vm4 = vweird.f32 %v5202_v33 }
 0x26a   : > { %v1052_v59 = vmul.f32 %v1051_v21, %v5163_v24  ;;  %v867_v49 = vadd.f32 -0.074975304, %v866_v27  ;;  %v968_v51 = vsub.f32 1.0, %v967_v36  ;;  %v958_v17 = vsel %vm5068_vm7, %v954_v16, %v952_v41  ;;  %v5272_v27 = vpop.permute.xlu2 %608  ;;  %vm973_vm7 = vmor %vm971_vm4, %vm972_vm5 }
 0x26b   : > { %v959_v60 = vand.u32 2147483647, %v958_v17  ;;  %v960_v16 = vand.u32 2147483648, %v5046_v57  ;;  %v964_v41 = vmin.f32 %v5185_v11, %v5174_v5  ;;  %vm976_vm8 = vcmp.eq.f32.partialorder %v975_v56, 8.507059e+37 }
 0x26c   : > { %v1053_v0 = vadd.f32 0.19993454, %v1052_v59  ;;  %v868_v1 = vmul.f32 %v867_v49, %v5194_v29  ;;  %v969_v61 = vmul.f32 %v4578_v3, %v968_v51  ;;  %v5257_v58 = vpop.permute.xlu1 %826  ;;  %v978_v59 = vor.u32 1.1754944e-38, %v977_v62 }
 0x26d   : > { %v5268_v10 = vand.u32 2147483647, %v5257_v58  ;;  %v5289_v56 = vand.u32 2147483647, %v5262_v7  ;;  %vm1136_vm12 = vcmp.eq.s32.totalorder %v5265_v63, inf  ;;  %vm1065_vm13 = vcmp.lt.s32.totalorder %v5087_v18, 0 }
 0x26e   : > { %v1054_v23 = vmul.f32 %v1053_v0, %v5163_v24  ;;  %v869_v21 = vadd.f32 0.1064488, %v868_v1  ;;  %v970_v36 = vadd.f32 %v4578_v3, %v969_v61  ;;  %v961_v0 = vor.u32 %v960_v16, %v959_v60 }
 0x26f   : > { %v5280_v49 = vmax.f32 %v5268_v10, %v5265_v63  ;;  %vm1135_vm11 = vcmp.eq.s32.totalorder %v5268_v10, inf  ;;  %vm1067_vm5 = vcmp.eq.f32.partialorder %v5077_v9, 0.0  ;;  %vm1190_vm4 = vcmp.ne.f32.partialorder %v5262_v7, %v5262_v7 }
 0x270   : > { %v1055_v57 = vadd.f32 -0.33333147, %v1054_v23  ;;  %v870_v51 = vmul.f32 %v869_v21, %v5194_v29  ;;  %v974_v17 = vsel %vm973_vm7, %v4578_v3, %v970_v36  ;;  %1372 = vrot.lane.b32.xlu0 %v961_v0, %s4782_s19  ;;  %vm5303_vm2 = vmand %vm1135_vm11, %vm1136_vm12  ;;  %v1066_v0 = vsel %vm1065_vm13, 3.1415927, %v7406_v8 }
 0x271   : > { %v979_v1 = vsel %vm976_vm8, %v978_v59, %v974_v17  ;;  %4579 = vrcp.f32 %v5280_v49  ;;  %vm885_vm8 = vcmp.lt.s32.totalorder %v5120_v35, 0  ;;  %vm1196_vm12 = vcmp.eq.s32.totalorder %v5289_v56, inf }
 0x272   : > { %v1056_v33 = vmul.f32 %v1055_v57, %v5163_v24  ;;  %v871_v61 = vadd.f32 -0.14207031, %v870_v51  ;;  %v5285_v12 = vmul.f32 %v979_v1, %v964_v41  ;;  %v5319_v57 = vpop.permute.xlu2 %830  ;;  %v7501_v1 = vmov 0.7853982  }
 0x273   : > { %v5341_v52 = vsel %vm885_vm8, 3.1415927, %v7406_v8  ;;  %v5344_v50 = vand.u32 2147483647, %v5319_v57  ;;  %vm1091_vm0 = vweird.f32 %v5280_v49  ;;  %v625_v16 = vadd.f32 %v5272_v27, %v4997_v34 }
 0x274   : > { %v1057_v3 = vmul.f32 %v1056_v33, %v5157_v14  ;;  %v872_v24 = vmul.f32 %v871_v61, %v5194_v29  ;;  %v5299_v62 = vmul.f32 %v5285_v12, %v5285_v12  ;;  %v5301_v60 = vpop.permute.xlu0 %828  ;;  %v1200_v34 = vand.u32 2147483648, %v5262_v7 }
 0x275   : > { %v5311_v23 = vand.u32 2147483647, %v5301_v60  ;;  %vm1189_vm7 = vcmp.ne.f32.partialorder %v5301_v60, %v5301_v60 }
 0x276   : > { %v1058_v36 = vadd.f32 %v1057_v3, %v5157_v14  ;;  %v873_v41 = vadd.f32 0.19993454, %v872_v24  ;;  %v982_v59 = vmul.f32 0.002785687, %v5299_v62  ;;  %vm5321_vm11 = vmor %vm1189_vm7, %vm1190_vm4  ;;  %v1074_v14 = vsel %vm1062_vm10, 2.3561945, %v7501_v1 }
 0x277   : > { %v4580_v17 = vpop.eup %4579  ;;  %v5333_v33 = vmax.f32 %v5311_v23, %v5289_v56  ;;  %vm1059_vm4 = vcmp.gt.f32.partialorder %v5083_v15, %v5092_v20  ;;  %v1097_v15 = vand.u32 2147483648, %v5280_v49  ;;  %vm1195_vm7 = vcmp.eq.s32.totalorder %v5311_v23, inf }
 0x278   : > { %v1060_v61 = vsub.f32 1.5707964, %v1058_v36  ;;  %v874_v3 = vmul.f32 %v873_v41, %v5194_v29  ;;  %v983_v24 = vadd.f32 -0.015866, %v982_v59  ;;  %v1087_v21 = vmul.f32 %v4580_v17, %v5280_v49 }
 0x279   : > { %4581 = vrcp.f32 %v5333_v33  ;;  %v1095_v59 = vand.u32 2147483647, %v5280_v49  ;;  %vm1092_vm8 = vweird.f32 %v4580_v17 }
 0x27a   : > { %v1061_v6 = vsel %vm1059_vm4, %v1060_v61, %v1058_v36  ;;  %v875_v40 = vadd.f32 -0.33333147, %v874_v3  ;;  %v984_v47 = vmul.f32 %v983_v24, %v5299_v62  ;;  %v1088_v43 = vsub.f32 1.0, %v1087_v21  ;;  %vm5356_vm4 = vmand %vm1195_vm7, %vm1196_vm12 }
 0x27b   : > { %v1063_v41 = vsub.f32 3.1415927, %v1061_v6  ;;  %v1084_v3 = vmin.f32 %v5268_v10, %v5265_v63  ;;  %vm882_vm12 = vcmp.lt.f32.partialorder %v5120_v35, 0.0  ;;  %vm1093_vm7 = vmor %vm1091_vm0, %vm1092_vm8  ;;  %vm1096_vm13 = vcmp.eq.f32.partialorder %v1095_v59, 8.507059e+37 }
 0x27c   : > { %v876_v20 = vmul.f32 %v875_v40, %v5194_v29  ;;  %v985_v8 = vadd.f32 0.04247222, %v984_v47  ;;  %v1089_v45 = vmul.f32 %v4580_v17, %v1088_v43  ;;  %v607_v36 = vpop.permute.xlu0 %606  ;;  %v653_v35 = vmul.f32 %v5073_v2, %v5073_v2 }
 0x27d   : > { %v1064_v61 = vsel %vm1062_vm10, %v1063_v41, %v1061_v6  ;;  %v624_v40 = vadd.f32 %v607_v36, %v4994_v32  ;;  %vm887_vm10 = vcmp.eq.f32.partialorder %v5117_v28, 0.0  ;;  %v1098_v32 = vor.u32 1.1754944e-38, %v1097_v15 }
 0x27e   : > { %v1068_v43 = vsel %vm1067_vm5, %v1066_v0, %v1064_v61  ;;  %v877_v47 = vmul.f32 %v876_v20, %v5177_v44  ;;  %v986_v29 = vmul.f32 %v985_v8, %v5299_v62  ;;  %v1090_v24 = vadd.f32 %v4580_v17, %v1089_v45 }
 0x27f   : > { %v4582_v38 = vpop.eup %4581  ;;  %v1072_v18 = vsel %vm5102_vm15, nan, %v1068_v43  ;;  %v5375_v6 = vsub.f32 0.0, %v624_v40  ;;  %v1155_v45 = vand.u32 2147483647, %v5333_v33  ;;  %vm7504_vm15 = vcmp.gt.f32.partialorder %v5123_v37, %v5126_v39 }
 0x280   : > { %v878_v49 = vadd.f32 %v877_v47, %v5177_v44  ;;  %v987_v0 = vadd.f32 -0.074975304, %v986_v29  ;;  %v1094_v41 = vsel %vm1093_vm7, %v4580_v17, %v1090_v24  ;;  %v1147_v20 = vmul.f32 %v4582_v38, %v5333_v33 }
 0x281   : > { %v1099_v8 = vsel %vm1096_vm13, %v1098_v32, %v1094_v41  ;;  %vm800_vm5 = vcmp.eq.f32.partialorder %v5375_v6, 0.0  ;;  %v1078_v22 = vsel %vm5111_vm3, %v1074_v14, %v1072_v18  ;;  %vm1152_vm0 = vweird.f32 %v4582_v38 }
 0x282   : > { %v880_v36 = vsub.f32 1.5707964, %v878_v49  ;;  %v988_v59 = vmul.f32 %v987_v0, %v5299_v62  ;;  %v5384_v15 = vmul.f32 %v1099_v8, %v1084_v3  ;;  %v1148_v61 = vsub.f32 1.0, %v1147_v20 }
 0x283   : > { %v1157_v44 = vand.u32 2147483648, %v5333_v33  ;;  %v5388_v17 = vsel %vm800_vm5, 0.0, %v5375_v6  ;;  %v1079_v40 = vand.u32 2147483647, %v1078_v22  ;;  %v1144_v29 = vmin.f32 %v5311_v23, %v5289_v56 }
 0x284   : > { %v881_v43 = vsel %vm7504_vm15, %v880_v36, %v878_v49  ;;  %v989_v47 = vadd.f32 0.1064488, %v988_v59  ;;  %v5395_v26 = vmul.f32 %v5384_v15, %v5384_v15  ;;  %v1149_v14 = vmul.f32 %v4582_v38, %v1148_v61 }
 0x285   : > { %v883_v3 = vsub.f32 3.1415927, %v881_v43  ;;  %vm1151_vm3 = vweird.f32 %v5333_v33  ;;  %v5401_v24 = vand.u32 2147483647, %v5388_v17  ;;  %v7505_v32 = vand.u32 2147483648, %v5077_v9 }
 0x286   : > { %v990_v18 = vmul.f32 %v989_v47, %v5299_v62  ;;  %v1102_v37 = vmul.f32 0.002785687, %v5395_v26  ;;  %v1150_v39 = vadd.f32 %v4582_v38, %v1149_v14  ;;  %vm1153_vm13 = vmor %vm1151_vm3, %vm1152_vm0  ;;  %vm1156_vm8 = vcmp.eq.f32.partialorder %v1155_v45, 8.507059e+37 }
 0x287   : > { %v1081_v49 = vor.u32 %v7505_v32, %v1079_v40  ;;  %v884_v0 = vsel %vm882_vm12, %v883_v3, %v881_v43  ;;  %v1158_v41 = vor.u32 1.1754944e-38, %v1157_v44  ;;  %v1205_v33 = vmax.f32 %v5344_v50, %v5401_v24 }
 0x288   : > { %v888_v20 = vsel %vm887_vm10, %v5341_v52, %v884_v0  ;;  %v991_v8 = vadd.f32 -0.14207031, %v990_v18  ;;  %v1103_v22 = vadd.f32 -0.015866, %v1102_v37  ;;  %v1154_v36 = vsel %vm1153_vm13, %v4582_v38, %v1150_v39 }
 0x289   : > { %1376 = vrot.lane.b32.xlu2 %v1081_v49, %s4782_s19  ;;  %v892_v9 = vsel %vm5136_vm9, nan, %v888_v20  ;;  %v1159_v59 = vsel %vm1156_vm8, %v1158_v41, %v1154_v36  ;;  %4583 = vrcp.f32 %v1205_v33  ;;  %v894_v45 = vsel %vm882_vm12, 2.3561945, %v7501_v1 }
 0x28a   : > { %v992_v61 = vmul.f32 %v991_v8, %v5299_v62  ;;  %v1104_v44 = vmul.f32 %v1103_v22, %v5395_v26  ;;  %v5423_v40 = vmul.f32 %v1159_v59, %v1144_v29  ;;  %v898_v38 = vsel %vm5143_vm14, %v894_v45, %v892_v9 }
 0x28b   : > { %vm1255_vm10 = vcmp.eq.s32.totalorder %v5344_v50, inf  ;;  %vm1256_vm7 = vcmp.eq.s32.totalorder %v5401_v24, inf  ;;  %v899_v47 = vand.u32 2147483647, %v898_v38  ;;  %v900_v14 = vand.u32 2147483648, %v5117_v28 }
 0x28c   : > { %v993_v52 = vadd.f32 0.19993454, %v992_v61  ;;  %v1105_v53 = vadd.f32 0.04247222, %v1104_v44  ;;  %v5431_v43 = vmul.f32 %v5423_v40, %v5423_v40  ;;  %vm5433_vm9 = vmand %vm1255_vm10, %vm1256_vm7  ;;  %v1215_v22 = vand.u32 2147483647, %v1205_v33 }
 0x28d   : > { %v901_v37 = vor.u32 %v900_v14, %v899_v47  ;;  %v1217_v36 = vand.u32 2147483648, %v1205_v33  ;;  %vm1211_vm12 = vweird.f32 %v1205_v33  ;;  %vm999_vm15 = vcmp.gt.f32.partialorder %v5174_v5, %v5185_v11 }
 0x28e   : > { %v994_v25 = vmul.f32 %v993_v52, %v5299_v62  ;;  %v1106_v3 = vmul.f32 %v1105_v53, %v5395_v26  ;;  %v1162_v29 = vmul.f32 0.002785687, %v5431_v43  ;;  %v1204_v53 = vmin.f32 %v5344_v50, %v5401_v24 }
 0x28f   : > { %v4584_v18 = vpop.eup %4583  ;;  %1370 = vrot.lane.b32.xlu1 %v901_v37, %s4782_s19  ;;  %vm1216_vm0 = vcmp.eq.f32.partialorder %v1215_v22, 8.507059e+37  ;;  %v1218_v47 = vor.u32 1.1754944e-38, %v1217_v36  ;;  %vm1005_vm3 = vcmp.lt.s32.totalorder %v5179_v13, 0  ;;  %vm1002_vm13 = vcmp.lt.f32.partialorder %v5179_v13, 0.0 }
 0x290   : > { %v995_v39 = vadd.f32 -0.33333147, %v994_v25  ;;  %v1107_v32 = vadd.f32 -0.074975304, %v1106_v3  ;;  %v1163_v49 = vadd.f32 -0.015866, %v1162_v29  ;;  %v1207_v0 = vmul.f32 %v4584_v18, %v1205_v33 }
 0x291   : > { %vm1212_vm14 = vweird.f32 %v4584_v18  ;;  %vm1007_vm8 = vcmp.eq.f32.partialorder %v5167_v46, 0.0  ;;  %v7508_v11 = vmov 0.0   ;;  %vm1129_vm10 = vcmp.ne.f32.partialorder %v5257_v58, %v5257_v58 }
 0x292   : > { %v996_v41 = vmul.f32 %v995_v39, %v5299_v62  ;;  %v1108_v20 = vmul.f32 %v1107_v32, %v5395_v26  ;;  %v1164_v28 = vmul.f32 %v1163_v49, %v5431_v43  ;;  %v1208_v8 = vsub.f32 1.0, %v1207_v0  ;;  %vm1213_vm5 = vmor %vm1211_vm12, %vm1212_vm14 }
 0x293   : > { %vm1122_vm7 = vcmp.lt.f32.partialorder %v5257_v58, 0.0  ;;  %vm1127_vm14 = vcmp.eq.f32.partialorder %v5249_v42, 0.0  ;;  %vm1130_vm12 = vcmp.ne.f32.partialorder %v5249_v42, %v5249_v42 }
 0x294   : > { %v997_v9 = vmul.f32 %v996_v41, %v5285_v12  ;;  %v1109_v59 = vadd.f32 0.1064488, %v1108_v20  ;;  %v1165_v45 = vadd.f32 0.04247222, %v1164_v28  ;;  %v1209_v61 = vmul.f32 %v4584_v18, %v1208_v8 }
 0x295   : > { %v1006_v20 = vsel %vm1005_vm3, 3.1415927, %v7508_v11  ;;  %vm1182_vm3 = vcmp.lt.f32.partialorder %v5301_v60, 0.0 }
 0x296   : > { %v998_v44 = vadd.f32 %v997_v9, %v5285_v12  ;;  %v1110_v38 = vmul.f32 %v1109_v59, %v5395_v26  ;;  %v1166_v62 = vmul.f32 %v1165_v45, %v5431_v43  ;;  %v1210_v52 = vadd.f32 %v4584_v18, %v1209_v61 }
 0x297   : > { %v1014_v9 = vsel %vm1002_vm13, 2.3561945, %v7501_v1 }
 0x298   : > { %v1000_v14 = vsub.f32 1.5707964, %v998_v44  ;;  %v1111_v25 = vadd.f32 -0.14207031, %v1110_v38  ;;  %v1167_v3 = vadd.f32 -0.074975304, %v1166_v62  ;;  %v1214_v29 = vsel %vm1213_vm5, %v4584_v18, %v1210_v52  ;;  %vm1131_vm5 = vmor %vm1129_vm10, %vm1130_vm12 }
 0x299   : > { %v1219_v12 = vsel %vm1216_vm0, %v1218_v47, %v1214_v29  ;;  %v1020_v62 = vand.u32 2147483648, %v5167_v46  ;;  %vm1179_vm0 = vcmp.gt.f32.partialorder %v5289_v56, %v5311_v23 }
 0x29a   : > { %v1001_v33 = vsel %vm999_vm15, %v1000_v14, %v998_v44  ;;  %v1112_v37 = vmul.f32 %v1111_v25, %v5395_v26  ;;  %v1168_v39 = vmul.f32 %v1167_v3, %v5431_v43  ;;  %v5456_v32 = vmul.f32 %v1219_v12, %v1204_v53 }
 0x29b   : > { %v1003_v49 = vsub.f32 3.1415927, %v1001_v33  ;;  %vm1185_vm15 = vcmp.lt.s32.totalorder %v5301_v60, 0 }
 0x29c   : > { %v1113_v0 = vadd.f32 0.19993454, %v1112_v37  ;;  %v1169_v41 = vadd.f32 0.1064488, %v1168_v39  ;;  %v5461_v18 = vmul.f32 %v5456_v32, %v5456_v32  ;;  %v1186_v56 = vsel %vm1185_vm15, 3.1415927, %v7508_v11 }
 0x29d   : > { %v1004_v5 = vsel %vm1002_vm13, %v1003_v49, %v1001_v33  ;;  %vm1187_vm13 = vcmp.eq.f32.partialorder %v5262_v7, 0.0 }
 0x29e   : > { %v1008_v28 = vsel %vm1007_vm8, %v1006_v20, %v1004_v5  ;;  %v1114_v8 = vmul.f32 %v1113_v0, %v5395_v26  ;;  %v1170_v22 = vmul.f32 %v1169_v41, %v5431_v43  ;;  %v1222_v36 = vmul.f32 0.002785687, %v5461_v18 }
 0x29f   : > { %v1012_v13 = vsel %vm5196_vm1, nan, %v1008_v28  ;;  %vm1119_vm1 = vcmp.gt.f32.partialorder %v5265_v63, %v5268_v10  ;;  %vm1250_vm8 = vcmp.ne.f32.partialorder %v5388_v17, %v5388_v17 }
 0x2a0   : > { %v1115_v59 = vadd.f32 -0.33333147, %v1114_v8  ;;  %v1171_v45 = vadd.f32 -0.14207031, %v1170_v22  ;;  %v1018_v61 = vsel %vm5212_vm6, %v1014_v9, %v1012_v13  ;;  %v1223_v44 = vadd.f32 -0.015866, %v1222_v36 }
 0x2a1   : > { %v1019_v38 = vand.u32 2147483647, %v1018_v61  ;;  %vm1125_vm6 = vcmp.lt.s32.totalorder %v5257_v58, 0  ;;  %v1134_v58 = vsel %vm1122_vm7, 2.3561945, %v7501_v1  ;;  %v1140_v9 = vand.u32 2147483648, %v5249_v42 }
 0x2a2   : > { %v1116_v52 = vmul.f32 %v1115_v59, %v5395_v26  ;;  %v1172_v53 = vmul.f32 %v1171_v45, %v5431_v43  ;;  %v1224_v47 = vmul.f32 %v1223_v44, %v5461_v18  ;;  %v1126_v10 = vsel %vm1125_vm6, 3.1415927, %v7508_v11 }
 0x2a3   : > { %v1021_v14 = vor.u32 %v1020_v62, %v1019_v38 }
 0x2a4   : > { %v1117_v31 = vmul.f32 %v1116_v52, %v5384_v15  ;;  %v1173_v25 = vadd.f32 0.19993454, %v1172_v53  ;;  %v1225_v3 = vadd.f32 0.04247222, %v1224_v47  ;;  %v1194_v52 = vsel %vm1182_vm3, 2.3561945, %v7501_v1 }
 0x2a5   : > { %1374 = vrot.lane.b32.xlu0 %v1021_v14, %s4782_s19  ;;  %v633_v47 = vsub.f32 0.0, %v625_v16  ;;  %v5600_v16 = vld [vmem:[%s5228_s30] ss:$0 sm:$0xff] }
 0x2a6   : > { %v1118_v48 = vadd.f32 %v1117_v31, %v5384_v15  ;;  %v1174_v29 = vmul.f32 %v1173_v25, %v5431_v43  ;;  %v1226_v12 = vmul.f32 %v1225_v3, %v5461_v18  ;;  %v651_v31 = vmul.f32 %v5042_v55, %v5042_v55 }
 0x2a8   : > { %v1120_v46 = vsub.f32 1.5707964, %v1118_v48  ;;  %v1175_v33 = vadd.f32 -0.33333147, %v1174_v29  ;;  %v1227_v26 = vadd.f32 -0.074975304, %v1226_v12 }
 0x2aa   : > { %v1121_v37 = vsel %vm1119_vm1, %v1120_v46, %v1118_v48  ;;  %v1176_v39 = vmul.f32 %v1175_v33, %v5431_v43  ;;  %v1228_v49 = vmul.f32 %v1227_v26, %v5461_v18  ;;  %vm1242_vm1 = vcmp.lt.f32.partialorder %v5319_v57, 0.0 }
 0x2ab   : > { %v1123_v0 = vsub.f32 3.1415927, %v1121_v37 }
 0x2ac   : > { %v1177_v15 = vmul.f32 %v1176_v39, %v5423_v40  ;;  %v1229_v41 = vadd.f32 0.1064488, %v1228_v49 }
 0x2ad   : > { %v1124_v63 = vsel %vm1122_vm7, %v1123_v0, %v1121_v37  ;;  %vm1249_vm7 = vcmp.ne.f32.partialorder %v5319_v57, %v5319_v57  ;;  %v1254_v37 = vsel %vm1242_vm1, 2.3561945, %v7501_v1 }
 0x2ae   : > { %v1128_v43 = vsel %vm1127_vm14, %v1126_v10, %v1124_v63  ;;  %v1178_v5 = vadd.f32 %v1177_v15, %v5423_v40  ;;  %v1230_v20 = vmul.f32 %v1229_v41, %v5461_v18  ;;  %vm1247_vm14 = vcmp.eq.f32.partialorder %v5388_v17, 0.0 }
 0x2af   : > { %v1132_v28 = vsel %vm1131_vm5, nan, %v1128_v43  ;;  %vm1251_vm5 = vmor %vm1249_vm7, %vm1250_vm8  ;;  %v1260_v15 = vand.u32 2147483648, %v5388_v17  ;;  %v657_v41 = vmul.f32 %v633_v47, %v633_v47 }
 0x2b0   : > { %v1180_v8 = vsub.f32 1.5707964, %v1178_v5  ;;  %v1138_v22 = vsel %vm5303_vm2, %v1134_v58, %v1132_v28  ;;  %v1231_v36 = vadd.f32 -0.14207031, %v1230_v20  ;;  %vm801_vm2 = vcmp.eq.f32.partialorder %v633_v47, 0.0 }
 0x2b1   : > { %v1139_v13 = vand.u32 2147483647, %v1138_v22  ;;  %v5525_v21 = vsel %vm801_vm2, 0.0, %v633_v47 }
 0x2b2   : > { %v1181_v59 = vsel %vm1179_vm0, %v1180_v8, %v1178_v5  ;;  %v1232_v40 = vmul.f32 %v1231_v36, %v5461_v18  ;;  %v5531_v55 = vand.u32 2147483647, %v5525_v21  ;;  %vm1310_vm6 = vcmp.ne.f32.partialorder %v5525_v21, %v5525_v21 }
 0x2b3   : > { %v1183_v45 = vsub.f32 3.1415927, %v1181_v59  ;;  %v1141_v61 = vor.u32 %v1140_v9, %v1139_v13  ;;  %v654_v9 = vmul.f32 %v5217_v54, %v5217_v54 }
 0x2b4   : > { %v1233_v44 = vadd.f32 0.19993454, %v1232_v40  ;;  %vm1316_vm15 = vcmp.eq.s32.totalorder %v5531_v55, inf }
 0x2b5   : > { %v1184_v38 = vsel %vm1182_vm3, %v1183_v45, %v1181_v59  ;;  %1378 = vrot.lane.b32.xlu2 %v1141_v61, %s4782_s19  ;;  %v5593_v45 = vld [vmem:[%s5228_s30 + $0x1] ss:$0 sm:$0xff] }
 0x2b6   : > { %v1188_v42 = vsel %vm1187_vm13, %v1186_v56, %v1184_v38  ;;  %v1234_v23 = vmul.f32 %v1233_v44, %v5461_v18  ;;  %v5597_v44 = vld [vmem:[%s5242_s7 + $0x1] ss:$0 sm:$0xff] }
 0x2b7   : > { %v1192_v62 = vsel %vm5321_vm11, nan, %v1188_v42  ;;  %vm1239_vm11 = vcmp.gt.f32.partialorder %v5401_v24, %v5344_v50 }
 0x2b8   : > { %v1198_v60 = vsel %vm5356_vm4, %v1194_v52, %v1192_v62  ;;  %v1235_v53 = vadd.f32 -0.33333147, %v1234_v23  ;;  %vm1245_vm4 = vcmp.lt.s32.totalorder %v5319_v57, 0  ;;  %v5604_v23 = vld [vmem:[%s5242_s7] ss:$0 sm:$0xff] }
 0x2b9   : > { %v1199_v14 = vand.u32 2147483647, %v1198_v60  ;;  %v1246_v24 = vsel %vm1245_vm4, 3.1415927, %v7508_v11 }
 0x2ba   : > { %v1236_v27 = vmul.f32 %v1235_v53, %v5461_v18 }
 0x2bb   : > { %v1201_v25 = vor.u32 %v1200_v34, %v1199_v14 }
 0x2bc   : > { %v1237_v3 = vmul.f32 %v1236_v27, %v5456_v32 }
 0x2bd   : > { %668 = vrot.lane.b32.xlu2 %v651_v31, %s4782_s19  ;;  %1380 = vrot.lane.b32.xlu1 %v1201_v25, %s4782_s19 }
 0x2be   : > { %v1238_v51 = vadd.f32 %v1237_v3, %v5456_v32  ;;  %v652_v32 = vmul.f32 %v5147_v4, %v5147_v4 }
 0x2c0   : > { %v1240_v48 = vsub.f32 1.5707964, %v1238_v51 }
 0x2c2   : > { %v1241_v7 = vsel %vm1239_vm11, %v1240_v48, %v1238_v51 }
 0x2c3   : > { %v5535_v18 = vpop.permute.xlu1 %832  ;;  %v1243_v29 = vsub.f32 3.1415927, %v1241_v7 }
 0x2c4   : > { %v5543_v50 = vand.u32 2147483647, %v5535_v18  ;;  %vm1309_vm10 = vcmp.ne.f32.partialorder %v5535_v18, %v5535_v18  ;;  %vm1305_vm4 = vcmp.lt.s32.totalorder %v5535_v18, 0 }
 0x2c5   : > { %vm5551_vm12 = vmor %vm1309_vm10, %vm1310_vm6  ;;  %670 = vrot.lane.b32.xlu2 %v652_v32, %s4782_s19  ;;  %v1244_v12 = vsel %vm1242_vm1, %v1243_v29, %v1241_v7 }
 0x2c6   : > { %v1265_v46 = vmax.f32 %v5543_v50, %v5531_v55  ;;  %v1248_v33 = vsel %vm1247_vm14, %v1246_v24, %v1244_v12  ;;  %vm1315_vm0 = vcmp.eq.s32.totalorder %v5543_v50, inf  ;;  %v1264_v8 = vmin.f32 %v5543_v50, %v5531_v55 }
 0x2c7   : > { %v1252_v26 = vsel %vm1251_vm5, nan, %v1248_v33  ;;  %vm5568_vm3 = vmand %vm1315_vm0, %vm1316_vm15  ;;  %vm1299_vm10 = vcmp.gt.f32.partialorder %v5531_v55, %v5543_v50  ;;  %vm1302_vm0 = vcmp.lt.f32.partialorder %v5535_v18, 0.0  ;;  %vm1307_vm15 = vcmp.eq.f32.partialorder %v5525_v21, 0.0 }
 0x2c8   : > { %4585 = vrcp.f32 %v1265_v46  ;;  %v1258_v49 = vsel %vm5433_vm9, %v1254_v37, %v1252_v26  ;;  %v1277_v5 = vand.u32 2147483648, %v1265_v46  ;;  %v1275_v28 = vand.u32 2147483647, %v1265_v46 }
 0x2c9   : > { %v1259_v0 = vand.u32 2147483647, %v1258_v49  ;;  %vm1271_vm9 = vweird.f32 %v1265_v46 }
 0x2ca   : > { %v1278_v17 = vor.u32 1.1754944e-38, %v1277_v5  ;;  %vm1276_vm11 = vcmp.eq.f32.partialorder %v1275_v28, 8.507059e+37  ;;  %v7428_v28 = vmov 683565275  }
 0x2cb   : > { %v1261_v63 = vor.u32 %v1260_v15, %v1259_v0 }
 0x2cd   : > { %680 = vrot.lane.b32.xlu2 %v657_v41, %s4782_s19  ;;  %1382 = vrot.lane.b32.xlu1 %v1261_v63, %s4782_s19 }
 0x2ce   : > { %v4586_v10 = vpop.eup %4585 }
 0x2cf   : > { %v1267_v57 = vmul.f32 %v4586_v10, %v1265_v46  ;;  %vm1272_vm13 = vweird.f32 %v4586_v10  ;;  %v5624_v46 = vsel %vm1305_vm4, 3.1415927, %v7508_v11 }
 0x2d0   : > { %vm1273_vm2 = vmor %vm1271_vm9, %vm1272_vm13 }
 0x2d1   : > { %v1268_v43 = vsub.f32 1.0, %v1267_v57 }
 0x2d3   : > { %v1269_v20 = vmul.f32 %v4586_v10, %v1268_v43 }
 0x2d5   : > { %v1270_v58 = vadd.f32 %v4586_v10, %v1269_v20  ;;  %672 = vrot.lane.b32.xlu1 %v653_v35, %s4782_s19 }
 0x2d7   : > { %v1274_v22 = vsel %vm1273_vm2, %v4586_v10, %v1270_v58  ;;  %v7422_v58 = vmov 2475754826  }
 0x2d8   : > { %v1279_v36 = vsel %vm1276_vm11, %v1278_v17, %v1274_v22 }
 0x2d9   : > { %v5582_v13 = vmul.f32 %v1279_v36, %v1264_v8  ;;  %v7420_v8 = vmov 2131351028  }
 0x2db   : > { %v5586_v2 = vmul.f32 %v5582_v13, %v5582_v13 }
 0x2dd   : > { %v1282_v59 = vmul.f32 0.002785687, %v5586_v2  ;;  %674 = vrot.lane.b32.xlu1 %v654_v9, %s4782_s19 }
 0x2df   : > { %v1283_v40 = vadd.f32 -0.015866, %v1282_v59 }
 0x2e1   : > { %v1284_v61 = vmul.f32 %v1283_v40, %v5586_v2  ;;  %v7418_v40 = vmov 2102212464  }
 0x2e2   : > { %v1373_v54 = vpop.permute.xlu0 %1372 }
 0x2e3   : > { %v1377_v38 = vpop.permute.xlu2 %1376  ;;  %v1285_v56 = vadd.f32 0.04247222, %v1284_v61  ;;  %v1395_v60 = vmul.f32 %v5600_v16, %v1373_v54 }
 0x2e4   : > { %v1397_v42 = vmul.f32 %v5593_v45, %v1377_v38 }
 0x2e5   : > { %v1286_v62 = vmul.f32 %v1285_v56, %v5586_v2  ;;  %v5614_v34 = vadd.f32 %v5604_v23, %v1395_v60  ;;  %v7424_v56 = vmov 920167782  }
 0x2e6   : > { %v5608_v52 = vadd.f32 %v5597_v44, %v1397_v42 }
 0x2e7   : > { %v1287_v53 = vadd.f32 -0.074975304, %v1286_v62  ;;  %v7414_v3 = vand.u32 2147483647, %v5614_v34  ;;  %v1567_v51 = vand.u32 2139095040, %v5614_v34 }
 0x2e8   : > { %v1872_v47 = vand.u32 2147483647, %v5608_v52  ;;  %v1875_v14 = vand.u32 2139095040, %v5608_v52  ;;  %v7415_v62 = vmov 1326507024  }
 0x2e9   : > { %v1288_v27 = vmul.f32 %v1287_v53, %v5586_v2  ;;  %v1568_v29 = vshrl.u32 %v1567_v51, 23  ;;  %v1571_v37 = vand.u32 8388607, %v7414_v3 }
 0x2ea   : > { %v1876_v31 = vshrl.u32 %v1875_v14, 23  ;;  %v1879_v25 = vand.u32 8388607, %v1872_v47 }
 0x2eb   : > { %v1289_v48 = vadd.f32 0.1064488, %v1288_v27  ;;  %v4382_v26 = vadd.s32 4294967169, %v1568_v29  ;;  %v1572_v57 = vor.u32 8388608, %v1571_v37 }
 0x2ec   : > { %v4388_v7 = vadd.s32 4294967169, %v1876_v31  ;;  %v1880_v32 = vor.u32 8388608, %v1879_v25 }
 0x2ed   : > { %v1290_v24 = vmul.f32 %v1289_v48, %v5586_v2  ;;  %v1574_v15 = vadd.s32 1, %v4382_v26 }
 0x2ee   : > { %v1882_v12 = vadd.s32 1, %v4388_v7  ;;  %v5626_v33 = vshll.u32 %v1880_v32, 8 }
 0x2ef   : > { %v1291_v49 = vadd.f32 -0.14207031, %v1290_v24  ;;  %vm1575_vm1 = vcmp.gt.s32.totalorder %v1574_v15, 0 }
 0x2f0   : > { %vm1883_vm8 = vcmp.gt.s32.totalorder %v1882_v12, 0  ;;  %v5632_v10 = vand.u32 65535, %v5626_v33  ;;  %v5637_v20 = vshrl.u32 %v5626_v33, 16 }
 0x2f1   : > { %v1884_v0 = vsel %vm1883_vm8, %v1882_v12, 0  ;;  %v1292_v41 = vmul.f32 %v1291_v49, %v5586_v2  ;;  %v1576_v12 = vsel %vm1575_vm1, %v1574_v15, 0 }
 0x2f2   : > { %v1886_v63 = vand.u32 31, %v1884_v0  ;;  %v5634_v11 = vshrl.u32 %v1884_v0, 5 }
 0x2f3   : > { %v1293_v43 = vadd.f32 0.19993454, %v1292_v41 }
 0x2f4   : > { %v1887_v5 = vsub.s32 32, %v1886_v63  ;;  %v1889_v35 = vshll.u32 %v7428_v28, %v1886_v63  ;;  %v1892_v17 = vshll.u32 %v7422_v58, %v1886_v63  ;;  %v1895_v22 = vshll.u32 %v7420_v8, %v1886_v63 }
 0x2f5   : > { %v1294_v36 = vmul.f32 %v1293_v43, %v5586_v2  ;;  %v1898_v61 = vshll.u32 %v7418_v40, %v1886_v63  ;;  %v1901_v54 = vshll.u32 %v7424_v56, %v1886_v63  ;;  %vm1904_vm6 = vcmp.lt.s32.totalorder %v5634_v11, 1 }
 0x2f6   : > { %v1890_v9 = vshrl.u32 %v7422_v58, %v1887_v5  ;;  %v1893_v59 = vshrl.u32 %v7420_v8, %v1887_v5  ;;  %v1896_v38 = vshrl.u32 %v7418_v40, %v1887_v5  ;;  %v1899_v42 = vshrl.u32 %v7424_v56, %v1887_v5 }
 0x2f7   : > { %v1902_v60 = vshrl.u32 %v7415_v62, %v1887_v5  ;;  %v1295_v53 = vadd.f32 -0.33333147, %v1294_v36  ;;  %vm1905_vm7 = vcmp.lt.s32.totalorder %v5634_v11, 2  ;;  %vm1906_vm14 = vcmp.lt.s32.totalorder %v5634_v11, 3 }
 0x2f8   : > { %v1891_v14 = vor.u32 %v1890_v9, %v1889_v35  ;;  %v1894_v27 = vor.u32 %v1893_v59, %v1892_v17  ;;  %v1897_v31 = vor.u32 %v1896_v38, %v1895_v22  ;;  %v1900_v25 = vor.u32 %v1899_v42, %v1898_v61 }
 0x2f9   : > { %v1903_v51 = vor.u32 %v1902_v60, %v1901_v54  ;;  %v1296_v48 = vmul.f32 %v1295_v53, %v5586_v2  ;;  %vm1907_vm5 = vcmp.lt.s32.totalorder %v5634_v11, 4  ;;  %v1888_v0 = vshrl.u32 %v7428_v28, %v1887_v5 }
 0x2fa   : > { %v1912_v7 = vsel %vm1904_vm6, %v1891_v14, %v1894_v27  ;;  %v1913_v32 = vsel %vm1907_vm5, %v1900_v25, 920167782  ;;  %v1916_v29 = vsel %vm1904_vm6, %v1894_v27, %v1897_v31  ;;  %v1909_v37 = vsel %vm1907_vm5, %v1897_v31, 2102212464 }
 0x2fb   : > { %v1917_v24 = vsel %vm1907_vm5, %v1903_v51, 1326507024  ;;  %v1297_v26 = vmul.f32 %v1296_v48, %v5582_v13  ;;  %v1914_v2 = vsel %vm1906_vm14, %v1897_v31, %v1913_v32  ;;  %v5674_v63 = vshll.u32 %v1572_v57, 8 }
 0x2fc   : > { %v1918_v49 = vsel %vm1906_vm14, %v1900_v25, %v1917_v24  ;;  %v1915_v41 = vsel %vm1905_vm7, %v1912_v7, %v1914_v2  ;;  %v1908_v36 = vsel %vm1904_vm6, %v1888_v0, %v1891_v14  ;;  %v1910_v9 = vsel %vm1906_vm14, %v1894_v27, %v1909_v37 }
 0x2fd   : > { %v1919_v15 = vsel %vm1905_vm7, %v1916_v29, %v1918_v49  ;;  %v1298_v43 = vadd.f32 %v1297_v26, %v5582_v13  ;;  %v1945_v22 = vand.u32 65535, %v1915_v41  ;;  %v1946_v5 = vshrl.u32 %v1915_v41, 16 }
 0x2fe   : > { %v1923_v35 = vand.u32 65535, %v1919_v15  ;;  %v1924_v17 = vshrl.u32 %v1919_v15, 16  ;;  %v5681_v59 = vshrl.u32 %v1576_v12, 5  ;;  %v1578_v42 = vand.u32 31, %v1576_v12 }
 0x2ff   : > { %v1300_v61 = vsub.f32 1.5707964, %v1298_v43  ;;  %v1948_v60 = vmul.u32 %v1946_v5, %v5632_v10  ;;  %v1949_v53 = vmul.u32 %v1945_v22, %v5637_v20  ;;  %v1947_v25 = vmul.u32 %v1945_v22, %v5632_v10 }
 0x300   : > { %v1926_v38 = vmul.u32 %v1924_v17, %v5632_v10  ;;  %v1927_v57 = vmul.u32 %v1923_v35, %v5637_v20  ;;  %v1925_v13 = vmul.u32 %v1923_v35, %v5632_v10  ;;  %v1928_v54 = vmul.u32 %v1924_v17, %v5637_v20 }
 0x301   : > { %v1301_v14 = vsel %vm1299_vm10, %v1300_v61, %v1298_v43  ;;  %v1951_v32 = vshll.u32 %v1948_v60, 16  ;;  %v1950_v24 = vmul.u32 %v1946_v5, %v5637_v20  ;;  %v1952_v12 = vshrl.u32 %v1948_v60, 16 }
 0x302   : > { %v1929_v27 = vshll.u32 %v1926_v38, 16  ;;  %v1930_v31 = vshrl.u32 %v1926_v38, 16  ;;  %v1303_v51 = vsub.f32 3.1415927, %v1301_v14  ;;  %v1931_v48 = vshll.u32 %v1927_v57, 16 }
 0x303   : > { %v1932_v7 = vshrl.u32 %v1927_v57, 16  ;;  %v7426_v37 = vmov 0   ;;  %v1953_v50 = vshll.u32 %v1949_v53, 16  ;;  %vm1955_vm9 = vc.u32 %v1947_v25, %v1951_v32 }
 0x304   : > { %vm1933_vm13 = vc.u32 %v1925_v13, %v1929_v27  ;;  %v1935_v29 = vadd.s32 %v1929_v27, %v1925_v13  ;;  %v1304_v26 = vsel %vm1302_vm0, %v1303_v51, %v1301_v14  ;;  %v1956_v49 = vsel %vm1955_vm9, 1, %v7426_v37 }
 0x305   : > { %v1934_v55 = vsel %vm1933_vm13, 1, %v7426_v37  ;;  %v5700_v10 = vsel %vm1307_vm15, %v5624_v46, %v1304_v26  ;;  %v1957_v41 = vadd.s32 %v1951_v32, %v1947_v25  ;;  %v1958_v15 = vadd.s32 %v1956_v49, %v1950_v24 }
 0x306   : > { %v1936_v2 = vadd.s32 %v1934_v55, %v1928_v54  ;;  %vm1937_vm2 = vc.u32 %v1935_v29, %v1931_v48  ;;  %v1312_v20 = vsel %vm5551_vm12, nan, %v5700_v10  ;;  %v1954_v35 = vshrl.u32 %v1949_v53, 16 }
 0x307   : > { %v1938_v0 = vsel %vm1937_vm2, 1, %v7426_v37  ;;  %v5707_v17 = vsub.s32 32, %v1578_v42  ;;  %v1581_v22 = vshll.u32 %v7428_v28, %v1578_v42  ;;  %vm1959_vm11 = vc.u32 %v1957_v41, %v1953_v50 }
 0x308   : > { %v1940_v43 = vadd.s32 %v1938_v0, %v1936_v2  ;;  %v5710_v46 = vadd.s32 %v1957_v41, %v1953_v50  ;;  %v1584_v5 = vshll.u32 %v7422_v58, %v1578_v42  ;;  %v1587_v61 = vshll.u32 %v7420_v8, %v1578_v42 }
 0x309   : > { %v1960_v57 = vsel %vm1959_vm11, 1, %v7426_v37  ;;  %v1582_v13 = vshrl.u32 %v7422_v58, %v5707_v17  ;;  %v1590_v54 = vshll.u32 %v7418_v40, %v1578_v42  ;;  %v1585_v53 = vshrl.u32 %v7420_v8, %v5707_v17 }
 0x30a   : > { %v1941_v38 = vadd.s32 %v1940_v43, %v1930_v31  ;;  %v1962_v60 = vadd.s32 %v1960_v57, %v1958_v15  ;;  %v1588_v14 = vshrl.u32 %v7418_v40, %v5707_v17  ;;  %v1591_v27 = vshrl.u32 %v7424_v56, %v5707_v17 }
 0x30b   : > { %v5726_v31 = vor.u32 %v1582_v13, %v1581_v22  ;;  %v1593_v51 = vshll.u32 %v7424_v56, %v1578_v42  ;;  %v1594_v48 = vshrl.u32 %v7415_v62, %v5707_v17  ;;  %v5731_v29 = vor.u32 %v1585_v53, %v1584_v5 }
 0x30c   : > { %v5724_v25 = vadd.s32 %v1941_v38, %v1932_v7  ;;  %v1963_v32 = vadd.s32 %v1962_v60, %v1952_v12  ;;  %v5733_v24 = vor.u32 %v1588_v14, %v1587_v61  ;;  %v1592_v26 = vor.u32 %v1591_v27, %v1590_v54  ;;  %v1371_v54 = vpop.permute.xlu1 %1370 }
 0x30d   : > { %v1911_v55 = vsel %vm1905_vm7, %v1908_v36, %v1910_v9  ;;  %v1595_v50 = vor.u32 %v1594_v48, %v1593_v51  ;;  %v1613_v7 = vand.u32 65535, %v5674_v63  ;;  %vm1596_vm8 = vcmp.lt.s32.totalorder %v5681_v59, 1 }
 0x30e   : > { %v1964_v2 = vadd.s32 %v1963_v32, %v1954_v35  ;;  %vm1967_vm4 = vc.u32 %v5724_v25, %v5710_v46  ;;  %vm1599_vm1 = vcmp.lt.s32.totalorder %v5681_v59, 4  ;;  %vm1598_vm6 = vcmp.lt.s32.totalorder %v5681_v59, 3 }
 0x30f   : > { %v1604_v42 = vsel %vm1596_vm8, %v5726_v31, %v5731_v29  ;;  %v1605_v11 = vsel %vm1599_vm1, %v1592_v26, 920167782  ;;  %v1608_v36 = vsel %vm1596_vm8, %v5731_v29, %v5733_v24  ;;  %vm1597_vm10 = vcmp.lt.s32.totalorder %v5681_v59, 2 }
 0x310   : > { %v1968_v9 = vadd.s32 1, %v1964_v2  ;;  %v1606_v12 = vsel %vm1598_vm6, %v5733_v24, %v1605_v11  ;;  %v1609_v49 = vsel %vm1599_vm1, %v1595_v50, 1326507024  ;;  %v1965_v0 = vmul.u32 %v5626_v33, %v1911_v55 }
 0x311   : > { %v1607_v41 = vsel %vm1597_vm10, %v1604_v42, %v1606_v12  ;;  %v1610_v15 = vsel %vm1598_vm6, %v1592_v26, %v1609_v49  ;;  %v1614_v43 = vshrl.u32 %v5674_v63, 16  ;;  %v1314_v27 = vsel %vm1302_vm0, 2.3561945, %v7501_v1 }
 0x312   : > { %v1969_v35 = vsel %vm1967_vm4, %v1968_v9, %v1964_v2  ;;  %v1611_v22 = vsel %vm1597_vm10, %v1608_v36, %v1610_v15  ;;  %v1637_v5 = vand.u32 65535, %v1607_v41  ;;  %v1638_v61 = vshrl.u32 %v1607_v41, 16 }
 0x313   : > { %v1970_v38 = vadd.s32 %v1969_v35, %v1965_v0  ;;  %v1615_v57 = vand.u32 65535, %v1611_v22  ;;  %v1616_v13 = vshrl.u32 %v1611_v22, 16  ;;  %v1394_v32 = vmul.f32 %v5600_v16, %v1371_v54 }
 0x314   : > { %v1640_v60 = vmul.u32 %v1638_v61, %v1613_v7  ;;  %v1641_v33 = vmul.u32 %v1637_v5, %v1614_v43  ;;  %v1639_v51 = vmul.u32 %v1637_v5, %v1613_v7  ;;  %v1642_v2 = vmul.u32 %v1638_v61, %v1614_v43 }
 0x315   : > { %v1618_v53 = vmul.u32 %v1616_v13, %v1613_v7  ;;  %v1619_v14 = vmul.u32 %v1615_v57, %v1614_v43  ;;  %v1971_v26 = vadd.s32 536870912, %v1970_v38  ;;  %v1617_v55 = vmul.u32 %v1615_v57, %v1613_v7 }
 0x316   : > { %v1643_v48 = vshll.u32 %v1640_v60, 16  ;;  %v1620_v42 = vmul.u32 %v1616_v13, %v1614_v43  ;;  %v1645_v11 = vshll.u32 %v1641_v33, 16  ;;  %v1644_v1 = vshrl.u32 %v1640_v60, 16 }
 0x317   : > { %v1621_v50 = vshll.u32 %v1618_v53, 16  ;;  %v1623_v9 = vshll.u32 %v1619_v14, 16  ;;  %v5773_v41 = vshrl.u32 %v1971_v26, 30  ;;  %v5778_v35 = vadd.f32 %v5604_v23, %v1394_v32 }
 0x318   : > { %vm1647_vm7 = vc.u32 %v1639_v51, %v1643_v48  ;;  %v1649_v36 = vadd.s32 %v1643_v48, %v1639_v51  ;;  %v1318_v22 = vsel %vm5568_vm3, %v1314_v27, %v1312_v20  ;;  %v1622_v5 = vshrl.u32 %v1618_v53, 16 }
 0x319   : > { %vm1625_vm14 = vc.u32 %v1617_v55, %v1621_v50  ;;  %v1627_v12 = vadd.s32 %v1621_v50, %v1617_v55  ;;  %v1648_v49 = vsel %vm1647_vm7, 1, %v7426_v37  ;;  %v1319_v57 = vand.u32 2147483647, %v1318_v22 }
 0x31a   : > { %v1626_v18 = vsel %vm1625_vm14, 1, %v7426_v37  ;;  %v1650_v0 = vadd.s32 %v1648_v49, %v1642_v2  ;;  %vm1651_vm5 = vc.u32 %v1649_v36, %v1645_v11  ;;  %v1320_v13 = vand.u32 2147483648, %v5525_v21 }
 0x31b   : > { %v1628_v16 = vadd.s32 %v1626_v18, %v1620_v42  ;;  %vm1629_vm0 = vc.u32 %v1627_v12, %v1623_v9  ;;  %v1652_v7 = vsel %vm1651_vm5, 1, %v7426_v37  ;;  %v1413_v60 = vand.u32 2139095040, %v5778_v35  ;;  %v1379_v9 = vpop.permute.xlu2 %1378 }
 0x31c   : > { %v1630_v15 = vsel %vm1629_vm0, 1, %v7426_v37  ;;  %v1654_v43 = vadd.s32 %v1652_v7, %v1650_v0  ;;  %v1973_v51 = vshll.u32 %v5773_v41, 30  ;;  %v1646_v23 = vshrl.u32 %v1641_v33, 16 }
 0x31d   : > { %v1632_v61 = vadd.s32 %v1630_v15, %v1628_v16  ;;  %v1321_v32 = vor.u32 %v1320_v13, %v1319_v57  ;;  %v1624_v26 = vshrl.u32 %v1619_v14, 16  ;;  %v1414_v4 = vshrl.u32 %v1413_v60, 23  ;;  %v5846_v13 = vld [vmem:[%s5242_s7 + $0x2] ss:$0 sm:$0xff] }
 0x31e   : > { %v1655_v54 = vadd.s32 %v1654_v43, %v1644_v1  ;;  %v1601_v39 = vsel %vm1599_vm1, %v5733_v24, 2102212464  ;;  %v1580_v21 = vshrl.u32 %v7428_v28, %v5707_v17  ;;  %v5797_v27 = vsub.s32 %v1970_v38, %v1973_v51 }
 0x31f   : > { %v1633_v48 = vadd.s32 %v1632_v61, %v1622_v5  ;;  %1384 = vrot.lane.b32.xlu0 %v1321_v32, %s4782_s19  ;;  %v4379_v53 = vadd.s32 4294967169, %v1414_v4  ;;  %v1602_v24 = vsel %vm1598_vm6, %v5731_v29, %v1601_v39  ;;  %v5805_v14 = vadd.s32 %v1649_v36, %v1645_v11  ;;  %v5817_v11 = vld [vmem:[%s5228_s30 + $0x2] ss:$0 sm:$0xff] }
 0x320   : > { %v1656_v10 = vadd.s32 %v1655_v54, %v1646_v23  ;;  %v1600_v33 = vsel %vm1596_vm8, %v1580_v21, %v5726_v31  ;;  %v650_v17 = vmul.f32 %v5089_v19, %v5089_v19  ;;  %v1976_v38 = vsub.s32 0, %v5797_v27 }
 0x321   : > { %v5795_v20 = vadd.s32 %v1633_v48, %v1624_v26  ;;  %v1420_v55 = vadd.s32 1, %v4379_v53  ;;  %v1603_v31 = vsel %vm1597_vm10, %v1600_v33, %v1602_v24  ;;  %v7412_v2 = vand.u32 2147483647, %v5778_v35 }
 0x322   : > { %v1660_v50 = vadd.s32 1, %v1656_v10  ;;  %vm1975_vm15 = vcmp.lt.s32.totalorder %v5797_v27, 0  ;;  %v1657_v12 = vmul.u32 %v5674_v63, %v1603_v31  ;;  %v655_v18 = vmul.f32 %v5209_v30, %v5209_v30 }
 0x323   : > { %vm1659_vm12 = vc.u32 %v5795_v20, %v5805_v14  ;;  %vm1421_vm3 = vcmp.gt.s32.totalorder %v1420_v55, 0  ;;  %v1977_v59 = vsel %vm1975_vm15, %v1976_v38, %v5797_v27  ;;  %v1417_v49 = vand.u32 8388607, %v7412_v2 }
 0x324   : > { %v1422_v42 = vsel %vm1421_vm3, %v1420_v55, 0  ;;  %v1661_v36 = vsel %vm1659_vm12, %v1660_v50, %v1656_v10  ;;  %v1398_v7 = vmul.f32 %v5817_v11, %v1379_v9  ;;  %v1978_v23 = vclz %v1977_v59 }
 0x325   : > { %v1424_v29 = vand.u32 31, %v1422_v42  ;;  %v1662_v1 = vadd.s32 %v1661_v36, %v1657_v12  ;;  %v5839_v30 = vshrl.u32 %v1422_v42, 5  ;;  %v1418_v54 = vor.u32 8388608, %v1417_v49 }
 0x326   : > { %v5859_v10 = vadd.f32 %v5846_v13, %v1398_v7  ;;  %v4389_v24 = vadd.s32 4294967294, %v1978_v23 }
 0x327   : > { %666 = vrot.lane.b32.xlu0 %v650_v17, %s4782_s19  ;;  %v5821_v19 = vsub.s32 32, %v1424_v29  ;;  %v1427_v0 = vshll.u32 %v7428_v28, %v1424_v29  ;;  %v1430_v63 = vshll.u32 %v7422_v58, %v1424_v29  ;;  %v1433_v5 = vshll.u32 %v7420_v8, %v1424_v29 }
 0x328   : > { %v1436_v61 = vshll.u32 %v7418_v40, %v1424_v29  ;;  %v1439_v48 = vshll.u32 %v7424_v56, %v1424_v29  ;;  %v1663_v4 = vadd.s32 536870912, %v1662_v1  ;;  %vm1442_vm13 = vcmp.lt.s32.totalorder %v5839_v30, 1 }
 0x329   : > { %v1428_v16 = vshrl.u32 %v7422_v58, %v5821_v19  ;;  %v1431_v15 = vshrl.u32 %v7420_v8, %v5821_v19  ;;  %v1434_v43 = vshrl.u32 %v7418_v40, %v5821_v19  ;;  %v1437_v22 = vshrl.u32 %v7424_v56, %v5821_v19 }
 0x32a   : > { %v1440_v57 = vshrl.u32 %v7415_v62, %v5821_v19  ;;  %vm1445_vm9 = vcmp.lt.s32.totalorder %v5839_v30, 4  ;;  %vm1444_vm2 = vcmp.lt.s32.totalorder %v5839_v30, 3  ;;  %v5868_v33 = vshll.u32 %v1418_v54, 8 }
 0x32b   : > { %v5848_v60 = vor.u32 %v1428_v16, %v1427_v0  ;;  %v5850_v51 = vor.u32 %v1431_v15, %v1430_v63  ;;  %v5853_v32 = vor.u32 %v1434_v43, %v1433_v5  ;;  %v1438_v26 = vor.u32 %v1437_v22, %v1436_v61 }
 0x32c   : > { %v1441_v39 = vor.u32 %v1440_v57, %v1439_v48  ;;  %vm1443_vm11 = vcmp.lt.s32.totalorder %v5839_v30, 2  ;;  %v5878_v17 = vshrl.u32 %v1663_v4, 30  ;;  %v656_v29 = vmul.f32 %v5375_v6, %v5375_v6 }
 0x32d   : > { %v1450_v21 = vsel %vm1442_vm13, %v5848_v60, %v5850_v51  ;;  %v1451_v53 = vsel %vm1445_vm9, %v1438_v26, 920167782  ;;  %v1454_v50 = vsel %vm1442_vm13, %v5850_v51, %v5853_v32  ;;  %v1459_v9 = vand.u32 65535, %v5868_v33 }
 0x32e   : > { %v1452_v55 = vsel %vm1444_vm2, %v5853_v32, %v1451_v53  ;;  %7513 = vst [vmem:[#allocation20_spill] sm:$0xff] %v5878_v17  ;;  %v1455_v31 = vsel %vm1445_vm9, %v1441_v39, 1326507024  ;;  %vm4390_vm4 = vcmp.lt.s32.totalorder %v4389_v24, 0  ;;  %v1460_v49 = vshrl.u32 %v5868_v33, 16 }
 0x32f   : > { %676 = vrot.lane.b32.xlu0 %v655_v18, %s4782_s19  ;;  %v1453_v38 = vsel %vm1443_vm11, %v1450_v21, %v1452_v55  ;;  %v1456_v42 = vsel %vm1444_vm2, %v1438_v26, %v1455_v31  ;;  %v2029_v0 = vand.u32 2139095040, %v5859_v10  ;;  %v1665_v16 = vshll.u32 %v5878_v17, 30 }
 0x330   : > { %v1457_v36 = vsel %vm1443_vm11, %v1454_v50, %v1456_v42  ;;  %v1483_v12 = vand.u32 65535, %v1453_v38  ;;  %v1484_v59 = vshrl.u32 %v1453_v38, 16  ;;  %v5897_v15 = vsel %vm4390_vm4, 0, %v4389_v24 }
 0x331   : > { %v1461_v18 = vand.u32 65535, %v1457_v36  ;;  %v1462_v7 = vshrl.u32 %v1457_v36, 16  ;;  %v2030_v57 = vshrl.u32 %v2029_v0, 23  ;;  %v5901_v54 = vsub.s32 %v1662_v1, %v1665_v16 }
 0x332   : > { %v1486_v63 = vmul.u32 %v1484_v59, %v1459_v9  ;;  %v5899_v22 = vmul.u32 %v1483_v12, %v1460_v49  ;;  %v1485_v61 = vmul.u32 %v1483_v12, %v1459_v9  ;;  %v1986_v26 = vsub.s32 4294967266, %v5897_v15 }
 0x333   : > { %v5895_v6 = vmul.u32 %v1461_v18, %v1460_v49  ;;  %v1464_v43 = vmul.u32 %v1462_v7, %v1459_v9  ;;  %v1463_v48 = vmul.u32 %v1461_v18, %v1459_v9  ;;  %v1466_v24 = vmul.u32 %v1462_v7, %v1460_v49 }
 0x334   : > { %v1489_v5 = vshll.u32 %v1486_v63, 16  ;;  %v1491_v21 = vshll.u32 %v5899_v22, 16  ;;  %v4391_v1 = vadd.s32 4294967169, %v2030_v57  ;;  %v1668_v38 = vsub.s32 0, %v5901_v54 }
 0x335   : > { %v1467_v23 = vshll.u32 %v1464_v43, 16  ;;  %v1469_v4 = vshll.u32 %v5895_v6, 16  ;;  %v1488_v31 = vmul.u32 %v1484_v59, %v1460_v49  ;;  %vm1667_vm7 = vcmp.lt.s32.totalorder %v5901_v54, 0 }
 0x336   : > { %vm1493_vm8 = vc.u32 %v1485_v61, %v1489_v5  ;;  %v5906_v53 = vadd.s32 %v1489_v5, %v1485_v61  ;;  %v1982_v36 = vsub.s32 32, %v5897_v15  ;;  %v2036_v18 = vadd.s32 1, %v4391_v1 }
 0x337   : > { %678 = vrot.lane.b32.xlu0 %v656_v29, %s4782_s19  ;;  %vm1471_vm1 = vc.u32 %v1463_v48, %v1467_v23  ;;  %v1473_v39 = vadd.s32 %v1467_v23, %v1463_v48  ;;  %v1494_v50 = vsel %vm1493_vm8, 1, %v7426_v37  ;;  %v7411_v29 = vand.u32 2147483647, %v5859_v10 }
 0x338   : > { %v1472_v55 = vsel %vm1471_vm1, 1, %v7426_v37  ;;  %vm1497_vm10 = vc.u32 %v5906_v53, %v1491_v21  ;;  %v1496_v12 = vadd.s32 %v1494_v50, %v1488_v31  ;;  %v5918_v0 = vadd.s32 127, %v1986_v26 }
 0x339   : > { %vm1475_vm6 = vc.u32 %v1473_v39, %v1469_v4  ;;  %v1474_v42 = vadd.s32 %v1472_v55, %v1466_v24  ;;  %v1498_v16 = vsel %vm1497_vm10, 1, %v7426_v37  ;;  %v1966_v59 = vadd.s32 %v5710_v46, %v5724_v25 }
 0x33a   : > { %v1476_v9 = vsel %vm1475_vm6, 1, %v7426_v37  ;;  %v5924_v49 = vsel %vm1667_vm7, %v1668_v38, %v5901_v54  ;;  %vm2037_vm14 = vcmp.gt.s32.totalorder %v2036_v18, 0  ;;  %v2033_v5 = vand.u32 8388607, %v7411_v29 }
 0x33b   : > { %v1478_v7 = vadd.s32 %v1476_v9, %v1474_v42  ;;  %v2038_v61 = vsel %vm2037_vm14, %v2036_v18, 0  ;;  %v1983_v57 = vshll.u32 %v5797_v27, %v5897_v15  ;;  %v1984_v48 = vshrl.u32 %v1966_v59, %v1982_v36 }
 0x33c   : > { %v1426_v23 = vshrl.u32 %v7428_v28, %v5821_v19  ;;  %v1500_v26 = vadd.s32 %v1498_v16, %v1496_v12  ;;  %v1988_v4 = vshll.u32 %v5918_v0, 23  ;;  %v1670_v46 = vclz %v5924_v49  ;;  %v1375_v12 = vpop.permute.xlu0 %1374 }
 0x33d   : > { %v1468_v25 = vshrl.u32 %v1464_v43, 16  ;;  %v2040_v39 = vand.u32 31, %v2038_v61  ;;  %v1447_v55 = vsel %vm1445_vm9, %v5853_v32, 2102212464  ;;  %v1470_v50 = vshrl.u32 %v5895_v6, 16 }
 0x33e   : > { %v1446_v24 = vsel %vm1442_vm13, %v1426_v23, %v5848_v60  ;;  %v1490_v1 = vshrl.u32 %v1486_v63, 16  ;;  %v1492_v19 = vshrl.u32 %v5899_v22, 16  ;;  %v2034_v31 = vor.u32 8388608, %v2033_v5 }
 0x33f   : > { %v1479_v38 = vadd.s32 %v1478_v7, %v1468_v25  ;;  %v5942_v42 = vsub.s32 32, %v2040_v39  ;;  %v5944_v43 = vshrl.u32 %v2038_v61, 5  ;;  %v2043_v9 = vshll.u32 %v7428_v28, %v2040_v39 }
 0x340   : > { %v1501_v36 = vadd.s32 %v1500_v26, %v1490_v1  ;;  %v2046_v60 = vshll.u32 %v7422_v58, %v2040_v39  ;;  %v2049_v6 = vshll.u32 %v7420_v8, %v2040_v39  ;;  %v2052_v18 = vshll.u32 %v7418_v40, %v2040_v39 }
 0x341   : > { %v2044_v32 = vshrl.u32 %v7422_v58, %v5942_v42  ;;  %v2047_v63 = vshrl.u32 %v7420_v8, %v5942_v42  ;;  %v2050_v0 = vshrl.u32 %v7418_v40, %v5942_v42  ;;  %v2053_v16 = vshrl.u32 %v7424_v56, %v5942_v42 }
 0x342   : > { %v2055_v59 = vshll.u32 %v7424_v56, %v2040_v39  ;;  %v2056_v7 = vshrl.u32 %v7415_v62, %v5942_v42  ;;  %v5965_v23 = vshll.u32 %v2034_v31, 8  ;;  %v1396_v26 = vmul.f32 %v5593_v45, %v1375_v12 }
 0x343   : > { %v5961_v5 = vor.u32 %v2044_v32, %v2043_v9  ;;  %v5963_v61 = vor.u32 %v2047_v63, %v2046_v60  ;;  %v5968_v25 = vor.u32 %v2050_v0, %v2049_v6  ;;  %v2054_v1 = vor.u32 %v2053_v16, %v2052_v18 }
 0x344   : > { %v2057_v29 = vor.u32 %v2056_v7, %v2055_v59  ;;  %vm2058_vm5 = vcmp.lt.s32.totalorder %v5944_v43, 1  ;;  %v5971_v2 = vadd.s32 %v1479_v38, %v1470_v50  ;;  %v1502_v39 = vadd.s32 %v1501_v36, %v1492_v19 }
 0x345   : > { %vm2061_vm0 = vcmp.lt.s32.totalorder %v5944_v43, 4  ;;  %v2066_v9 = vsel %vm2058_vm5, %v5961_v5, %v5963_v61  ;;  %vm2060_vm12 = vcmp.lt.s32.totalorder %v5944_v43, 3  ;;  %v2070_v31 = vsel %vm2058_vm5, %v5963_v61, %v5968_v25 }
 0x346   : > { %v2067_v45 = vsel %vm2061_vm0, %v2054_v1, 920167782  ;;  %v2071_v50 = vsel %vm2061_vm0, %v2057_v29, 1326507024  ;;  %v1448_v38 = vsel %vm1444_vm2, %v5850_v51, %v1447_v55  ;;  %vm2059_vm3 = vcmp.lt.s32.totalorder %v5944_v43, 2 }
 0x347   : > { %v2068_v19 = vsel %vm2060_vm12, %v5968_v25, %v2067_v45  ;;  %v2072_v36 = vsel %vm2060_vm12, %v2054_v1, %v2071_v50  ;;  %v5999_v60 = vadd.s32 %v5906_v53, %v1491_v21  ;;  %v2075_v55 = vand.u32 65535, %v5965_v23 }
 0x348   : > { %v2069_v29 = vsel %vm2059_vm3, %v2066_v9, %v2068_v19  ;;  %v2073_v51 = vsel %vm2059_vm3, %v2070_v31, %v2072_v36  ;;  %v1506_v12 = vadd.s32 1, %v1502_v39  ;;  %v2076_v22 = vshrl.u32 %v5965_v23, 16 }
 0x349   : > { %v2077_v32 = vand.u32 65535, %v2073_v51  ;;  %v2078_v63 = vshrl.u32 %v2073_v51, 16  ;;  %v2099_v6 = vand.u32 65535, %v2069_v29  ;;  %vm1505_vm15 = vc.u32 %v5971_v2, %v5999_v60 }
 0x34a   : > { %v2100_v18 = vshrl.u32 %v2069_v29, 16  ;;  %v6010_v21 = vadd.f32 %v5597_v44, %v1396_v26  ;;  %v1449_v53 = vsel %vm1443_vm11, %v1446_v24, %v1448_v38  ;;  %v1985_v16 = vor.u32 %v1984_v48, %v1983_v57 }
 0x34b   : > { %v2080_v0 = vmul.u32 %v2078_v63, %v2075_v55  ;;  %v1989_v59 = vor.u32 4788187, %v1988_v4  ;;  %v6017_v7 = vmul.u32 %v2077_v32, %v2076_v22  ;;  %v1507_v9 = vsel %vm1505_vm15, %v1506_v12, %v1502_v39 }
 0x34c   : > { %v2102_v1 = vmul.u32 %v2100_v18, %v2075_v55  ;;  %v2079_v45 = vmul.u32 %v2077_v32, %v2075_v55  ;;  %v6019_v50 = vmul.u32 %v2099_v6, %v2076_v22  ;;  %v4383_v44 = vadd.s32 4294967294, %v1670_v46 }
 0x34d   : > { %v2083_v31 = vshll.u32 %v2080_v0, 16  ;;  %v1503_v30 = vmul.u32 %v5868_v33, %v1449_v53  ;;  %v2101_v24 = vmul.u32 %v2099_v6, %v2075_v55  ;;  %v1721_v26 = vand.u32 2139095040, %v6010_v21 }
 0x34e   : > { %v2085_v27 = vshll.u32 %v6017_v7, 16  ;;  %v2105_v57 = vshll.u32 %v2102_v1, 16  ;;  %v2082_v4 = vmul.u32 %v2078_v63, %v2076_v22  ;;  %v2104_v38 = vmul.u32 %v2100_v18, %v2076_v22 }
 0x34f   : > { %vm2087_vm13 = vc.u32 %v2079_v45, %v2083_v31  ;;  %v2089_v15 = vadd.s32 %v2083_v31, %v2079_v45  ;;  %v6026_v48 = vadd.s32 %v1507_v9, %v1503_v30  ;;  %v2107_v49 = vshll.u32 %v6019_v50, 16  ;;  %v7514_v9 = vld [vmem:[#allocation12_spill] sm:$0xff]  ;;  %v7515_v30 = vld [vmem:[#allocation15_spill] sm:$0xff] }
 0x350   : > { %v2088_v39 = vsel %vm2087_vm13, 1, %v7426_v37  ;;  %vm2109_vm2 = vc.u32 %v2101_v24, %v2105_v57  ;;  %v6030_v46 = vadd.s32 %v2105_v57, %v2101_v24  ;;  %v1722_v36 = vshrl.u32 %v1721_v26, 23  ;;  %v7516_v24 = vld [vmem:[#allocation14_spill] sm:$0xff] }
 0x351   : > { %vm2091_vm9 = vc.u32 %v2089_v15, %v2085_v27  ;;  %v2090_v33 = vadd.s32 %v2088_v39, %v2082_v4  ;;  %v2110_v19 = vsel %vm2109_vm2, 1, %v7426_v37  ;;  %v1990_v29 = vand.u32 2147483647, %v1989_v59  ;;  %v7517_v4 = vld [vmem:[#allocation16_spill] sm:$0xff] }
 0x352   : > { %v2092_v51 = vsel %vm2091_vm9, 1, %v7426_v37  ;;  %v2112_v55 = vadd.s32 %v2110_v19, %v2104_v38  ;;  %vm2113_vm11 = vc.u32 %v6030_v46, %v2107_v49  ;;  %v1992_v12 = vcvt.s32.f32 %v1985_v16 }
 0x353   : > { %v2114_v32 = vsel %vm2113_vm11, 1, %v7426_v37  ;;  %vm4384_vm4 = vcmp.lt.s32.totalorder %v4383_v44, 0  ;;  %v1509_v63 = vadd.s32 536870912, %v6026_v48  ;;  %v7413_v6 = vand.u32 2147483647, %v6010_v21 }
 0x354   : > { %v4385_v22 = vadd.s32 4294967169, %v1722_v36  ;;  %v2094_v18 = vadd.s32 %v2092_v51, %v2090_v33  ;;  %v2116_v53 = vadd.s32 %v2114_v32, %v2112_v55  ;;  %v6042_v59 = vmul.f32 %v7514_v9, %v7514_v9 }
 0x355   : > { %v6044_v45 = vmul.f32 %v1992_v12, %v1990_v29  ;;  %v6048_v16 = vmul.f32 %v7515_v30, %v7515_v30  ;;  %v6052_v26 = vmul.f32 %v7516_v24, %v7516_v24  ;;  %v6054_v27 = vsel %vm4384_vm4, 0, %v4383_v44 }
 0x356   : > { %v1728_v31 = vadd.s32 1, %v4385_v22  ;;  %v2084_v15 = vshrl.u32 %v2080_v0, 16  ;;  %v2106_v57 = vshrl.u32 %v2102_v1, 16  ;;  %v6058_v39 = vmul.f32 %v7517_v4, %v7517_v4 }
 0x357   : > { %v6060_v38 = vshrl.u32 %v1509_v63, 30  ;;  %v2042_v33 = vshrl.u32 %v7428_v28, %v5942_v42  ;;  %v1725_v19 = vand.u32 8388607, %v7413_v6  ;;  %v2063_v44 = vsel %vm2061_vm0, %v5968_v25, 2102212464 }
 0x358   : > { %7518 = vst [vmem:[#allocation12_spill] sm:$0xff] %v6058_v39  ;;  %vm1729_vm8 = vcmp.gt.s32.totalorder %v1728_v31, 0  ;;  %v2095_v36 = vadd.s32 %v2094_v18, %v2084_v15  ;;  %v2117_v0 = vadd.s32 %v2116_v53, %v2106_v57  ;;  %v1994_v29 = vxor.u32 2147483648, %v6044_v45 }
 0x359   : > { %7519 = vst [vmem:[#allocation15_spill] sm:$0xff] %v6060_v38  ;;  %v1730_v1 = vsel %vm1729_vm8, %v1728_v31, 0  ;;  %v1658_v51 = vadd.s32 %v5805_v14, %v5795_v20  ;;  %v1674_v55 = vsub.s32 32, %v6054_v27  ;;  %v1678_v42 = vsub.s32 4294967266, %v6054_v27 }
 0x35a   : > { %v1732_v12 = vand.u32 31, %v1730_v1  ;;  %v2062_v32 = vsel %vm2058_vm5, %v2042_v33, %v5961_v5  ;;  %v2086_v63 = vshrl.u32 %v6017_v7, 16  ;;  %v2108_v25 = vshrl.u32 %v6019_v50, 16 }
 0x35b   : > { %v1511_v22 = vshll.u32 %v6060_v38, 30  ;;  %v2064_v18 = vsel %vm2060_vm12, %v5963_v61, %v2063_v44  ;;  %v1726_v20 = vor.u32 8388608, %v1725_v19  ;;  %v6096_v15 = vshrl.u32 %v1730_v1, 5 }
 0x35c   : > { %v6083_v14 = vsub.s32 32, %v1732_v12  ;;  %v6085_v53 = vadd.s32 %v2095_v36, %v2086_v63  ;;  %v2118_v9 = vadd.s32 %v2117_v0, %v2108_v25  ;;  %v1735_v31 = vshll.u32 %v7428_v28, %v1732_v12 }
 0x35d   : > { %v1738_v5 = vshll.u32 %v7422_v58, %v1732_v12  ;;  %v1741_v24 = vshll.u32 %v7420_v8, %v1732_v12  ;;  %v1744_v57 = vshll.u32 %v7418_v40, %v1732_v12  ;;  %v1747_v33 = vshll.u32 %v7424_v56, %v1732_v12 }
 0x35e   : > { %v1736_v7 = vshrl.u32 %v7422_v58, %v6083_v14  ;;  %v1739_v30 = vshrl.u32 %v7420_v8, %v6083_v14  ;;  %v1742_v61 = vshrl.u32 %v7418_v40, %v6083_v14  ;;  %v1745_v4 = vshrl.u32 %v7424_v56, %v6083_v14 }
 0x35f   : > { %v1748_v0 = vshrl.u32 %v7415_v62, %v6083_v14  ;;  %v1676_v63 = vshrl.u32 %v1658_v51, %v1674_v55  ;;  %v1679_v25 = vadd.s32 127, %v1678_v42  ;;  %v6113_v1 = vadd.s32 %v6030_v46, %v2107_v49  ;;  %v669_v62 = vpop.permute.xlu2 %668 }
 0x360   : > { %v6102_v19 = vor.u32 %v1736_v7, %v1735_v31  ;;  %v6104_v44 = vor.u32 %v1739_v30, %v1738_v5  ;;  %v6106_v36 = vor.u32 %v1742_v61, %v1741_v24  ;;  %v1746_v6 = vor.u32 %v1745_v4, %v1744_v57 }
 0x361   : > { %v6116_v3 = vsub.s32 %v6026_v48, %v1511_v22  ;;  %v2065_v12 = vsel %vm2059_vm3, %v2062_v32, %v2064_v18  ;;  %v2122_v31 = vadd.s32 1, %v2118_v9  ;;  %v1749_v5 = vor.u32 %v1748_v0, %v1747_v33 }
 0x362   : > { %vm2121_vm1 = vc.u32 %v6085_v53, %v6113_v1  ;;  %vm1750_vm6 = vcmp.lt.s32.totalorder %v6096_v15, 1  ;;  %vm1753_vm10 = vcmp.lt.s32.totalorder %v6096_v15, 4  ;;  %v6124_v50 = vshll.u32 %v1726_v20, 8  ;;  %v1381_v20 = vpop.permute.xlu1 %1380 }
 0x363   : > { %vm1752_vm7 = vcmp.lt.s32.totalorder %v6096_v15, 3  ;;  %v1758_v48 = vsel %vm1750_vm6, %v6102_v19, %v6104_v44  ;;  %v1759_v43 = vsel %vm1753_vm10, %v1746_v6, 920167782  ;;  %v1762_v49 = vsel %vm1750_vm6, %v6104_v44, %v6106_v36 }
 0x364   : > { %v1680_v46 = vshll.u32 %v1679_v25, 23  ;;  %vm1751_vm14 = vcmp.lt.s32.totalorder %v6096_v15, 2  ;;  %v1760_v51 = vsel %vm1752_vm7, %v6106_v36, %v1759_v43  ;;  %v1763_v55 = vsel %vm1753_vm10, %v1749_v5, 1326507024 }
 0x365   : > { %v2119_v42 = vmul.u32 %v5965_v23, %v2065_v12  ;;  %v2123_v32 = vsel %vm2121_vm1, %v2122_v31, %v2118_v9  ;;  %v1761_v22 = vsel %vm1751_vm14, %v1758_v48, %v1760_v51  ;;  %v1764_v18 = vsel %vm1752_vm7, %v1746_v6, %v1763_v55  ;;  %v7520_v31 = vld [vmem:[#allocation13_spill] sm:$0xff] }
 0x366   : > { %v1514_v7 = vsub.s32 0, %v6116_v3  ;;  %v1765_v30 = vsel %vm1751_vm14, %v1762_v49, %v1764_v18  ;;  %v1767_v24 = vand.u32 65535, %v6124_v50  ;;  %v1791_v61 = vand.u32 65535, %v1761_v22 }
 0x367   : > { %v1768_v57 = vshrl.u32 %v6124_v50, 16  ;;  %v1769_v4 = vand.u32 65535, %v1765_v30  ;;  %v1770_v23 = vshrl.u32 %v1765_v30, 16  ;;  %v1792_v9 = vshrl.u32 %v1761_v22, 16 }
 0x368   : > { %v1675_v33 = vshll.u32 %v5901_v54, %v6054_v27  ;;  %vm1513_vm5 = vcmp.lt.s32.totalorder %v6116_v3, 0  ;;  %v6156_v6 = vadd.s32 %v2123_v32, %v2119_v42  ;;  %v1399_v0 = vmul.f32 %v5817_v11, %v1381_v20 }
 0x369   : > { %vm1874_vm0 = vcmp.lt.s32.totalorder %v5608_v52, 0  ;;  %v1772_v25 = vmul.u32 %v1770_v23, %v1767_v24  ;;  %v1795_v12 = vmul.u32 %v1791_v61, %v1768_v57  ;;  %v6162_v5 = vmul.f32 %v7520_v31, %v7520_v31 }
 0x36a   : > { %v1995_v54 = vsel %vm1874_vm0, %v1994_v29, %v6044_v45  ;;  %v6169_v27 = vor.u32 %v1676_v63, %v1675_v33  ;;  %v1773_v48 = vmul.u32 %v1769_v4, %v1768_v57  ;;  %v1794_v43 = vmul.u32 %v1792_v9, %v1767_v24 }
 0x36b   : > { %7521 = vst [vmem:[#allocation14_spill] sm:$0xff] %v6162_v5  ;;  %v1681_v49 = vor.u32 4788187, %v1680_v46  ;;  %v1515_v11 = vsel %vm1513_vm5, %v1514_v7, %v6116_v3  ;;  %v1771_v51 = vmul.u32 %v1769_v4, %v1767_v24  ;;  %v1775_v55 = vshll.u32 %v1772_v25, 16 }
 0x36c   : > { %v2125_v42 = vadd.s32 536870912, %v6156_v6  ;;  %v1793_v32 = vmul.u32 %v1791_v61, %v1767_v24  ;;  %v1797_v22 = vshll.u32 %v1794_v43, 16  ;;  %v6174_v18 = vadd.f32 %v5846_v13, %v1399_v0 }
 0x36d   : > { %v1774_v20 = vmul.u32 %v1770_v23, %v1768_v57  ;;  %vm1779_vm12 = vc.u32 %v1771_v51, %v1775_v55  ;;  %v1781_v30 = vadd.s32 %v1775_v55, %v1771_v51  ;;  %v1799_v45 = vshll.u32 %v1795_v12, 16 }
 0x36e   : > { %7522 = vst [vmem:[#allocation16_spill] sm:$0xff] %v6174_v18  ;;  %v1777_v29 = vshll.u32 %v1773_v48, 16  ;;  %v1780_v63 = vsel %vm1779_vm12, 1, %v7426_v37  ;;  %vm1801_vm3 = vc.u32 %v1793_v32, %v1797_v22  ;;  %v1803_v46 = vadd.s32 %v1797_v22, %v1793_v32 }
 0x36f   : > { %v1682_v33 = vand.u32 2147483647, %v1681_v49  ;;  %v1516_v7 = vclz %v1515_v11  ;;  %v1782_v4 = vadd.s32 %v1780_v63, %v1774_v20  ;;  %v1796_v31 = vmul.u32 %v1792_v9, %v1768_v57 }
 0x370   : > { %v1734_v24 = vshrl.u32 %v7428_v28, %v6083_v14  ;;  %vm1783_vm15 = vc.u32 %v1781_v30, %v1777_v29  ;;  %v1802_v13 = vsel %vm1801_vm3, 1, %v7426_v37  ;;  %vm1805_vm13 = vc.u32 %v1803_v46, %v1799_v45  ;;  %v6189_v14 = vld [vmem:[%s5228_s30 + $0x3] ss:$0 sm:$0xff] }
 0x371   : > { %v6180_v61 = vshrl.u32 %v2125_v42, 30  ;;  %v1755_v23 = vsel %vm1753_vm10, %v6106_v36, 2102212464  ;;  %v1784_v0 = vsel %vm1783_vm15, 1, %v7426_v37  ;;  %v1804_v49 = vadd.s32 %v1802_v13, %v1796_v31  ;;  %v1383_v36 = vpop.permute.xlu1 %1382 }
 0x372   : > { %v1776_v11 = vshrl.u32 %v1772_v25, 16  ;;  %v1786_v51 = vadd.s32 %v1784_v0, %v1782_v4  ;;  %v1806_v57 = vsel %vm1805_vm13, 1, %v7426_v37  ;;  %v2183_v9 = vand.u32 2139095040, %v6174_v18 }
 0x373   : > { %7523 = vst [vmem:[#allocation13_spill] sm:$0xff] %v6180_v61  ;;  %v4380_v55 = vadd.s32 4294967294, %v1516_v7  ;;  %v1754_v42 = vsel %vm1750_vm6, %v1734_v24, %v6102_v19  ;;  %v1798_v32 = vshrl.u32 %v1794_v43, 16  ;;  %v1808_v22 = vadd.s32 %v1806_v57, %v1804_v49  ;;  %v6204_v43 = vld [vmem:[%s5242_s7 + $0x3] ss:$0 sm:$0xff]  ;;  %v7530_v57 = vld [vmem:[#allocation19_spill] sm:$0xff] }
 0x374   : > { %v1756_v25 = vsel %vm1752_vm7, %v6104_v44, %v1755_v23  ;;  %v1778_v20 = vshrl.u32 %v1773_v48, 16  ;;  %v1787_v30 = vadd.s32 %v1786_v51, %v1776_v11  ;;  %v2184_v29 = vshrl.u32 %v2183_v9, 23  ;;  %v671_v51 = vpop.permute.xlu2 %670 }
 0x375   : > { %v2127_v63 = vshll.u32 %v6180_v61, 30  ;;  %v1800_v4 = vshrl.u32 %v1795_v12, 16  ;;  %v1809_v31 = vadd.s32 %v1808_v22, %v1798_v32  ;;  %v7417_v7 = vand.u32 2147483647, %v6174_v18 }
 0x376   : > { %v6199_v13 = vadd.s32 %v1787_v30, %v1778_v20  ;;  %v6201_v0 = vadd.s32 %v1803_v46, %v1799_v45  ;;  %v4394_v19 = vadd.s32 4294967169, %v2184_v29  ;;  %v1400_v24 = vmul.f32 %v6189_v14, %v1383_v36 }
 0x377   : > { %vm6209_vm9 = vcmp.le.f32.partialorder %v1872_v47, 0.7853982  ;;  %v7524_v44 = vmov 0  ;;  %v1684_v12 = vcvt.s32.f32 %v6169_v27  ;;  %v1757_v48 = vsel %vm1751_vm14, %v1754_v42, %v1756_v25  ;;  %v7532_v42 = vld [vmem:[#allocation17_spill] sm:$0xff] }
 0x378   : > { %v7525_v44 = vsel %vm6209_vm9, 4294967295, %v7524_v44  ;;  %v1810_v23 = vadd.s32 %v1809_v31, %v1800_v4  ;;  %v6219_v45 = vsel %vm6209_vm9, %v5608_v52, %v1995_v54  ;;  %v6222_v46 = vadd.f32 %v669_v62, %v6042_v59 }
 0x379   : > { %7526 = vst [vmem:[#allocation21_spill] sm:$0xff] %v7525_v44  ;;  %vm1813_vm2 = vc.u32 %v6199_v13, %v6201_v0  ;;  %v2190_v47 = vadd.s32 1, %v4394_v19  ;;  %v6226_v49 = vmul.f32 %v1684_v12, %v1682_v33  ;;  %vm4381_vm11 = vcmp.lt.s32.totalorder %v4380_v55, 0 }
 0x37a   : > { %7527 = vst [vmem:[#allocation22_spill] sm:$0xff] %v6219_v45  ;;  %v6229_v27 = vsub.s32 %v6156_v6, %v2127_v63  ;;  %v1814_v15 = vadd.s32 1, %v1810_v23  ;;  %v1811_v11 = vmul.u32 %v6124_v50, %v1757_v48  ;;  %v2187_v54 = vand.u32 8388607, %v7417_v7 }
 0x37b   : > { %7528 = vst [vmem:[#allocation23_spill] sm:$0xff] %v6222_v46  ;;  %vm2191_vm4 = vcmp.gt.s32.totalorder %v2190_v47, 0  ;;  %v6235_v62 = vadd.f32 %v6204_v43, %v1400_v24  ;;  %v6239_v33 = vmul.f32 %v7530_v57, %v7530_v57  ;;  %v6243_v6 = vmul.f32 %v7532_v42, %v7532_v42 }
 0x37c   : > { %v1815_v59 = vsel %vm1813_vm2, %v1814_v15, %v1810_v23  ;;  %v2192_v9 = vsel %vm2191_vm4, %v2190_v47, 0  ;;  %v6247_v50 = vmul.f32 %v6219_v45, %v6219_v45  ;;  %4587 = vrsqrt.f32 %v6222_v46 }
 0x37d   : > { %7529 = vst [vmem:[#allocation24_spill] sm:$0xff] %v6235_v62  ;;  %v1816_v32 = vadd.s32 %v1815_v59, %v1811_v11  ;;  %v2194_v22 = vand.u32 31, %v2192_v9  ;;  %v6252_v25 = vsel %vm4381_vm11, 0, %v4380_v55  ;;  %vm2129_vm8 = vcmp.lt.s32.totalorder %v6229_v27, 0 }
 0x37e   : > { %7531 = vst [vmem:[#allocation19_spill] sm:$0xff] %v6239_v33  ;;  %v6256_v20 = vadd.f32 %v671_v51, %v6048_v16  ;;  %v2188_v29 = vor.u32 8388608, %v2187_v54  ;;  %v2337_v4 = vand.u32 2139095040, %v6235_v62  ;;  %v6261_v31 = vshrl.u32 %v2192_v9, 5 }
 0x37f   : > { %7533 = vst [vmem:[#allocation17_spill] sm:$0xff] %v6243_v6  ;;  %v1817_v30 = vadd.s32 536870912, %v1816_v32  ;;  %v6258_v63 = vsub.s32 32, %v2194_v22  ;;  %v2197_v19 = vshll.u32 %v7428_v28, %v2194_v22  ;;  %v2200_v24 = vshll.u32 %v7422_v58, %v2194_v22 }
 0x380   : > { %v2203_v55 = vshll.u32 %v7420_v8, %v2194_v22  ;;  %v2206_v23 = vshll.u32 %v7418_v40, %v2194_v22  ;;  %v2209_v11 = vshll.u32 %v7424_v56, %v2194_v22  ;;  %v7534_v51 = vmov 1326507024  }
 0x381   : > { %v6266_v12 = vshrl.u32 %v1817_v30, 30  ;;  %v2198_v16 = vshrl.u32 %v7422_v58, %v6258_v63  ;;  %v2201_v48 = vshrl.u32 %v7420_v8, %v6258_v63  ;;  %v2204_v47 = vshrl.u32 %v7418_v40, %v6258_v63 }
 0x382   : > { %v2207_v15 = vshrl.u32 %v7424_v56, %v6258_v63  ;;  %v2210_v54 = vshrl.u32 %v7534_v51, %v6258_v63  ;;  %v6280_v59 = vpop.eup %4587  ;;  %v2130_v57 = vsub.s32 0, %v6229_v27  ;;  %v2338_v8 = vshrl.u32 %v2337_v4, 23 }
 0x383   : > { %7535 = vst [vmem:[#allocation25_spill] sm:$0xff] %v6280_v59  ;;  %v1819_v9 = vshll.u32 %v6266_v12, 30  ;;  %v6284_v42 = vor.u32 %v2198_v16, %v2197_v19  ;;  %v6286_v30 = vor.u32 %v2201_v48, %v2200_v24  ;;  %v2205_v7 = vor.u32 %v2204_v47, %v2203_v55 }
 0x384   : > { %v2208_v36 = vor.u32 %v2207_v15, %v2206_v23  ;;  %v2211_v40 = vor.u32 %v2210_v54, %v2209_v11  ;;  %vm2212_vm1 = vcmp.lt.s32.totalorder %v6261_v31, 1  ;;  %vm2215_vm6 = vcmp.lt.s32.totalorder %v6261_v31, 4 }
 0x385   : > { %v6288_v58 = vsub.s32 %v1816_v32, %v1819_v9  ;;  %v6292_v22 = vshll.u32 %v2188_v29, 8  ;;  %v1504_v56 = vadd.s32 %v5999_v60, %v5971_v2  ;;  %vm2214_vm10 = vcmp.lt.s32.totalorder %v6261_v31, 3 }
 0x386   : > { %v2220_v19 = vsel %vm2212_vm1, %v6284_v42, %v6286_v30  ;;  %v2221_v32 = vsel %vm2215_vm6, %v2208_v36, 920167782  ;;  %v2131_v4 = vsel %vm2129_vm8, %v2130_v57, %v6229_v27  ;;  %vm2213_vm7 = vcmp.lt.s32.totalorder %v6261_v31, 2 }
 0x387   : > { %v2222_v29 = vsel %vm2214_vm10, %v2205_v7, %v2221_v32  ;;  %v2224_v2 = vsel %vm2212_vm1, %v6286_v30, %v2205_v7  ;;  %v1520_v60 = vsub.s32 32, %v6252_v25  ;;  %v2225_v55 = vsel %vm2215_vm6, %v2211_v40, 1326507024 }
 0x388   : > { %v2223_v24 = vsel %vm2213_vm7, %v2220_v19, %v2222_v29  ;;  %v4397_v16 = vadd.s32 4294967169, %v2338_v8  ;;  %v1822_v48 = vsub.s32 0, %v6288_v58  ;;  %v2226_v23 = vsel %vm2214_vm10, %v2208_v36, %v2225_v55 }
 0x389   : > { %v2229_v47 = vand.u32 65535, %v6292_v22  ;;  %v2254_v15 = vshrl.u32 %v2223_v24, 16  ;;  %v2132_v11 = vclz %v2131_v4  ;;  %vm1821_vm14 = vcmp.lt.s32.totalorder %v6288_v58, 0 }
 0x38a   : > { %v2227_v54 = vsel %vm2213_vm7, %v2224_v2, %v2226_v23  ;;  %v2253_v57 = vand.u32 65535, %v2223_v24  ;;  %v2230_v9 = vshrl.u32 %v6292_v22, 16  ;;  %v6327_v29 = vshrl.u32 %v1504_v56, %v1520_v60 }
 0x38b   : > { %v2231_v19 = vand.u32 65535, %v2227_v54  ;;  %v2232_v40 = vshrl.u32 %v2227_v54, 16  ;;  %v2256_v8 = vmul.u32 %v2254_v15, %v2229_v47  ;;  %v2344_v55 = vadd.s32 1, %v4397_v16 }
 0x38c   : > { %v1823_v4 = vsel %vm1821_vm14, %v1822_v48, %v6288_v58  ;;  %4589 = vrsqrt.f32 %v6256_v20  ;;  %v6332_v24 = vadd.s32 4294967294, %v2132_v11  ;;  %v2257_v23 = vmul.u32 %v2253_v57, %v2230_v9 }
 0x38d   : > { %v2234_v37 = vmul.u32 %v2232_v40, %v2229_v47  ;;  %v2235_v2 = vmul.u32 %v2231_v19, %v2230_v9  ;;  %v2259_v28 = vshll.u32 %v2256_v8, 16  ;;  %v7536_v33 = vmov 683565275  }
 0x38e   : > { %v2196_v32 = vshrl.u32 %v7536_v33, %v6258_v63  ;;  %v2233_v56 = vmul.u32 %v2231_v19, %v2229_v47  ;;  %v2255_v61 = vmul.u32 %v2253_v57, %v2229_v47  ;;  %v1824_v36 = vclz %v1823_v4 }
 0x38f   : > { %v2237_v60 = vshll.u32 %v2234_v37, 16  ;;  %v2236_v16 = vmul.u32 %v2232_v40, %v2230_v9  ;;  %v2258_v6 = vmul.u32 %v2254_v15, %v2230_v9  ;;  %vm2345_vm5 = vcmp.gt.s32.totalorder %v2344_v55, 0 }
 0x390   : > { %v2239_v48 = vshll.u32 %v2235_v2, 16  ;;  %vm2263_vm3 = vc.u32 %v2255_v61, %v2259_v28  ;;  %v2217_v11 = vsel %vm2215_vm6, %v2205_v7, 2102212464  ;;  %v7537_v17 = vmov 0  }
 0x391   : > { %vm2241_vm12 = vc.u32 %v2233_v56, %v2237_v60  ;;  %v2243_v5 = vadd.s32 %v2237_v60, %v2233_v56  ;;  %v2261_v54 = vshll.u32 %v2257_v23, 16  ;;  %v2264_v45 = vsel %vm2263_vm3, 1, %v7537_v17 }
 0x392   : > { %v2242_v38 = vsel %vm2241_vm12, 1, %v7537_v17  ;;  %v6341_v63 = vpop.eup %4589  ;;  %v2265_v47 = vadd.s32 %v2259_v28, %v2255_v61  ;;  %v2266_v57 = vadd.s32 %v2264_v45, %v2258_v6  ;;  %v4386_v15 = vadd.s32 4294967294, %v1824_v36 }
 0x393   : > { %v2244_v19 = vadd.s32 %v2242_v38, %v2236_v16  ;;  %vm2245_vm15 = vc.u32 %v2243_v5, %v2239_v48  ;;  %v2216_v9 = vsel %vm2212_vm1, %v2196_v32, %v6284_v42  ;;  %v2346_v7 = vsel %vm2345_vm5, %v2344_v55, 0 }
 0x394   : > { %v2246_v40 = vsel %vm2245_vm15, 1, %v7537_v17  ;;  %v2218_v4 = vsel %vm2214_vm10, %v6286_v30, %v2217_v11  ;;  %v2238_v56 = vshrl.u32 %v2234_v37, 16  ;;  %vm2267_vm13 = vc.u32 %v2265_v47, %v2261_v54 }
 0x395   : > { %v2248_v60 = vadd.s32 %v2246_v40, %v2244_v19  ;;  %vm4393_vm2 = vcmp.lt.s32.totalorder %v6332_v24, 0  ;;  %v2268_v28 = vsel %vm2267_vm13, 1, %v7537_v17  ;;  %v7538_v38 = vand.u32 2147483647, %v6235_v62 }
 0x396   : > { %v2348_v61 = vand.u32 31, %v2346_v7  ;;  %v2240_v45 = vshrl.u32 %v2235_v2, 16  ;;  %v2260_v42 = vshrl.u32 %v2256_v8, 16  ;;  %v2270_v32 = vadd.s32 %v2268_v28, %v2266_v57 }
 0x397   : > { %v2341_v5 = vand.u32 8388607, %v7538_v38  ;;  %v2249_v6 = vadd.s32 %v2248_v60, %v2238_v56  ;;  %vm4387_vm11 = vcmp.lt.s32.totalorder %v4386_v15, 0  ;;  %v2219_v36 = vsel %vm2213_vm7, %v2216_v9, %v2218_v4 }
 0x398   : > { %v2262_v30 = vshrl.u32 %v2257_v23, 16  ;;  %v6357_v37 = vsub.s32 32, %v2348_v61  ;;  %v6361_v16 = vadd.s32 %v2265_v47, %v2261_v54  ;;  %v2271_v48 = vadd.s32 %v2270_v32, %v2260_v42 }
 0x399   : > { %v6359_v55 = vadd.s32 %v2249_v6, %v2240_v45  ;;  %v6363_v11 = vshrl.u32 %v2346_v7, 5  ;;  %v2351_v19 = vshll.u32 %v7536_v33, %v2348_v61  ;;  %v7539_v2 = vmov 2475754826  }
 0x39a   : > { %v2352_v8 = vshrl.u32 %v7539_v2, %v6357_v37  ;;  %v2354_v57 = vshll.u32 %v7539_v2, %v2348_v61  ;;  %v7540_v31 = vmov 2131351028   ;;  %v2272_v23 = vadd.s32 %v2271_v48, %v2262_v30 }
 0x39b   : > { %v2355_v9 = vshrl.u32 %v7540_v31, %v6357_v37  ;;  %v2357_v40 = vshll.u32 %v7540_v31, %v2348_v61  ;;  %v7541_v4 = vmov 2102212464   ;;  %vm2275_vm4 = vc.u32 %v6359_v55, %v6361_v16 }
 0x39c   : > { %v2358_v54 = vshrl.u32 %v7541_v4, %v6357_v37  ;;  %v2360_v47 = vshll.u32 %v7541_v4, %v2348_v61  ;;  %v6377_v7 = vor.u32 %v2352_v8, %v2351_v19  ;;  %v7542_v60 = vmov 920167782  }
 0x39d   : > { %v6379_v56 = vor.u32 %v2355_v9, %v2354_v57  ;;  %v2361_v28 = vshrl.u32 %v7542_v60, %v6357_v37  ;;  %vm1566_vm8 = vcmp.lt.s32.totalorder %v5614_v34, 0  ;;  %v2276_v38 = vadd.s32 1, %v2272_v23 }
 0x39e   : > { %v6384_v45 = vor.u32 %v2358_v54, %v2357_v40  ;;  %v2363_v6 = vshll.u32 %v7542_v60, %v2348_v61  ;;  %v2364_v42 = vshrl.u32 %v7534_v51, %v6357_v37  ;;  %v7543_v32 = vsub.s32 4294967266, %v6252_v25 }
 0x39f   : > { %v6396_v48 = vsel %vm4393_vm2, 0, %v6332_v24  ;;  %v2273_v19 = vmul.u32 %v6292_v22, %v2219_v36  ;;  %v2362_v8 = vor.u32 %v2361_v28, %v2360_v47  ;;  %v2277_v57 = vsel %vm2275_vm4, %v2276_v38, %v2272_v23 }
 0x3a0   : > { %v6391_v30 = vadd.s32 127, %v7543_v32  ;;  %v2342_v9 = vor.u32 8388608, %v2341_v5  ;;  %v2365_v40 = vor.u32 %v2364_v42, %v2363_v6  ;;  %vm2366_vm1 = vcmp.lt.s32.totalorder %v6363_v11, 1 }
 0x3a1   : > { %v6401_v61 = vsel %vm4387_vm11, 0, %v4386_v15  ;;  %v2278_v54 = vadd.s32 %v2277_v57, %v2273_v19  ;;  %vm2369_vm6 = vcmp.lt.s32.totalorder %v6363_v11, 4  ;;  %v2374_v24 = vsel %vm2366_vm1, %v6377_v7, %v6379_v56 }
 0x3a2   : > { %vm2368_vm10 = vcmp.lt.s32.totalorder %v6363_v11, 3  ;;  %v2375_v22 = vsel %vm2369_vm6, %v2362_v8, 920167782  ;;  %v2378_v5 = vsel %vm2366_vm1, %v6379_v56, %v6384_v45  ;;  %v2379_v15 = vsel %vm2369_vm6, %v2365_v40, 1326507024 }
 0x3a3   : > { %v2279_v36 = vadd.s32 536870912, %v2278_v54  ;;  %vm2367_vm7 = vcmp.lt.s32.totalorder %v6363_v11, 2  ;;  %v2376_v23 = vsel %vm2368_vm10, %v6384_v45, %v2375_v22  ;;  %v2380_v47 = vsel %vm2368_vm10, %v2362_v8, %v2379_v15 }
 0x3a4   : > { %v2377_v28 = vsel %vm2367_vm7, %v2374_v24, %v2376_v23  ;;  %v2381_v38 = vsel %vm2367_vm7, %v2378_v5, %v2380_v47  ;;  %v6427_v6 = vshll.u32 %v2342_v9, 8  ;;  %v723_v42 = vmul.f32 %v6341_v63, %v6256_v20 }
 0x3a5   : > { %v1832_v32 = vsub.s32 4294967266, %v6401_v61  ;;  %v6432_v19 = vshrl.u32 %v2279_v36, 30  ;;  %v2385_v57 = vand.u32 65535, %v2381_v38  ;;  %v2386_v40 = vshrl.u32 %v2381_v38, 16 }
 0x3a6   : > { %v2383_v22 = vand.u32 65535, %v6427_v6  ;;  %v2384_v8 = vshrl.u32 %v6427_v6, 16  ;;  %v2407_v15 = vand.u32 65535, %v2377_v28  ;;  %v2408_v24 = vshrl.u32 %v2377_v28, 16 }
 0x3a7   : > { %7544 = vst [vmem:[#allocation26_spill] sm:$0xff] %v6432_v19  ;;  %v7545_v5 = vxor.u32 2147483648, %v6226_v49  ;;  %v7546_v23 = vshll.u32 %v6116_v3, %v6252_v25  ;;  %v1526_v47 = vshll.u32 %v6391_v30, 23  ;;  %v2281_v38 = vshll.u32 %v6432_v19, 30 }
 0x3a8   : > { %v2120_v28 = vadd.s32 %v6113_v1, %v6085_v53  ;;  %v2140_v62 = vsub.s32 4294967266, %v6396_v48  ;;  %v2388_v51 = vmul.u32 %v2386_v40, %v2383_v22  ;;  %v6454_v60 = vmul.u32 %v2385_v57, %v2384_v8 }
 0x3a9   : > { %v6441_v9 = vsel %vm1566_vm8, %v7545_v5, %v6226_v49  ;;  %v6447_v36 = vor.u32 %v6327_v29, %v7546_v23  ;;  %v1828_v49 = vsub.s32 32, %v6401_v61  ;;  %v6457_v5 = vsub.s32 %v2278_v54, %v2281_v38 }
 0x3aa   : > { %v2410_v3 = vmul.u32 %v2408_v24, %v2383_v22  ;;  %v724_v25 = vmul.f32 %v6341_v63, %v723_v42  ;;  %v1833_v29 = vadd.s32 127, %v1832_v32  ;;  %v2387_v23 = vmul.u32 %v2385_v57, %v2383_v22 }
 0x3ab   : > { %v2391_v30 = vshll.u32 %v2388_v51, 16  ;;  %v2409_v4 = vmul.u32 %v2407_v15, %v2383_v22  ;;  %vm2283_vm14 = vcmp.lt.s32.totalorder %v6457_v5, 0  ;;  %v2284_v53 = vsub.s32 0, %v6457_v5 }
 0x3ac   : > { %v6462_v1 = vmul.u32 %v2407_v15, %v2384_v8  ;;  %v2413_v19 = vshll.u32 %v2410_v3, 16  ;;  %v2390_v18 = vmul.u32 %v2386_v40, %v2384_v8  ;;  %v2393_v31 = vshll.u32 %v6454_v60, 16 }
 0x3ad   : > { %vm2395_vm5 = vc.u32 %v2387_v23, %v2391_v30  ;;  %v2397_v54 = vadd.s32 %v2391_v30, %v2387_v23  ;;  %v2285_v38 = vsel %vm2283_vm14, %v2284_v53, %v6457_v5  ;;  %v2412_v32 = vmul.u32 %v2408_v24, %v2384_v8 }
 0x3ae   : > { %v2396_v42 = vsel %vm2395_vm5, 1, %v7537_v17  ;;  %vm2417_vm12 = vc.u32 %v2409_v4, %v2413_v19  ;;  %v2286_v57 = vclz %v2285_v38  ;;  %v7547_v15 = vand.u32 2147483647, %v5614_v34 }
 0x3af   : > { %v2398_v22 = vadd.s32 %v2396_v42, %v2390_v18  ;;  %vm2399_vm3 = vc.u32 %v2397_v54, %v2393_v31  ;;  %v2418_v2 = vsel %vm2417_vm12, 1, %v7537_v17  ;;  %v2415_v23 = vshll.u32 %v6462_v1, 16 }
 0x3b0   : > { %vm6470_vm15 = vcmp.le.f32.partialorder %v7547_v15, 0.7853982  ;;  %v2400_v40 = vsel %vm2399_vm3, 1, %v7537_v17  ;;  %v2419_v30 = vadd.s32 %v2413_v19, %v2409_v4  ;;  %v2420_v53 = vadd.s32 %v2418_v2, %v2412_v32 }
 0x3b1   : > { %v1527_v59 = vor.u32 4788187, %v1526_v47  ;;  %v2136_v8 = vsub.s32 32, %v6396_v48  ;;  %v1812_v18 = vadd.s32 %v6201_v0, %v6199_v13  ;;  %v4395_v31 = vadd.s32 4294967294, %v2286_v57 }
 0x3b2   : > { %v2141_v24 = vadd.s32 127, %v2140_v62  ;;  %v1834_v54 = vshll.u32 %v1833_v29, 23  ;;  %v2402_v38 = vadd.s32 %v2400_v40, %v2398_v22  ;;  %vm2421_vm13 = vc.u32 %v2419_v30, %v2415_v23  ;;  %v673_v62 = vpop.permute.xlu1 %672 }
 0x3b3   : > { %v1830_v42 = vshrl.u32 %v1812_v18, %v1828_v49  ;;  %vm4396_vm2 = vcmp.lt.s32.totalorder %v4395_v31, 0  ;;  %v2422_v15 = vsel %vm2421_vm13, 1, %v7537_v17  ;;  %v725_v46 = vmul.f32 0.5, %v724_v25 }
 0x3b4   : > { %v1530_v44 = vcvt.s32.f32 %v6447_v36  ;;  %v2392_v4 = vshrl.u32 %v2388_v51, 16  ;;  %v2414_v2 = vshrl.u32 %v2410_v3, 16  ;;  %v2424_v19 = vadd.s32 %v2422_v15, %v2420_v53 }
 0x3b5   : > { %v1528_v47 = vand.u32 2147483647, %v1527_v59  ;;  %v2138_v32 = vshrl.u32 %v2120_v28, %v2136_v8  ;;  %v1829_v13 = vshll.u32 %v6288_v58, %v6401_v61  ;;  %v6483_v0 = vsel %vm4396_vm2, 0, %v4395_v31 }
 0x3b6   : > { %v2142_v29 = vshll.u32 %v2141_v24, 23  ;;  %v1835_v57 = vor.u32 4788187, %v1834_v54  ;;  %v2403_v49 = vadd.s32 %v2402_v38, %v2392_v4  ;;  %v2425_v22 = vadd.s32 %v2424_v19, %v2414_v2 }
 0x3b7   : > { %v2137_v25 = vshll.u32 %v6229_v27, %v6396_v48  ;;  %v1831_v40 = vor.u32 %v1830_v42, %v1829_v13  ;;  %v2416_v51 = vshrl.u32 %v6462_v1, 16  ;;  %v726_v36 = vsub.f32 1.5, %v725_v46 }
 0x3b8   : > { %vm1412_vm11 = vcmp.lt.s32.totalorder %v5778_v35, 0  ;;  %v2294_v59 = vsub.s32 4294967266, %v6483_v0  ;;  %v2371_v58 = vsel %vm2369_vm6, %v6384_v45, 2102212464  ;;  %v2394_v61 = vshrl.u32 %v6454_v60, 16 }
 0x3b9   : > { %v6495_v28 = vadd.f32 %v673_v62, %v6052_v26  ;;  %v6501_v27 = vsel %vm6470_vm15, %v5614_v34, %v6441_v9  ;;  %v1531_v46 = vmul.f32 %v1530_v44, %v1528_v47  ;;  %v2350_v48 = vshrl.u32 %v7536_v33, %v6357_v37 }
 0x3ba   : > { %v2426_v3 = vadd.s32 %v2425_v22, %v2416_v51  ;;  %v2139_v1 = vor.u32 %v2138_v32, %v2137_v25  ;;  %v2143_v53 = vor.u32 4788187, %v2142_v29  ;;  %v1836_v8 = vand.u32 2147483647, %v1835_v57 }
 0x3bb   : > { %v6505_v45 = vadd.s32 %v2403_v49, %v2394_v61  ;;  %v1838_v60 = vcvt.s32.f32 %v1831_v40  ;;  %v2370_v26 = vsel %vm2366_vm1, %v2350_v48, %v6377_v7  ;;  %v2372_v9 = vsel %vm2368_vm10, %v6379_v56, %v2371_v58 }
 0x3bc   : > { %v727_v44 = vmul.f32 %v6341_v63, %v726_v36  ;;  %v7550_v18 = vand.u32 2147483647, %v5778_v35  ;;  %v2295_v31 = vadd.s32 127, %v2294_v59  ;;  %v6520_v24 = vadd.s32 %v2419_v30, %v2415_v23  ;;  %v1385_v23 = vpop.permute.xlu0 %1384 }
 0x3bd   : > { %4591 = vrsqrt.f32 %v6495_v28  ;;  %v2001_v54 = vmul.f32 -0.001358992, %v6247_v50  ;;  %v6526_v7 = vmul.f32 %v6501_v27, %v6501_v27  ;;  %v1532_v56 = vxor.u32 2147483648, %v1531_v46 }
 0x3be   : > { %vm6516_vm4 = vcmp.le.f32.partialorder %v7550_v18, 0.7853982  ;;  %v2430_v38 = vadd.s32 1, %v2426_v3  ;;  %v2008_v63 = vmul.f32 -0.00019511016, %v6247_v50  ;;  %vm1720_vm1 = vcmp.lt.s32.totalorder %v6010_v21, 0 }
 0x3bf   : > { %v2144_v42 = vand.u32 2147483647, %v2143_v53  ;;  %v1839_v15 = vmul.f32 %v1838_v60, %v1836_v8  ;;  %v2290_v4 = vsub.s32 32, %v6483_v0  ;;  %vm2429_vm6 = vc.u32 %v6505_v45, %v6520_v24 }
 0x3c0   : > { %v2373_v30 = vsel %vm2367_vm7, %v2370_v26, %v2372_v9  ;;  %v1401_v2 = vmul.f32 %v6189_v14, %v1385_v23  ;;  %v728_v19 = vmul.f32 %v727_v44, %v6256_v20  ;;  %v1996_v47 = vsub.s32 4, %v5773_v41 }
 0x3c1   : > { %v2146_v32 = vcvt.s32.f32 %v2139_v1  ;;  %v2274_v13 = vadd.s32 %v6361_v16, %v6359_v55  ;;  %v2296_v62 = vshll.u32 %v2295_v31, 23  ;;  %v2002_v29 = vadd.f32 0.041655596, %v2001_v54 }
 0x3c2   : > { %v1533_v57 = vsel %vm1412_vm11, %v1532_v56, %v1531_v46  ;;  %vm2028_vm10 = vcmp.lt.s32.totalorder %v5859_v10, 0  ;;  %v7553_v11 = vand.u32 2147483647, %v6010_v21  ;;  %v2431_v14 = vsel %vm2429_vm6, %v2430_v38, %v2426_v3 }
 0x3c3   : > { %v6550_v22 = vadd.f32 %v6204_v43, %v1401_v2  ;;  %v2009_v25 = vadd.f32 0.008332121, %v2008_v63  ;;  %v6552_v40 = vpop.eup %4591  ;;  %v2147_v55 = vmul.f32 %v2146_v32, %v2144_v42  ;;  %v2292_v16 = vshrl.u32 %v2274_v13, %v2290_v4 }
 0x3c4   : > { %vm6545_vm7 = vcmp.le.f32.partialorder %v7553_v11, 0.7853982  ;;  %v2427_v51 = vmul.u32 %v6427_v6, %v2373_v30  ;;  %vm729_vm14 = vcmp.eq.f32.partialorder %v6256_v20, inf  ;;  %v1840_v36 = vxor.u32 2147483648, %v1839_v15 }
 0x3c5   : > { %v2291_v59 = vshll.u32 %v6457_v5, %v6483_v0  ;;  %v730_v58 = vsel %vm729_vm14, %v6256_v20, %v728_v19  ;;  %v1997_v43 = vsel %vm1874_vm0, %v1996_v47, %v5773_v41  ;;  %v2297_v61 = vor.u32 4788187, %v2296_v62  ;;  %v675_v19 = vpop.permute.xlu1 %674  ;;  %v6600_v47 = vld [vmem:[%s5228_s30 + $0x1] ss:$0 sm:$0xff] }
 0x3c6   : > { %v6562_v46 = vadd.s32 %v2431_v14, %v2427_v51  ;;  %v2491_v48 = vand.u32 2139095040, %v6550_v22  ;;  %v2003_v3 = vmul.f32 %v2002_v29, %v6247_v50  ;;  %v6569_v6 = vsel %vm6516_vm4, %v5778_v35, %v1533_v57  ;;  %v7558_v29 = vld [vmem:[#allocation23_spill] sm:$0xff]  ;;  %v7559_v57 = vld [vmem:[#allocation25_spill] sm:$0xff] }
 0x3c7   : > { %v732_v5 = vand.u32 2147483648, %v6256_v20  ;;  %v735_v0 = vmul.f32 %v6552_v40, %v6495_v28  ;;  %v2010_v1 = vmul.f32 %v2009_v25, %v6247_v50  ;;  %v2148_v41 = vxor.u32 2147483648, %v2147_v55 }
 0x3c8   : > { %v2293_v53 = vor.u32 %v2292_v16, %v2291_v59  ;;  %v2492_v8 = vshrl.u32 %v2491_v48, 23  ;;  %vm731_vm0 = vcmp.eq.f32.partialorder %v6256_v20, 0.0  ;;  %v1841_v60 = vsel %vm1720_vm1, %v1840_v36, %v1839_v15 }
 0x3c9   : > { %v733_v26 = vsel %vm731_vm0, %v732_v5, %v730_v58  ;;  %v1842_v9 = vsub.s32 4, %v6266_v12  ;;  %v6581_v18 = vsel %vm6209_vm9, 0, %v1997_v43  ;;  %v2298_v31 = vand.u32 2147483647, %v2297_v61  ;;  %v7561_v58 = vld [vmem:[#allocation12_spill] sm:$0xff] }
 0x3ca   : > { %7557 = vst [vmem:[#allocation21_spill] sm:$0xff] %v6581_v18  ;;  %v2433_v54 = vadd.s32 536870912, %v6562_v46  ;;  %v4400_v56 = vadd.s32 4294967169, %v2492_v8  ;;  %v2004_v38 = vadd.f32 -0.4999988, %v2003_v3  ;;  %v6586_v63 = vmul.f32 %v6569_v6, %v6569_v6 }
 0x3cb   : > { %v7452_v20 = vand.u32 2147483647, %v6550_v22  ;;  %v736_v42 = vmul.f32 %v6552_v40, %v735_v0  ;;  %v2011_v15 = vadd.f32 -0.16666654, %v2010_v1  ;;  %v6592_v4 = vsel %vm2028_vm10, %v2148_v41, %v2147_v55  ;;  %v6626_v3 = vld [vmem:[%s5242_s7 + $0x1] ss:$0 sm:$0xff] }
 0x3cc   : > { %v6597_v23 = vsel %vm6545_vm7, %v6010_v21, %v1841_v60  ;;  %v2300_v30 = vcvt.s32.f32 %v2293_v53  ;;  %v2498_v2 = vadd.s32 1, %v4400_v56  ;;  %v1336_v32 = vmul.f32 %v6600_v47, %v733_v26 }
 0x3cd   : > { %v1843_v13 = vsel %vm1720_vm1, %v1842_v9, %v6266_v12  ;;  %v3259_v62 = vadd.s32 3, %v6581_v18  ;;  %v711_v11 = vmul.f32 %v7559_v57, %v7558_v29  ;;  %v6611_v25 = vshrl.u32 %v2433_v54, 30 }
 0x3ce   : > { %v6609_v14 = vmul.f32 %v2300_v30, %v2298_v31  ;;  %vm2499_vm9 = vcmp.gt.s32.totalorder %v2498_v2, 0  ;;  %v2005_v55 = vmul.f32 %v2004_v38, %v6247_v50  ;;  %v2495_v16 = vand.u32 8388607, %v7452_v20  ;;  %v7565_v30 = vld [vmem:[#allocation16_spill] sm:$0xff]  ;;  %v7569_v20 = vld [vmem:[#allocation22_spill] sm:$0xff] }
 0x3cf   : > { %7560 = vst [vmem:[#allocation23_spill] sm:$0xff] %v6611_v25  ;;  %v2500_v51 = vsel %vm2499_vm9, %v2498_v2, 0  ;;  %v737_v36 = vmul.f32 0.5, %v736_v42  ;;  %v2012_v59 = vmul.f32 %v2011_v15, %v6247_v50  ;;  %v6619_v12 = vmul.f32 %v6597_v23, %v6597_v23 }
 0x3d0   : > { %v6622_v43 = vadd.f32 %v675_v19, %v7561_v58  ;;  %v2502_v61 = vand.u32 31, %v2500_v51  ;;  %v6629_v5 = vadd.f32 %v6626_v3, %v1336_v32  ;;  %v6633_v0 = vsel %vm6545_vm7, 0, %v1843_v13 }
 0x3d1   : > { %v6635_v50 = vand.u32 3, %v3259_v62  ;;  %v712_v1 = vmul.f32 %v7559_v57, %v711_v11  ;;  %v2302_v41 = vxor.u32 2147483648, %v6609_v14  ;;  %v2435_v53 = vshll.u32 %v6611_v25, 30 }
 0x3d2   : > { %v6640_v8 = vsub.s32 32, %v2502_v61  ;;  %v6642_v60 = vadd.f32 1.0, %v2005_v55  ;;  %v2496_v26 = vor.u32 8388608, %v2495_v16  ;;  %v6644_v9 = vshrl.u32 %v2500_v51, 5 }
 0x3d3   : > { %v738_v44 = vsub.f32 1.5, %v737_v36  ;;  %v2013_v31 = vadd.f32 1.0, %v2012_v59  ;;  %v2505_v49 = vshll.u32 %v7536_v33, %v2502_v61  ;;  %v7563_v54 = vmov 2475754826  }
 0x3d4   : > { %7562 = vst [vmem:[#allocation25_spill] sm:$0xff] %v6642_v60  ;;  %v2506_v56 = vshrl.u32 %v7563_v54, %v6640_v8  ;;  %v2508_v38 = vshll.u32 %v7563_v54, %v2502_v61  ;;  %v7564_v42 = vmov 2131351028   ;;  %vm2182_vm5 = vcmp.lt.s32.totalorder %v7565_v30, 0 }
 0x3d5   : > { %v2511_v15 = vshll.u32 %v7564_v42, %v2502_v61  ;;  %v2509_v2 = vshrl.u32 %v7564_v42, %v6640_v8  ;;  %v7566_v19 = vmov 2102212464   ;;  %v7567_v62 = vmov 920167782  }
 0x3d6   : > { %v2512_v32 = vshrl.u32 %v7566_v19, %v6640_v8  ;;  %v2514_v13 = vshll.u32 %v7566_v19, %v2502_v61  ;;  %v2515_v11 = vshrl.u32 %v7567_v62, %v6640_v8  ;;  %v6659_v55 = vor.u32 %v2506_v56, %v2505_v49 }
 0x3d7   : > { %v2517_v16 = vshll.u32 %v7567_v62, %v2502_v61  ;;  %v7568_v51 = vmov 1326507024   ;;  %v713_v59 = vmul.f32 0.5, %v712_v1  ;;  %v6664_v58 = vor.u32 %v2509_v2, %v2508_v38 }
 0x3d8   : > { %v2518_v36 = vshrl.u32 %v7568_v51, %v6640_v8  ;;  %v6666_v54 = vor.u32 %v2512_v32, %v2511_v15  ;;  %v2516_v42 = vor.u32 %v2515_v11, %v2514_v13  ;;  %v6669_v48 = vmul.f32 %v2013_v31, %v7569_v20 }
 0x3d9   : > { %vm3262_vm12 = vcmp.eq.s32.totalorder %v6635_v50, 0  ;;  %vm2520_vm3 = vcmp.lt.s32.totalorder %v6644_v9, 1  ;;  %v6673_v49 = vshll.u32 %v2496_v26, 8  ;;  %v739_v61 = vmul.f32 %v6552_v40, %v738_v44 }
 0x3da   : > { %7570 = vst [vmem:[#allocation12_spill] sm:$0xff] %v6669_v48  ;;  %v2519_v19 = vor.u32 %v2518_v36, %v2517_v16  ;;  %vm741_vm13 = vcmp.eq.f32.partialorder %v6495_v28, inf  ;;  %v6678_v1 = vsub.s32 %v6562_v46, %v2435_v53  ;;  %vm2523_vm2 = vcmp.lt.s32.totalorder %v6644_v9, 4 }
 0x3db   : > { %v2528_v20 = vsel %vm2520_vm3, %v6659_v55, %v6664_v58  ;;  %v7453_v31 = vxor.u32 2147483648, %v6642_v60  ;;  %vm2522_vm1 = vcmp.lt.s32.totalorder %v6644_v9, 3  ;;  %v2529_v26 = vsel %vm2523_vm2, %v2516_v42, 920167782 }
 0x3dc   : > { %v2532_v40 = vsel %vm2520_vm3, %v6664_v58, %v6666_v54  ;;  %v714_v46 = vsub.f32 1.5, %v713_v59  ;;  %vm2521_vm6 = vcmp.lt.s32.totalorder %v6644_v9, 2  ;;  %v2530_v53 = vsel %vm2522_vm1, %v6666_v54, %v2529_v26 }
 0x3dd   : > { %v2533_v44 = vsel %vm2523_vm2, %v2519_v19, 1326507024  ;;  %v7456_v56 = vxor.u32 2147483648, %v6669_v48  ;;  %v2531_v38 = vsel %vm2521_vm6, %v2528_v20, %v2530_v53  ;;  %v2537_v2 = vand.u32 65535, %v6673_v49 }
 0x3de   : > { %v2534_v15 = vsel %vm2522_vm1, %v2516_v42, %v2533_v44  ;;  %v740_v32 = vmul.f32 %v739_v61, %v6495_v28  ;;  %v2538_v62 = vshrl.u32 %v6673_v49, 16  ;;  %v2561_v11 = vand.u32 65535, %v2531_v38 }
 0x3df   : > { %v2535_v13 = vsel %vm2521_vm6, %v2532_v40, %v2534_v15  ;;  %v2562_v16 = vshrl.u32 %v2531_v38, 16  ;;  %v6712_v51 = vsel %vm2182_vm5, %v2302_v41, %v6609_v14  ;;  %vm3265_vm7 = vcmp.eq.s32.totalorder %v6635_v50, 2 }
 0x3e0   : > { %v2539_v36 = vand.u32 65535, %v2535_v13  ;;  %v2540_v59 = vshrl.u32 %v2535_v13, 16  ;;  %v2565_v61 = vmul.u32 %v2561_v11, %v2538_v62  ;;  %v3267_v20 = vsel %vm3265_vm7, %v7453_v31, %v6669_v48 }
 0x3e1   : > { %v2564_v19 = vmul.u32 %v2562_v16, %v2537_v2  ;;  %v3264_v14 = vsel %vm3262_vm12, %v6642_v60, %v7456_v56  ;;  %v6725_v41 = vmul.f32 %v7559_v57, %v714_v46  ;;  %v2563_v53 = vmul.u32 %v2561_v11, %v2537_v2 }
 0x3e2   : > { %v2542_v26 = vmul.u32 %v2540_v59, %v2537_v2  ;;  %v2543_v40 = vmul.u32 %v2539_v36, %v2538_v62  ;;  %v742_v38 = vsel %vm741_vm13, %v6495_v28, %v740_v32  ;;  %v1847_v15 = vmul.f32 -0.001358992, %v6619_v12 }
 0x3e3   : > { %v2567_v44 = vshll.u32 %v2564_v19, 16  ;;  %v2504_v13 = vshrl.u32 %v7536_v33, %v6640_v8  ;;  %v2541_v31 = vmul.u32 %v2539_v36, %v2537_v2  ;;  %v2566_v48 = vmul.u32 %v2562_v16, %v2538_v62 }
 0x3e4   : > { %v2545_v42 = vshll.u32 %v2542_v26, 16  ;;  %vm743_vm14 = vcmp.eq.f32.partialorder %v6495_v28, 0.0  ;;  %v2544_v56 = vmul.u32 %v2540_v59, %v2538_v62  ;;  %v2547_v60 = vshll.u32 %v2543_v40, 16 }
 0x3e5   : > { %v2569_v57 = vshll.u32 %v2565_v61, 16  ;;  %vm2571_vm0 = vc.u32 %v2563_v53, %v2567_v44  ;;  %v2573_v25 = vadd.s32 %v2567_v44, %v2563_v53  ;;  %vm3261_vm12 = vcmp.lt.s32.totalorder %v6635_v50, 2  ;;  %v7572_v50 = vld [vmem:[#allocation15_spill] sm:$0xff] }
 0x3e6   : > { %vm2549_vm9 = vc.u32 %v2541_v31, %v2545_v42  ;;  %v2551_v46 = vadd.s32 %v2545_v42, %v2541_v31  ;;  %v2572_v11 = vsel %vm2571_vm0, 1, %v7537_v17  ;;  %v1848_v33 = vadd.f32 0.041655596, %v1847_v15 }
 0x3e7   : > { %v2550_v32 = vsel %vm2549_vm9, 1, %v7537_v17  ;;  %v2574_v18 = vadd.s32 %v2572_v11, %v2566_v48  ;;  %v1854_v8 = vmul.f32 -0.00019511016, %v6619_v12  ;;  %v2525_v2 = vsel %vm2523_vm2, %v6666_v54, 2102212464 }
 0x3e8   : > { %v2552_v62 = vadd.s32 %v2550_v32, %v2544_v56  ;;  %vm2553_vm13 = vc.u32 %v2551_v46, %v2547_v60  ;;  %vm2575_vm7 = vc.u32 %v2573_v25, %v2569_v57  ;;  %v1849_v36 = vmul.f32 %v1848_v33, %v6619_v12 }
 0x3e9   : > { %v2554_v31 = vsel %vm2553_vm13, 1, %v7537_v17  ;;  %v2576_v16 = vsel %vm2575_vm7, 1, %v7537_v17  ;;  %v1855_v59 = vadd.f32 0.008332121, %v1854_v8  ;;  %v2546_v42 = vshrl.u32 %v2542_v26, 16 }
 0x3ea   : > { %v2556_v53 = vadd.s32 %v2554_v31, %v2552_v62  ;;  %v2568_v48 = vshrl.u32 %v2564_v19, 16  ;;  %v2578_v44 = vadd.s32 %v2576_v16, %v2574_v18  ;;  %v2524_v15 = vsel %vm2520_vm3, %v2504_v13, %v6659_v55 }
 0x3eb   : > { %v2526_v60 = vsel %vm2522_vm1, %v6664_v58, %v2525_v2  ;;  %v1850_v54 = vadd.f32 -0.4999988, %v1849_v36  ;;  %v1856_v56 = vmul.f32 %v1855_v59, %v6619_v12  ;;  %v2548_v46 = vshrl.u32 %v2543_v40, 16 }
 0x3ec   : > { %v2557_v17 = vadd.s32 %v2556_v53, %v2546_v42  ;;  %v2570_v11 = vshrl.u32 %v2565_v61, 16  ;;  %v2579_v32 = vadd.s32 %v2578_v44, %v2568_v48  ;;  %vm2437_vm2 = vcmp.lt.s32.totalorder %v6678_v1, 0 }
 0x3ed   : > { %v7571_v19 = vand.u32 2147483648, %v6495_v28  ;;  %v1851_v55 = vmul.f32 %v1850_v54, %v6619_v12  ;;  %v1857_v26 = vadd.f32 -0.16666654, %v1856_v56  ;;  %v3104_v13 = vadd.s32 3, %v6633_v0  ;;  %v7576_v54 = vld [vmem:[#allocation20_spill] sm:$0xff] }
 0x3ee   : > { %v2527_v58 = vsel %vm2521_vm6, %v2524_v15, %v2526_v60  ;;  %v6760_v33 = vadd.s32 %v2557_v17, %v2548_v46  ;;  %v6762_v40 = vadd.s32 %v2573_v25, %v2569_v57  ;;  %v2580_v61 = vadd.s32 %v2579_v32, %v2570_v11  ;;  %v667_v32 = vpop.permute.xlu0 %666 }
 0x3ef   : > { %v745_v18 = vsel %vm743_vm14, %v7571_v19, %v742_v38  ;;  %v6764_v8 = vadd.f32 1.0, %v1851_v55  ;;  %v1858_v2 = vmul.f32 %v1857_v26, %v6619_v12  ;;  %v3268_v28 = vsel %vm3261_vm12, %v3264_v14, %v3267_v20  ;;  %v7577_v26 = vld [vmem:[#allocation14_spill] sm:$0xff] }
 0x3f0   : > { %v1539_v38 = vmul.f32 -0.001358992, %v6586_v63  ;;  %vm2583_vm3 = vc.u32 %v6760_v33, %v6762_v40  ;;  %v2584_v62 = vadd.s32 1, %v2580_v61  ;;  %v1337_v9 = vmul.f32 %v6600_v47, %v745_v18 }
 0x3f1   : > { %vm1861_vm1 = vweird.f32 %v6010_v21  ;;  %vm2015_vm6 = vweird.f32 %v5608_v52  ;;  %v1546_v25 = vmul.f32 -0.00019511016, %v6586_v63  ;;  %v2581_v57 = vmul.u32 %v6673_v49, %v2527_v58 }
 0x3f2   : > { %v1859_v12 = vadd.f32 1.0, %v1858_v2  ;;  %v3105_v31 = vand.u32 3, %v3104_v13  ;;  %v1534_v20 = vsub.s32 4, %v7572_v50  ;;  %v2585_v14 = vsel %vm2583_vm3, %v2584_v62, %v2580_v61 }
 0x3f3   : > { %v1540_v16 = vadd.f32 0.041655596, %v1539_v38  ;;  %v1547_v36 = vadd.f32 0.008332121, %v1546_v25  ;;  %v1693_v59 = vmul.f32 -0.001358992, %v6526_v7  ;;  %v2586_v42 = vadd.s32 %v2585_v14, %v2581_v57 }
 0x3f4   : > { %v6780_v47 = vmul.f32 %v1859_v12, %v6597_v23  ;;  %v7463_v53 = vxor.u32 2147483648, %v6764_v8  ;;  %v1700_v48 = vmul.f32 -0.00019511016, %v6526_v7  ;;  %v7573_v44 = vand.u32 2147483647, %v5859_v10 }
 0x3f5   : > { %v6791_v15 = vadd.f32 %v6626_v3, %v1337_v9  ;;  %v1548_v60 = vmul.f32 %v1547_v36, %v6586_v63  ;;  %v1688_v56 = vsub.s32 4, %v7576_v54  ;;  %v1694_v46 = vadd.f32 0.041655596, %v1693_v59 }
 0x3f6   : > { %vm6786_vm14 = vcmp.le.f32.partialorder %v7573_v44, 0.7853982  ;;  %v2587_v23 = vadd.s32 536870912, %v2586_v42  ;;  %v7464_v17 = vxor.u32 2147483648, %v6780_v47  ;;  %vm3106_vm0 = vcmp.lt.s32.totalorder %v3105_v31, 2 }
 0x3f7   : > { %v1701_v11 = vadd.f32 0.008332121, %v1700_v48  ;;  %vm3107_vm9 = vcmp.eq.s32.totalorder %v3105_v31, 0  ;;  %vm3110_vm12 = vcmp.eq.s32.totalorder %v3105_v31, 2  ;;  %v1541_v19 = vmul.f32 %v1540_v16, %v6586_v63 }
 0x3f8   : > { %v1549_v18 = vadd.f32 -0.16666654, %v1548_v60  ;;  %v3109_v3 = vsel %vm3107_vm9, %v6764_v8, %v7464_v17  ;;  %v3112_v55 = vsel %vm3110_vm12, %v7463_v53, %v6780_v47  ;;  %v6804_v13 = vadd.f32 %v667_v32, %v7577_v26  ;;  %v7584_v17 = vld [vmem:[#allocation19_spill] sm:$0xff] }
 0x3f9   : > { %v1695_v58 = vmul.f32 %v1694_v46, %v6526_v7  ;;  %v7578_v61 = vsub.s32 0, %v6678_v1  ;;  %v6812_v38 = vshrl.u32 %v2587_v23, 30  ;;  %v3113_v62 = vsel %vm3106_vm0, %v3109_v3, %v3112_v55 }
 0x3fa   : > { %v1702_v9 = vmul.f32 %v1701_v11, %v6526_v7  ;;  %v3114_v25 = vsel %vm1861_vm1, nan, %v3113_v62  ;;  %v3269_v57 = vsel %vm2015_vm6, nan, %v3268_v28  ;;  %4593 = vrsqrt.f32 %v6804_v13  ;;  %v677_v11 = vpop.permute.xlu0 %676 }
 0x3fb   : > { %v2439_v2 = vsel %vm2437_vm2, %v7578_v61, %v6678_v1  ;;  %v716_v12 = vmul.f32 %v6725_v41, %v7558_v29  ;;  %v3892_v31 = vmul.f32 %v3114_v25, %v6629_v5  ;;  %v3893_v14 = vmul.f32 %v3269_v57, %v6791_v15 }
 0x3fc   : > { %v1550_v16 = vmul.f32 %v1549_v18, %v6586_v63  ;;  %v1689_v36 = vsel %vm1566_vm8, %v1688_v56, %v7576_v54  ;;  %v1535_v59 = vsel %vm1412_vm11, %v1534_v20, %v7572_v50  ;;  %v1542_v28 = vadd.f32 -0.4999988, %v1541_v19 }
 0x3fd   : > { %v1696_v48 = vadd.f32 -0.4999988, %v1695_v58  ;;  %v1703_v44 = vadd.f32 -0.16666654, %v1702_v9  ;;  %v7579_v60 = vand.u32 2147483647, %v7565_v30  ;;  %4595 = vrsqrt.f32 %v6622_v43 }
 0x3fe   : > { %v2589_v46 = vshll.u32 %v6812_v38, 30  ;;  %v4548_v23 = vpack.i.bf16 %v3892_v31, %v3893_v14  ;;  %v6843_v54 = vsel %vm6786_vm14, %v5859_v10, %v6592_v4  ;;  %vm717_vm8 = vcmp.eq.f32.partialorder %v7558_v29, inf }
 0x3ff   : > { %vm6833_vm13 = vcmp.le.f32.partialorder %v7579_v60, 0.7853982  ;;  %v6854_v20 = vsel %vm6470_vm15, 0, %v1689_v36  ;;  %v2440_v56 = vclz %v2439_v2  ;;  %v6859_v4 = vsel %vm6516_vm4, 0, %v1535_v59  ;;  %v4605_v60 = vld [vmem:[%s5228_s30] ss:$0 sm:$0xff] }
 0x400   : > { %v6849_v50 = vsel %vm6833_vm13, %v7565_v30, %v6712_v51  ;;  %4549 = vrot.lane.b32.xlu2 %v4548_v23, %s4781_s27  ;;  %v1551_v32 = vadd.f32 1.0, %v1550_v16  ;;  %v1704_v19 = vmul.f32 %v1703_v44, %v6526_v7  ;;  %v4594_v18 = vpop.eup %4593  ;;  %v7582_v51 = vld [vmem:[#allocation17_spill] sm:$0xff]  ;;  %v718_v55 = vsel %vm717_vm8, %v7558_v29, %v716_v12 }
 0x401   : > { %v6863_v3 = vadd.f32 %v677_v11, %v7582_v51  ;;  %v1543_v39 = vmul.f32 %v1542_v28, %v6586_v63  ;;  %v1697_v26 = vmul.f32 %v1696_v48, %v6526_v7  ;;  %v6868_v58 = vsub.s32 %v2586_v42, %v2589_v46 }
 0x402   : > { %v699_v61 = vmul.f32 %v4594_v18, %v6804_v13  ;;  %v1705_v37 = vadd.f32 1.0, %v1704_v19  ;;  %v2949_v2 = vadd.s32 3, %v6854_v20  ;;  %v6874_v62 = vmul.f32 %v6843_v54, %v6843_v54 }
 0x403   : > { %4597 = vrsqrt.f32 %v6863_v3  ;;  %v720_v9 = vand.u32 2147483648, %v7558_v29  ;;  %v2794_v25 = vadd.s32 3, %v6859_v4  ;;  %v6879_v63 = vpop.eup %4595  ;;  %vm719_vm15 = vcmp.eq.f32.partialorder %v7558_v29, 0.0 }
 0x404   : > { %v700_v7 = vmul.f32 %v4594_v18, %v699_v61  ;;  %v6883_v42 = vmul.f32 %v1551_v32, %v6569_v6  ;;  %v6886_v57 = vmul.f32 %v1705_v37, %v6501_v27  ;;  %v6890_v12 = vmul.f32 %v6849_v50, %v6849_v50 }
 0x405   : > { %v6892_v31 = vadd.s32 4294967294, %v2440_v56  ;;  %v721_v14 = vsel %vm719_vm15, %v720_v9, %v718_v55  ;;  %v6894_v16 = vadd.f32 1.0, %v1697_v26  ;;  %v2592_v36 = vsub.s32 0, %v6868_v58 }
 0x406   : > { %v701_v59 = vmul.f32 0.5, %v700_v7  ;;  %v6897_v29 = vadd.f32 1.0, %v1543_v39  ;;  %v2950_v28 = vand.u32 3, %v2949_v2  ;;  %vm2591_vm11 = vcmp.lt.s32.totalorder %v6868_v58, 0  ;;  %v681_v7 = vpop.permute.xlu2 %680 }
 0x407   : > { %v1711_v27 = vxor.u32 2147483648, %v6886_v57  ;;  %v2795_v6 = vand.u32 3, %v2794_v25  ;;  %v747_v48 = vmul.f32 %v6879_v63, %v6622_v43  ;;  %v1335_v46 = vmul.f32 %v4605_v60, %v721_v14 }
 0x408   : > { %v702_v44 = vsub.f32 1.5, %v701_v59  ;;  %v7462_v23 = vxor.u32 2147483648, %v6883_v42  ;;  %vm1707_vm4 = vweird.f32 %v5614_v34  ;;  %vm705_vm7 = vcmp.eq.f32.partialorder %v6804_v13, inf }
 0x409   : > { %v4598_v56 = vpop.eup %4597  ;;  %vm707_vm2 = vcmp.eq.f32.partialorder %v6804_v13, 0.0  ;;  %v708_v11 = vand.u32 2147483648, %v6804_v13  ;;  %v1714_v32 = vxor.u32 2147483648, %v6894_v16  ;;  %v2593_v19 = vsel %vm2591_vm11, %v2592_v36, %v6868_v58 }
 0x40a   : > { %v703_v51 = vmul.f32 %v4594_v18, %v702_v44  ;;  %v7465_v55 = vxor.u32 2147483648, %v6897_v29  ;;  %vm2952_vm3 = vcmp.eq.s32.totalorder %v2950_v28, 0  ;;  %vm2797_vm0 = vcmp.eq.s32.totalorder %v2795_v6, 0 }
 0x40b   : > { %v2954_v39 = vsel %vm2952_vm3, %v6894_v16, %v1711_v27  ;;  %v748_v26 = vmul.f32 %v6879_v63, %v747_v48  ;;  %v759_v61 = vmul.f32 %v4598_v56, %v6863_v3  ;;  %v2799_v2 = vsel %vm2797_vm0, %v6897_v29, %v7462_v23 }
 0x40c   : > { %v704_v37 = vmul.f32 %v703_v51, %v6804_v13  ;;  %vm2800_vm9 = vcmp.eq.s32.totalorder %v2795_v6, 2  ;;  %vm2955_vm12 = vcmp.eq.s32.totalorder %v2950_v28, 2  ;;  %v2594_v18 = vclz %v2593_v19 }
 0x40d   : > { %vm2951_vm8 = vcmp.lt.s32.totalorder %v2950_v28, 2  ;;  %v2957_v9 = vsel %vm2955_vm12, %v1714_v32, %v6886_v57  ;;  %v760_v25 = vmul.f32 %v4598_v56, %v759_v61  ;;  %vm2796_vm15 = vcmp.lt.s32.totalorder %v2795_v6, 2  ;;  %v7583_v61 = vld [vmem:[#allocation13_spill] sm:$0xff] }
 0x40e   : > { %v706_v14 = vsel %vm705_vm7, %v6804_v13, %v704_v37  ;;  %v2802_v36 = vsel %vm2800_vm9, %v7465_v55, %v6883_v42  ;;  %v2958_v59 = vsel %vm2951_vm8, %v2954_v39, %v2957_v9  ;;  %v749_v44 = vmul.f32 0.5, %v748_v26 }
 0x40f   : > { %v709_v28 = vsel %vm707_vm2, %v708_v11, %v706_v14  ;;  %v2803_v48 = vsel %vm2796_vm15, %v2799_v2, %v2802_v36  ;;  %v761_v19 = vmul.f32 0.5, %v760_v25  ;;  %v2150_v23 = vsub.s32 4, %v7583_v61  ;;  %v4606_v11 = vld [vmem:[%s5242_s7] ss:$0 sm:$0xff] }
 0x410   : > { %v1334_v51 = vmul.f32 %v4605_v60, %v709_v28  ;;  %v2155_v53 = vmul.f32 -0.001358992, %v6874_v62  ;;  %v2162_v37 = vmul.f32 -0.00019511016, %v6874_v62  ;;  %v6936_v6 = vadd.f32 %v681_v7, %v7584_v17  ;;  %v7585_v28 = vld [vmem:[#allocation26_spill] sm:$0xff] }
 0x411   : > { %vm4399_vm11 = vcmp.lt.s32.totalorder %v6892_v31, 0  ;;  %v4401_v55 = vadd.s32 4294967294, %v2594_v18  ;;  %v2959_v13 = vsel %vm1707_vm4, nan, %v2958_v59  ;;  %v6944_v26 = vadd.f32 %v4606_v11, %v1335_v46 }
 0x412   : > { %v6942_v39 = vadd.f32 %v4606_v11, %v1334_v51  ;;  %vm1553_vm7 = vweird.f32 %v5778_v35  ;;  %v762_v60 = vsub.f32 1.5, %v761_v19  ;;  %v750_v9 = vsub.f32 1.5, %v749_v44 }
 0x413   : > { %v2804_v2 = vsel %vm1553_vm7, nan, %v2803_v48  ;;  %v2156_v17 = vadd.f32 0.041655596, %v2155_v53  ;;  %v2163_v25 = vadd.f32 0.008332121, %v2162_v37  ;;  %v3891_v18 = vmul.f32 %v2959_v13, %v6944_v26 }
 0x414   : > { %v3890_v7 = vmul.f32 %v2804_v2, %v6942_v39  ;;  %v2151_v14 = vsel %vm2028_vm10, %v2150_v23, %v7583_v61  ;;  %v2309_v46 = vmul.f32 -0.001358992, %v6890_v12  ;;  %vm4402_vm2 = vcmp.lt.s32.totalorder %v4401_v55, 0 }
 0x415   : > { %v2157_v36 = vmul.f32 %v2156_v17, %v6874_v62  ;;  %v2164_v59 = vmul.f32 %v2163_v25, %v6874_v62  ;;  %v2304_v48 = vsub.s32 4, %v7585_v28  ;;  %4599 = vrsqrt.f32 %v6936_v6 }
 0x416   : > { %v4543_v53 = vpack.i.bf16 %v3890_v7, %v3891_v18  ;;  %v763_v44 = vmul.f32 %v4598_v56, %v762_v60  ;;  %v2310_v19 = vadd.f32 0.041655596, %v2309_v46  ;;  %v6962_v51 = vsel %vm4399_vm11, 0, %v6892_v31 }
 0x417   : > { %v6966_v23 = vsel %vm6786_vm14, 0, %v2151_v14  ;;  %v2158_v61 = vadd.f32 -0.4999988, %v2157_v36  ;;  %v2165_v37 = vadd.f32 -0.16666654, %v2164_v59  ;;  %v2428_v13 = vadd.s32 %v6520_v24, %v6505_v45 }
 0x418   : > { %v6970_v11 = vsel %vm4402_vm2, 0, %v4401_v55  ;;  %4544 = vrot.lane.b32.xlu1 %v4543_v53, %s4781_s27  ;;  %v751_v56 = vmul.f32 %v6879_v63, %v750_v9  ;;  %v2311_v60 = vmul.f32 %v2310_v19, %v6890_v12  ;;  %v2305_v49 = vsel %vm2182_vm5, %v2304_v48, %v7585_v28 }
 0x419   : > { %v2159_v31 = vmul.f32 %v2158_v61, %v6874_v62  ;;  %v2166_v2 = vmul.f32 %v2165_v37, %v6874_v62  ;;  %v2316_v17 = vmul.f32 -0.00019511016, %v6890_v12  ;;  %v2448_v45 = vsub.s32 4294967266, %v6962_v51 }
 0x41a   : > { %v764_v24 = vmul.f32 %v763_v44, %v6863_v3  ;;  %v2312_v55 = vadd.f32 -0.4999988, %v2311_v60  ;;  %v3414_v25 = vadd.s32 3, %v6966_v23  ;;  %v2444_v63 = vsub.s32 32, %v6962_v51 }
 0x41b   : > { %v2602_v9 = vsub.s32 4294967266, %v6970_v11  ;;  %v2167_v7 = vadd.f32 1.0, %v2166_v2  ;;  %v2317_v18 = vadd.f32 0.008332121, %v2316_v17  ;;  %v6986_v62 = vpop.eup %4599  ;;  %v2445_v14 = vshll.u32 %v6678_v1, %v6962_v51 }
 0x41c   : > { %v752_v46 = vmul.f32 %v751_v56, %v6622_v43  ;;  %vm765_vm10 = vcmp.eq.f32.partialorder %v6863_v3, inf  ;;  %v6994_v36 = vsel %vm6833_vm13, 0, %v2305_v49  ;;  %v6996_v59 = vadd.f32 1.0, %v2159_v31 }
 0x41d   : > { %v6999_v28 = vmul.f32 %v2167_v7, %v6843_v54  ;;  %v2313_v48 = vmul.f32 %v2312_v55, %v6890_v12  ;;  %v2318_v53 = vmul.f32 %v2317_v18, %v6890_v12  ;;  %v2449_v44 = vadd.s32 127, %v2448_v45  ;;  %v4607_v18 = vld [vmem:[%s5228_s30 + $0x2] ss:$0 sm:$0xff] }
 0x41e   : > { %vm753_vm5 = vcmp.eq.f32.partialorder %v6622_v43, inf  ;;  %v766_v1 = vsel %vm765_vm10, %v6863_v3, %v764_v24  ;;  %v3415_v19 = vand.u32 3, %v3414_v25  ;;  %v2603_v51 = vadd.s32 127, %v2602_v9 }
 0x41f   : > { %v768_v41 = vand.u32 2147483648, %v6863_v3  ;;  %v2173_v61 = vxor.u32 2147483648, %v6999_v28  ;;  %v2319_v37 = vadd.f32 -0.16666654, %v2318_v53  ;;  %v754_v56 = vsel %vm753_vm5, %v6622_v43, %v752_v46 }
 0x420   : > { %v756_v54 = vand.u32 2147483648, %v6622_v43  ;;  %vm767_vm14 = vcmp.eq.f32.partialorder %v6863_v3, 0.0  ;;  %v3569_v60 = vadd.s32 3, %v6994_v36  ;;  %v2176_v2 = vxor.u32 2147483648, %v6996_v59 }
 0x421   : > { %v769_v31 = vsel %vm767_vm14, %v768_v41, %v766_v1  ;;  %v7012_v49 = vadd.f32 1.0, %v2313_v48  ;;  %v2320_v17 = vmul.f32 %v2319_v37, %v6890_v12  ;;  %v2450_v45 = vshll.u32 %v2449_v44, 23 }
 0x422   : > { %v2598_v24 = vsub.s32 32, %v6970_v11  ;;  %vm755_vm13 = vcmp.eq.f32.partialorder %v6622_v43, 0.0  ;;  %vm3417_vm3 = vcmp.eq.s32.totalorder %v3415_v19, 0  ;;  %v2604_v55 = vshll.u32 %v2603_v51, 23 }
 0x423   : > { %v757_v25 = vsel %vm755_vm13, %v756_v54, %v754_v56  ;;  %v2321_v9 = vadd.f32 1.0, %v2320_v17  ;;  %v3419_v3 = vsel %vm3417_vm3, %v6996_v59, %v2173_v61  ;;  %v2582_v7 = vadd.s32 %v6762_v40, %v6760_v33 }
 0x424   : > { %v1339_v46 = vmul.f32 %v4607_v18, %v769_v31  ;;  %vm3420_vm0 = vcmp.eq.s32.totalorder %v3415_v19, 2  ;;  %v3570_v12 = vand.u32 3, %v3569_v60  ;;  %v2330_v43 = vxor.u32 2147483648, %v7012_v49 }
 0x425   : > { %v7024_v48 = vmul.f32 %v2321_v9, %v6849_v50  ;;  %vm3416_vm9 = vcmp.lt.s32.totalorder %v3415_v19, 2  ;;  %v3422_v53 = vsel %vm3420_vm0, %v2176_v2, %v6999_v28  ;;  %v2446_v44 = vshrl.u32 %v2428_v13, %v2444_v63  ;;  %v4608_v50 = vld [vmem:[%s5242_s7 + $0x2] ss:$0 sm:$0xff] }
 0x426   : > { %v2451_v1 = vor.u32 4788187, %v2450_v45  ;;  %v1338_v51 = vmul.f32 %v4607_v18, %v757_v25  ;;  %v3423_v41 = vsel %vm3416_vm9, %v3419_v3, %v3422_v53  ;;  %v2599_v33 = vshll.u32 %v6868_v58, %v6970_v11  ;;  %v679_v53 = vpop.permute.xlu0 %678 }
 0x427   : > { %v2600_v40 = vshrl.u32 %v2582_v7, %v2598_v24  ;;  %v2605_v37 = vor.u32 4788187, %v2604_v55  ;;  %v2327_v56 = vxor.u32 2147483648, %v7024_v48  ;;  %v7034_v54 = vadd.f32 %v4608_v50, %v1339_v46 }
 0x428   : > { %vm2169_vm12 = vweird.f32 %v5859_v10  ;;  %vm3572_vm8 = vcmp.eq.s32.totalorder %v3570_v12, 0  ;;  %vm3575_vm15 = vcmp.eq.s32.totalorder %v3570_v12, 2  ;;  %vm3571_vm11 = vcmp.lt.s32.totalorder %v3570_v12, 2 }
 0x429   : > { %v3424_v13 = vsel %vm2169_vm12, nan, %v3423_v41  ;;  %v3574_v63 = vsel %vm3572_vm8, %v7012_v49, %v2327_v56  ;;  %v3577_v58 = vsel %vm3575_vm15, %v2330_v43, %v7024_v48  ;;  %v7045_v11 = vadd.f32 %v4608_v50, %v1338_v51 }
 0x42a   : > { %vm2323_vm2 = vweird.f32 %v7565_v30  ;;  %v3578_v19 = vsel %vm3571_vm11, %v3574_v63, %v3577_v58  ;;  %v783_v60 = vmul.f32 %v6986_v62, %v6936_v6  ;;  %v2447_v31 = vor.u32 %v2446_v44, %v2445_v14  ;;  %v7586_v44 = vld [vmem:[#allocation18_spill] sm:$0xff] }
 0x42b   : > { %v3579_v17 = vsel %vm2323_vm2, nan, %v3578_v19  ;;  %v2601_v45 = vor.u32 %v2600_v40, %v2599_v33  ;;  %v3894_v24 = vmul.f32 %v3424_v13, %v7045_v11  ;;  %v1708_v25 = vand.u32 3, %v6854_v20 }
 0x42c   : > { %v3895_v55 = vmul.f32 %v3579_v17, %v7034_v54  ;;  %v2452_v9 = vand.u32 2147483647, %v2451_v1  ;;  %v2606_v3 = vand.u32 2147483647, %v2605_v37  ;;  %v784_v18 = vmul.f32 %v6986_v62, %v783_v60 }
 0x42d   : > { %v2454_v46 = vcvt.s32.f32 %v2447_v31  ;;  %v2608_v12 = vcvt.s32.f32 %v2601_v45  ;;  %vm1713_vm10 = vcmp.eq.s32.totalorder %v1708_v25, 2  ;;  %v648_v51 = vmul.f32 %v7586_v44, %v7586_v44 }
 0x42e   : > { %v4553_v7 = vpack.i.bf16 %v3894_v24, %v3895_v55  ;;  %v1715_v41 = vsel %vm1713_vm10, %v1714_v32, %v6886_v57  ;;  %v785_v1 = vmul.f32 0.5, %v784_v18  ;;  %vm1710_vm5 = vcmp.eq.s32.totalorder %v1708_v25, 0  ;;  %v7587_v32 = vld [vmem:[#allocation24_spill] sm:$0xff] }
 0x42f   : > { %v2455_v14 = vmul.f32 %v2454_v46, %v2452_v9  ;;  %v2609_v20 = vmul.f32 %v2608_v12, %v2606_v3  ;;  %v7062_v33 = vadd.f32 %v679_v53, %v648_v51  ;;  %vm1709_vm14 = vcmp.lt.s32.totalorder %v1708_v25, 2  ;;  %v7594_v3 = vld [vmem:[#allocation21_spill] sm:$0xff]  ;;  %v7595_v12 = vld [vmem:[#allocation23_spill] sm:$0xff] }
 0x430   : > { %4554 = vrot.lane.b32.xlu0 %v4553_v7, %s4781_s27  ;;  %v1712_v40 = vsel %vm1710_vm5, %v6894_v16, %v1711_v27  ;;  %v786_v58 = vsub.f32 1.5, %v785_v1  ;;  %vm2336_vm13 = vcmp.lt.s32.totalorder %v7587_v32, 0  ;;  %vm2490_vm3 = vcmp.lt.s32.totalorder %v6550_v22, 0 }
 0x431   : > { %v1716_v37 = vsel %vm1709_vm14, %v1712_v40, %v1715_v41  ;;  %v2456_v50 = vxor.u32 2147483648, %v2455_v14  ;;  %v2610_v63 = vxor.u32 2147483648, %v2609_v20  ;;  %4601 = vrsqrt.f32 %v7062_v33 }
 0x432   : > { %v1717_v13 = vsel %vm1707_vm4, nan, %v1716_v37  ;;  %v787_v34 = vmul.f32 %v6986_v62, %v786_v58  ;;  %v7588_v16 = vand.u32 2147483647, %v7587_v32  ;;  %v7591_v31 = vand.u32 2147483647, %v6550_v22 }
 0x433   : > { %v7070_v19 = vmul.f32 %v1717_v13, %v6944_v26  ;;  %v2457_v60 = vsel %vm2336_vm13, %v2456_v50, %v2455_v14  ;;  %v2611_v57 = vsel %vm2490_vm3, %v2610_v63, %v2609_v20  ;;  %v2016_v7 = vand.u32 3, %v7594_v3 }
 0x434   : > { %vm7082_vm4 = vcmp.le.f32.partialorder %v7588_v16, 0.7853982  ;;  %vm7093_vm0 = vcmp.le.f32.partialorder %v7591_v31, 0.7853982  ;;  %v788_v24 = vmul.f32 %v787_v34, %v6936_v6  ;;  %vm789_vm9 = vcmp.eq.f32.partialorder %v6936_v6, inf }
 0x435   : > { %v7089_v26 = vsel %vm7082_vm4, %v7587_v32, %v2457_v60  ;;  %v7100_v62 = vsel %vm7093_vm0, %v6550_v22, %v2611_v57  ;;  %v2458_v53 = vsub.s32 4, %v7595_v12  ;;  %v792_v14 = vand.u32 2147483648, %v6936_v6 }
 0x436   : > { %v2462_v55 = vmul.f32 %v7089_v26, %v7089_v26  ;;  %v2616_v25 = vmul.f32 %v7100_v62, %v7100_v62  ;;  %v790_v46 = vsel %vm789_vm9, %v6936_v6, %v788_v24  ;;  %v2612_v41 = vsub.s32 4, %v6812_v38  ;;  %v4609_v24 = vld [vmem:[%s5228_s30 + $0x3] ss:$0 sm:$0xff] }
 0x437   : > { %v4602_v45 = vpop.eup %4601  ;;  %vm791_vm8 = vcmp.eq.f32.partialorder %v6936_v6, 0.0  ;;  %v2459_v1 = vsel %vm2336_vm13, %v2458_v53, %v7595_v12  ;;  %vm2018_vm15 = vcmp.eq.s32.totalorder %v2016_v7, 0  ;;  %vm2021_vm11 = vcmp.eq.s32.totalorder %v2016_v7, 2  ;;  %v7598_v53 = vld [vmem:[#allocation25_spill] sm:$0xff] }
 0x438   : > { %v771_v9 = vmul.f32 %v4602_v45, %v7062_v33  ;;  %v2463_v44 = vmul.f32 -0.001358992, %v2462_v55  ;;  %v2470_v51 = vmul.f32 -0.00019511016, %v2462_v55  ;;  %v2617_v40 = vmul.f32 -0.001358992, %v2616_v25 }
 0x439   : > { %v793_v37 = vsel %vm791_vm8, %v792_v14, %v790_v46  ;;  %v2613_v58 = vsel %vm2490_vm3, %v2612_v41, %v6812_v38  ;;  %v2624_v57 = vmul.f32 -0.00019511016, %v2616_v25  ;;  %v7123_v6 = vsel %vm7082_vm4, 0, %v2459_v1  ;;  %v7596_v46 = vld [vmem:[#allocation12_spill] sm:$0xff] }
 0x43a   : > { %v772_v18 = vmul.f32 %v4602_v45, %v771_v9  ;;  %v2464_v50 = vadd.f32 0.041655596, %v2463_v44  ;;  %v2471_v13 = vadd.f32 0.008332121, %v2470_v51  ;;  %v2618_v60 = vadd.f32 0.041655596, %v2617_v40 }
 0x43b   : > { %v1341_v9 = vmul.f32 %v4609_v24, %v793_v37  ;;  %v7597_v12 = vxor.u32 2147483648, %v7596_v46  ;;  %v7132_v51 = vsel %vm7093_vm0, 0, %v2613_v58  ;;  %v1862_v1 = vand.u32 3, %v6633_v0 }
 0x43c   : > { %v773_v20 = vmul.f32 0.5, %v772_v18  ;;  %v2465_v34 = vmul.f32 %v2464_v50, %v2462_v55  ;;  %v2472_v16 = vmul.f32 %v2471_v13, %v2462_v55  ;;  %v2619_v3 = vmul.f32 %v2618_v60, %v2616_v25 }
 0x43d   : > { %v2625_v18 = vadd.f32 0.008332121, %v2624_v57  ;;  %v2020_v14 = vsel %vm2018_vm15, %v7598_v53, %v7597_v12  ;;  %vm777_vm10 = vcmp.eq.f32.partialorder %v7062_v33, inf  ;;  %v780_v13 = vand.u32 2147483648, %v7062_v33 }
 0x43e   : > { %v774_v63 = vsub.f32 1.5, %v773_v20  ;;  %v2466_v38 = vadd.f32 -0.4999988, %v2465_v34  ;;  %v2473_v44 = vadd.f32 -0.16666654, %v2472_v16  ;;  %vm779_vm5 = vcmp.eq.f32.partialorder %v7062_v33, 0.0 }
 0x43f   : > { %v2620_v41 = vadd.f32 -0.4999988, %v2619_v3  ;;  %v2626_v20 = vmul.f32 %v2625_v18, %v2616_v25  ;;  %v3879_v57 = vadd.s32 3, %v7132_v51  ;;  %vm2017_vm14 = vcmp.lt.s32.totalorder %v2016_v7, 2 }
 0x440   : > { %v775_v31 = vmul.f32 %v4602_v45, %v774_v63  ;;  %v3724_v45 = vadd.s32 3, %v7123_v6  ;;  %v2467_v40 = vmul.f32 %v2466_v38, %v2462_v55  ;;  %v2474_v37 = vmul.f32 %v2473_v44, %v2462_v55 }
 0x441   : > { %v2621_v63 = vmul.f32 %v2620_v41, %v2616_v25  ;;  %v2627_v17 = vadd.f32 -0.16666654, %v2626_v20  ;;  %v7599_v55 = vxor.u32 2147483648, %v7598_v53  ;;  %v3880_v20 = vand.u32 3, %v3879_v57 }
 0x442   : > { %v776_v27 = vmul.f32 %v775_v31, %v7062_v33  ;;  %v7141_v58 = vadd.f32 1.0, %v2467_v40  ;;  %v2475_v60 = vadd.f32 1.0, %v2474_v37  ;;  %v3725_v31 = vand.u32 3, %v3724_v45 }
 0x443   : > { %v7144_v0 = vadd.f32 1.0, %v2621_v63  ;;  %v2628_v16 = vmul.f32 %v2627_v17, %v2616_v25  ;;  %v2023_v3 = vsel %vm2021_vm11, %v7599_v55, %v7596_v46  ;;  %vm1863_vm13 = vcmp.lt.s32.totalorder %v1862_v1, 2 }
 0x444   : > { %v778_v50 = vsel %vm777_vm10, %v7062_v33, %v776_v27  ;;  %v7151_v18 = vmul.f32 %v2475_v60, %v7089_v26  ;;  %v2024_v33 = vsel %vm2017_vm14, %v2020_v14, %v2023_v3  ;;  %v2484_v12 = vxor.u32 2147483648, %v7141_v58  ;;  %v4610_v27 = vld [vmem:[%s5242_s7 + $0x3] ss:$0 sm:$0xff] }
 0x445   : > { %v781_v34 = vsel %vm779_vm5, %v780_v13, %v778_v50  ;;  %v2629_v38 = vadd.f32 1.0, %v2628_v16  ;;  %v7155_v41 = vadd.f32 %v4610_v27, %v1341_v9  ;;  %v2638_v7 = vxor.u32 2147483648, %v7144_v0 }
 0x446   : > { %v1340_v44 = vmul.f32 %v4609_v24, %v781_v34  ;;  %v2481_v25 = vxor.u32 2147483648, %v7151_v18  ;;  %vm3727_vm3 = vcmp.eq.s32.totalorder %v3725_v31, 0  ;;  %vm1864_vm4 = vcmp.eq.s32.totalorder %v1862_v1, 0 }
 0x447   : > { %v7159_v45 = vmul.f32 %v2629_v38, %v7100_v62  ;;  %vm1867_vm0 = vcmp.eq.s32.totalorder %v1862_v1, 2  ;;  %vm3730_vm9 = vcmp.eq.s32.totalorder %v3725_v31, 2  ;;  %v7600_v24 = vxor.u32 2147483648, %v6780_v47 }
 0x448   : > { %v3729_v26 = vsel %vm3727_vm3, %v7141_v58, %v2481_v25  ;;  %vm3726_vm8 = vcmp.lt.s32.totalorder %v3725_v31, 2  ;;  %v3732_v62 = vsel %vm3730_vm9, %v2484_v12, %v7151_v18  ;;  %v7172_v53 = vadd.f32 %v4610_v27, %v1340_v44 }
 0x449   : > { %v1866_v9 = vsel %vm1864_vm4, %v6764_v8, %v7600_v24  ;;  %v2635_v46 = vxor.u32 2147483648, %v7159_v45  ;;  %v3733_v14 = vsel %vm3726_vm8, %v3729_v26, %v3732_v62  ;;  %vm3882_vm15 = vcmp.eq.s32.totalorder %v3880_v20, 0  ;;  %v7215_v24 = vld [vmem:[#allocation5 + $0x8] sm:$0xff] }
 0x44a   : > { %vm3885_vm11 = vcmp.eq.s32.totalorder %v3880_v20, 2  ;;  %v7601_v40 = vxor.u32 2147483648, %v6764_v8  ;;  %vm3881_vm10 = vcmp.lt.s32.totalorder %v3880_v20, 2  ;;  %vm2477_vm5 = vweird.f32 %v7587_v32 }
 0x44b   : > { %v3884_v50 = vsel %vm3882_vm15, %v7144_v0, %v2635_v46  ;;  %v3887_v13 = vsel %vm3885_vm11, %v2638_v7, %v7159_v45  ;;  %vm2631_vm14 = vweird.f32 %v6550_v22  ;;  %v3734_v8 = vsel %vm2477_vm5, nan, %v3733_v14 }
 0x44c   : > { %v1869_v37 = vsel %vm1867_vm0, %v7601_v40, %v6780_v47  ;;  %v3888_v17 = vsel %vm3881_vm10, %v3884_v50, %v3887_v13  ;;  %v3896_v60 = vmul.f32 %v3734_v8, %v7172_v53  ;;  %v2025_v1 = vsel %vm2015_vm6, nan, %v2024_v33 }
 0x44d   : > { %v1870_v63 = vsel %vm1863_vm13, %v1866_v9, %v1869_v37  ;;  %v3889_v47 = vsel %vm2631_vm14, nan, %v3888_v17  ;;  %v2170_v31 = vand.u32 3, %v6966_v23  ;;  %v2645_v38 = vmul.f32 %v2025_v1, %v6791_v15  ;;  %v7208_v23 = vld [vmem:[#allocation5] sm:$0xff] }
 0x44e   : > { %v3897_v57 = vmul.f32 %v3889_v47, %v7155_v41  ;;  %v1871_v16 = vsel %vm1861_vm1, nan, %v1870_v63  ;;  %vm7602_vm13 = vcmask 130048   ;;  %v1554_v10 = vand.u32 3, %v6859_v4 }
 0x44f   : > { %v2644_v20 = vmul.f32 %v1871_v16, %v6629_v5  ;;  %vm2175_vm3 = vcmp.eq.s32.totalorder %v2170_v31, 2  ;;  %vm7603_vm4 = vmmov %vm7602_vm13  ;;  %vm2172_vm1 = vcmp.eq.s32.totalorder %v2170_v31, 0  ;;  %vm2171_vm6 = vcmp.lt.s32.totalorder %v2170_v31, 2 }
 0x450   : > { %v4558_v44 = vpack.i.bf16 %v3896_v60, %v3897_v57  ;;  %v2177_v21 = vsel %vm2175_vm3, %v2176_v2, %v6999_v28  ;;  %v2174_v15 = vsel %vm2172_vm1, %v6996_v59, %v2173_v61  ;;  %vm7604_vm0 = vmmov %vm7603_vm4  ;;  %v7219_v2 = vld [vmem:[#allocation5 + $0x10] sm:$0xff]  ;;  %v7223_v59 = vld [vmem:[#allocation5 + $0x18] sm:$0xff]  ;;  %v7608_v28 = vxor.u32 2147483648, %v6883_v42 }
 0x451   : > { %v2178_v5 = vsel %vm2171_vm6, %v2174_v15, %v2177_v21  ;;  %vm7605_vm9 = vmmov %vm7604_vm0  ;;  %vm1559_vm11 = vcmp.eq.s32.totalorder %v1554_v10, 2  ;;  %vm1555_vm10 = vcmp.lt.s32.totalorder %v1554_v10, 2  ;;  %v2478_v62 = vand.u32 3, %v7123_v6 }
 0x452   : > { %4559 = vrot.lane.b32.xlu1 %v4558_v44, %s4781_s27  ;;  %v2179_v33 = vsel %vm2169_vm12, nan, %v2178_v5  ;;  %vm7606_vm8 = vmmov %vm7604_vm0  ;;  %vm1556_vm12 = vcmp.eq.s32.totalorder %v1554_v10, 0  ;;  %v2632_v30 = vand.u32 3, %v7132_v51  ;;  %v4136_v5 = vld [vmem:[#allocation7 + $0x10] sm:$0xff] }
 0x453   : > { %v2646_v26 = vmul.f32 %v2179_v33, %v7045_v11  ;;  %vm7607_vm15 = vmmov %vm7604_vm0  ;;  %v1558_v61 = vsel %vm1556_vm12, %v6897_v29, %v7608_v28  ;;  %v7609_v11 = vxor.u32 2147483648, %v6897_v29  ;;  %vm2479_vm6 = vcmp.lt.s32.totalorder %v2478_v62, 2  ;;  %v4135_v33 = vld [vmem:[#allocation7 + $0x8] sm:$0xff] }
 0x454   : > { %vm7610_vm3 = vmmov %vm7604_vm0 }
 0x455   : > { %v1561_v9 = vsel %vm1559_vm11, %v7609_v11, %v6883_v42  ;;  %vm7611_vm1 = vmmov %vm7604_vm0 }
 0x456   : > { %v1562_v14 = vsel %vm1555_vm10, %v1558_v61, %v1561_v9  ;;  %vm7613_vm12 = vmmov %vm7604_vm0 }
 0x457   : > { %v1563_v4 = vsel %vm1553_vm7, nan, %v1562_v14  ;;  %vm7612_vm7 = vmmov %vm7604_vm0 }
 0x458   : > { %v2642_v63 = vmul.f32 %v1563_v4, %v6942_v39  ;;  %vm7615_vm11 = vmmov %vm7604_vm0 }
 0x459   : > { %vm7616_vm10 = vmmov %vm7604_vm0 }
 0x45a   : > { %v4550_v34 = vpop.permute.xlu2 %4549 }
 0x45b   : > { %v4552_v55 = vunpack.i.h.bf16 %v4550_v34  ;;  %v4551_v3 = vunpack.i.l.bf16 %v4550_v34 }
 0x45d   : > { %v3933_v27 = vsel %vm7602_vm13, %v2645_v38, %v4551_v3  ;;  %v3932_v52 = vsel %vm7603_vm4, %v2644_v20, %v4552_v55  ;;  %vm2483_vm13 = vcmp.eq.s32.totalorder %v2478_v62, 2  ;;  %vm2480_vm4 = vcmp.eq.s32.totalorder %v2478_v62, 0 }
 0x45e   : > { %3981 = vmatpush.msra.mxu3 %v3933_v27  ;;  %v2485_v29 = vsel %vm2483_vm13, %v2484_v12, %v7151_v18  ;;  %v2482_v35 = vsel %vm2480_vm4, %v7141_v58, %v2481_v25  ;;  %vm7617_vm13 = vmmov %vm7604_vm0 }
 0x45f   : > { %v2486_v6 = vsel %vm2479_vm6, %v2482_v35, %v2485_v29  ;;  %vm7620_vm4 = vmmov %vm7604_vm0  ;;  %vm2637_vm6 = vcmp.eq.s32.totalorder %v2632_v30, 2 }
 0x460   : > { %3982 = vmatpush.msra.mxu3 %v3932_v52  ;;  %v2487_v39 = vsel %vm2477_vm5, nan, %v2486_v6  ;;  %vm7614_vm5 = vmmov %vm7604_vm0 }
 0x461   : > { %4431 = vmatmul.msk.f32.vlgmr.msra.gmra.mxu3 %vm7604_vm0, %v7208_v23  ;;  %v2648_v16 = vmul.f32 %v2487_v39, %v7172_v53 }
 0x469   : > { %4432 = vmatmul.msk.f32.gmra.mxu3 %vm7605_vm9, %v7215_v24 }
 0x471   : > { %4433 = vmatmul.msk.f32.gmra.mxu3 %vm7606_vm8, %v7219_v2 }
 0x479   : > { %4434 = vmatmul.msk.f32.gmra.mxu3 %vm7607_vm15, %v7223_v59 }
 0x48a   : > { %v4545_v40 = vpop.permute.xlu1 %4544 }
 0x48b   : > { %v4547_v37 = vunpack.i.h.bf16 %v4545_v40  ;;  %v4546_v50 = vunpack.i.l.bf16 %v4545_v40 }
 0x48d   : > { %v3931_v13 = vsel %vm7610_vm3, %v7070_v19, %v4546_v50  ;;  %v3930_v42 = vsel %vm7611_vm1, %v2642_v63, %v4547_v37  ;;  %v2324_v19 = vand.u32 3, %v6994_v36  ;;  %vm7618_vm3 = vmmov %vm7604_vm0  ;;  %vm2634_vm1 = vcmp.eq.s32.totalorder %v2632_v30, 0 }
 0x48e   : > { %3952 = vmatpush.msra.mxu2 %v3931_v13 }
 0x48f   : > { %vm2326_vm9 = vcmp.eq.s32.totalorder %v2324_v19, 0  ;;  %vm2329_vm8 = vcmp.eq.s32.totalorder %v2324_v19, 2  ;;  %vm2325_vm15 = vcmp.lt.s32.totalorder %v2324_v19, 2 }
 0x490   : > { %3953 = vmatpush.msra.mxu2 %v3930_v42  ;;  %v2328_v18 = vsel %vm2326_vm9, %v7012_v49, %v2327_v56  ;;  %v2331_v58 = vsel %vm2329_vm8, %v2330_v43, %v7024_v48  ;;  %v2636_v49 = vsel %vm2634_vm1, %v7144_v0, %v2635_v46  ;;  %v2639_v48 = vsel %vm2637_vm6, %v2638_v7, %v7159_v45  ;;  %vm7621_vm9 = vmmov %vm7604_vm0 }
 0x491   : > { %4427 = vmatmul.msk.f32.vlgmr.msra.gmra.mxu2 %vm7612_vm7, %v7208_v23  ;;  %v2332_v12 = vsel %vm2325_vm15, %v2328_v18, %v2331_v58  ;;  %vm2633_vm7 = vcmp.lt.s32.totalorder %v2632_v30, 2  ;;  %vm7622_vm8 = vmmov %vm7604_vm0 }
 0x492   : > { %v2333_v36 = vsel %vm2323_vm2, nan, %v2332_v12  ;;  %vm7619_vm2 = vmmov %vm7604_vm0  ;;  %v2640_v43 = vsel %vm2633_vm7, %v2636_v49, %v2639_v48 }
 0x493   : > { %v2647_v8 = vmul.f32 %v2333_v36, %v7034_v54  ;;  %v2641_v54 = vsel %vm2631_vm14, nan, %v2640_v43  ;;  %vm7623_vm15 = vmmov %vm7604_vm0 }
 0x494   : > { %v2649_v51 = vmul.f32 %v2641_v54, %v7155_v41  ;;  %vm7624_vm14 = vmmov %vm7604_vm0 }
 0x495   : > { %vm7632_vm1 = vmmov %vm7604_vm0 }
 0x496   : > { %vm7633_vm6 = vmmov %vm7604_vm0 }
 0x497   : > { %vm7634_vm7 = vmmov %vm7604_vm0 }
 0x499   : > { %4428 = vmatmul.msk.f32.gmra.mxu2 %vm7604_vm0, %v7215_v24 }
 0x4a1   : > { %4429 = vmatmul.msk.f32.gmra.mxu2 %vm7613_vm12, %v7219_v2  ;;  %vm7625_vm12 = vmmov %vm7604_vm0 }
 0x4a2   : > { %v4555_v32 = vpop.permute.xlu0 %4554 }
 0x4a3   : > { %v4557_v25 = vunpack.i.h.bf16 %v4555_v32  ;;  %v4556_v17 = vunpack.i.l.bf16 %v4555_v32 }
 0x4a5   : > { %v3935_v56 = vsel %vm7614_vm5, %v2647_v8, %v4556_v17  ;;  %v3934_v47 = vsel %vm7615_vm11, %v2646_v26, %v4557_v25  ;;  %v4134_v26 = vld [vmem:[#allocation7] sm:$0xff]  ;;  %vm4138_vm5 = vcmask 261120   ;;  %vm7626_vm11 = vmmov %vm7604_vm0 }
 0x4a6   : > { %4010 = vmatpush.msrb.mxu0 %v3935_v56 }
 0x4a8   : > { %4011 = vmatpush.msrb.mxu0 %v3934_v47 }
 0x4a9   : > { %4435 = vmatmul.msk.f32.vlgmr.msrb.gmra.mxu0 %vm7616_vm10, %v7208_v23  ;;  %4430 = vmatmul.msk.f32.gmra.mxu2 %vm7617_vm13, %v7223_v59  ;;  %vm7627_vm10 = vmmov %vm7604_vm0 }
 0x4aa   : > { %vm7628_vm13 = vmmov %vm7604_vm0 }
 0x4b1   : > { %4436 = vmatmul.msk.f32.gmra.mxu0 %vm7618_vm3, %v7215_v24  ;;  %vm7629_vm3 = vmmov %vm7604_vm0 }
 0x4b9   : > { %4437 = vmatmul.msk.f32.gmra.mxu0 %vm7619_vm2, %v7219_v2  ;;  %vm7630_vm2 = vmmov %vm7604_vm0 }
 0x4c1   : > { %4438 = vmatmul.msk.f32.gmra.mxu0 %vm7620_vm4, %v7223_v59  ;;  %vm7631_vm4 = vmmov %vm7604_vm0 }
 0x4c4   : > { %v4560_v60 = vpop.permute.xlu1 %4559 }
 0x4c5   : > { %v4562_v57 = vunpack.i.h.bf16 %v4560_v60  ;;  %v4561_v34 = vunpack.i.l.bf16 %v4560_v60 }
 0x4c7   : > { %v3937_v1 = vsel %vm7604_vm0, %v2649_v51, %v4561_v34  ;;  %v3936_v46 = vsel %vm7621_vm9, %v2648_v16, %v4562_v57  ;;  %vm7635_vm9 = vmmov %vm7604_vm0 }
 0x4c8   : > { %4039 = vmatpush.msra.mxu1 %v3937_v1 }
 0x4ca   : > { %4040 = vmatpush.msra.mxu1 %v3936_v46 }
 0x4cb   : > { %4439 = vmatmul.msk.f32.vlgmr.msra.gmra.mxu1 %vm7622_vm8, %v7208_v23  ;;  %v4137_v23 = vld [vmem:[#allocation7 + $0x18] sm:$0xff]  ;;  %vm7636_vm8 = vmmov %vm7604_vm0 }
 0x4cc   : > { %4175 = vmatpush.msrb.mxu2 %v4137_v23 }
 0x4ce   : > { %4176 = vmatpush.msrb.mxu2 %v4136_v5 }
 0x4d0   : > { %4177 = vmatpush.msrb.mxu2 %v4135_v33 }
 0x4d2   : > { %4178 = vmatpush.msrb.mxu2 %v4134_v26 }
 0x4d3   : > { %4440 = vmatmul.msk.f32.gmra.mxu1 %vm7623_vm15, %v7215_v24  ;;  %vm7637_vm15 = vmmov %vm7604_vm0 }
 0x4db   : > { %4441 = vmatmul.msk.f32.gmra.mxu1 %vm7624_vm14, %v7219_v2  ;;  %vm7638_vm14 = vmmov %vm7604_vm0 }
 0x4e3   : > { %4442 = vmatmul.msk.f32.gmra.mxu1 %vm7625_vm12, %v7223_v59  ;;  %vm7639_vm12 = vmmov %vm7604_vm0 }
 0x4e4   : > { %v3984_v0 = vpop.f32.mrf.mxu3 }
 0x4ec   : > { %v7298_v45 = vpop.f32.mrf.mxu3 }
 0x4f4   : > { %v3990_v31 = vpop.f32.mrf.mxu3 }
 0x4fc   : > { %v3993_v38 = vpop.f32.mrf.mxu3 }
 0x514   : > { %v3955_v22 = vpop.f32.mrf.mxu2 }
 0x51c   : > { %v3958_v41 = vpop.f32.mrf.mxu2 }
 0x524   : > { %v3961_v7 = vpop.f32.mrf.mxu2 }
 0x525   : > { %4062 = vrot.lane.b32.xlu2 %v3961_v7, %s4782_s19  ;;  %4094 = vrot.lane.b32.xlu0 %v3961_v7, %s4781_s27 }
 0x526   : > { %v7302_v53 = vpop.f32.mrf.mxu0 }
 0x52c   : > { %v3964_v55 = vpop.f32.mrf.mxu2 }
 0x52d   : > { %4096 = vrot.lane.b32.xlu2 %v3964_v55, %s4781_s27  ;;  %4066 = vrot.lane.b32.xlu0 %v3990_v31, %s4782_s19 }
 0x52e   : > { %v7306_v3 = vpop.f32.mrf.mxu0  ;;  %4064 = vrot.lane.b32.xlu1 %v3964_v55, %s4782_s19 }
 0x535   : > { %4068 = vrot.lane.b32.xlu2 %v3993_v38, %s4782_s19  ;;  %4100 = vrot.lane.b32.xlu0 %v3993_v38, %s4781_s27 }
 0x536   : > { %v4019_v44 = vpop.f32.mrf.mxu0  ;;  %4098 = vrot.lane.b32.xlu1 %v3990_v31, %s4781_s27 }
 0x53d   : > { %4102 = vrot.lane.b32.xlu2 %v4019_v44, %s4781_s27 }
 0x53e   : > { %v4022_v27 = vpop.f32.mrf.mxu0  ;;  %4070 = vrot.lane.b32.xlu1 %v4019_v44, %s4782_s19 }
 0x53f   : > { %4072 = vrot.lane.b32.xlu0 %v4022_v27, %s4782_s19 }
 0x546   : > { %4104 = vrot.lane.b32.xlu1 %v4022_v27, %s4781_s27 }
 0x548   : > { %v4042_v20 = vpop.f32.mrf.mxu1 }
 0x550   : > { %v7316_v52 = vpop.f32.mrf.mxu1 }
 0x558   : > { %v4048_v21 = vpop.f32.mrf.mxu1 }
 0x559   : > { %4074 = vrot.lane.b32.xlu2 %v4048_v21, %s4782_s19  ;;  %4106 = vrot.lane.b32.xlu0 %v4048_v21, %s4781_s27 }
 0x560   : > { %v4051_v15 = vpop.f32.mrf.mxu1 }
 0x561   : > { %4108 = vrot.lane.b32.xlu2 %v4051_v15, %s4781_s27  ;;  %4076 = vrot.lane.b32.xlu1 %v4051_v15, %s4782_s19  ;;  %s4226_s27 = sshll.u32 %s333_s8, 4  ;;  %s4228_s19 = sshll.u32 %s4225_s20, 4  ;;  %s4227_s27 = int_to_ptr.vmem [resolvable:$true] %s4226_s27  ;;  %s4229_s19 = int_to_ptr.hbm [resolvable:$true] %s4228_s19 }
 0x562   : > { %s4719_s11 = sshra.s32 %s4229_s19, 4  ;;  %s4720_s11 = int_to_ptr.hbm [resolvable:$true] %s4719_s11 }
 0x563   : > { %s4721_s12 = scalar_lea.hbm %s4720_s11, 64  ;;  %p4726_p2 = scmp.lt.s32.totalorder %s4720_s11, %s7395_s6 }
 0x564   : > { %p4722_p4 = scmp.ne.s32.totalorder %s4720_s11, %s4721_s12  ;;  %p4727_p9 = scmp.lt.s32.totalorder %s4725_s13, %s4721_s12 }
 0x566   : > { %p4723_p8 = pnand %p4722_p4, %p4901_p3  ;;  %p4728_p10 = por %p4727_p9, %p4726_p2 }
 0x568   : > { %p4724_p11 = pneg %p4723_p8 }
 0x56a   : > { %p4729_p12 = pnand %p4728_p10, %p4724_p11 }
 0x57f   : > { %v4063_v24 = vpop.permute.xlu2 %4062 }
 0x580   : > { %v4086_v59 = vsub.f32 %v3955_v22, %v4063_v24 }
 0x587   : > { %v4097_v61 = vpop.permute.xlu2 %4096 }
 0x588   : > { %v4119_v9 = vadd.f32 %v4097_v61, %v3958_v41 }
 0x58f   : > { %v4069_v63 = vpop.permute.xlu2 %4068 }
 0x590   : > { %v4089_v35 = vsub.f32 %v7298_v45, %v4069_v63 }
 0x597   : > { %v4095_v2 = vpop.permute.xlu0 %4094  ;;  %v4103_v19 = vpop.permute.xlu2 %4102 }
 0x598   : > { %v4118_v10 = vadd.f32 %v4095_v2, %v3955_v22  ;;  %v4122_v58 = vadd.f32 %v4103_v19, %v7302_v53 }
 0x59a   : > { %v4126_v28 = vsel %vm7626_vm11, %v4086_v59, %v4118_v10 }
 0x59b   : > { %4443 = vmatmul.msk.f32.vlgmr.msrb.gmra.mxu2 %vm4138_vm5, %v4126_v28 }
 0x59f   : > { %v4067_v14 = vpop.permute.xlu0 %4066 }
 0x5a0   : > { %v4065_v11 = vpop.permute.xlu1 %4064  ;;  %v4088_v50 = vsub.f32 %v3984_v0, %v4067_v14 }
 0x5a1   : > { %v4087_v62 = vsub.f32 %v3958_v41, %v4065_v11 }
 0x5a3   : > { %v4127_v40 = vsel %vm7627_vm10, %v4087_v62, %v4119_v9 }
 0x5a4   : > { %4444 = vmatmul.msk.f32.gmra.mxu2 %vm4138_vm5, %v4127_v40 }
 0x5a7   : > { %v4101_v29 = vpop.permute.xlu0 %4100 }
 0x5a8   : > { %v4099_v37 = vpop.permute.xlu1 %4098  ;;  %v4121_v42 = vadd.f32 %v4101_v29, %v7298_v45 }
 0x5a9   : > { %v4120_v4 = vadd.f32 %v4099_v37, %v3984_v0 }
 0x5aa   : > { %v4129_v39 = vsel %vm7629_vm3, %v4089_v35, %v4121_v42 }
 0x5ab   : > { %v4128_v13 = vsel %vm7628_vm13, %v4088_v50, %v4120_v4 }
 0x5ac   : > { %4445 = vmatmul.msk.f32.gmra.mxu2 %vm4138_vm5, %v4128_v13 }
 0x5b0   : > { %v4071_v6 = vpop.permute.xlu1 %4070 }
 0x5b1   : > { %v4090_v18 = vsub.f32 %v7302_v53, %v4071_v6  ;;  %v4073_v36 = vpop.permute.xlu0 %4072 }
 0x5b2   : > { %v4091_v17 = vsub.f32 %v7306_v3, %v4073_v36 }
 0x5b3   : > { %v4130_v12 = vsel %vm7630_vm2, %v4090_v18, %v4122_v58  ;;  %v4075_v56 = vpop.permute.xlu2 %4074 }
 0x5b4   : > { %4446 = vmatmul.msk.f32.gmra.mxu2 %vm4138_vm5, %v4129_v39  ;;  %v4092_v30 = vsub.f32 %v4042_v20, %v4075_v56 }
 0x5b8   : > { %v4105_v32 = vpop.permute.xlu1 %4104 }
 0x5b9   : > { %v4123_v25 = vadd.f32 %v4105_v32, %v7306_v3 }
 0x5bb   : > { %v4131_v8 = vsel %vm7631_vm4, %v4091_v17, %v4123_v25  ;;  %v4109_v43 = vpop.permute.xlu2 %4108 }
 0x5bc   : > { %4447 = vmatmul.msk.f32.gmra.mxu2 %vm4138_vm5, %v4130_v12  ;;  %v4125_v60 = vadd.f32 %v4109_v43, %v7316_v52 }
 0x5c4   : > { %4448 = vmatmul.msk.f32.gmra.mxu2 %vm4138_vm5, %v4131_v8 }
 0x5cb   : > { %v4107_v47 = vpop.permute.xlu0 %4106 }
 0x5cc   : > { %v4124_v49 = vadd.f32 %v4107_v47, %v4042_v20 }
 0x5ce   : > { %v4132_v48 = vsel %vm7632_vm1, %v4092_v30, %v4124_v49 }
 0x5cf   : > { %4449 = vmatmul.msk.f32.gmra.mxu2 %vm4138_vm5, %v4132_v48 }
 0x5d3   : > { %v4077_v54 = vpop.permute.xlu1 %4076 }
 0x5d4   : > { %v4093_v57 = vsub.f32 %v7316_v52, %v4077_v54 }
 0x5d6   : > { %v4133_v34 = vsel %vm7633_vm6, %v4093_v57, %v4125_v60 }
 0x5d7   : > { %4450 = vmatmul.msk.f32.gmra.mxu2 %vm4138_vm5, %v4133_v34  ;;  %vm7640_vm5 = vmmov %vm7604_vm0 }
 0x61e   : > { %v4180_v51 = vpop.f32.mrf.mxu2 }
 0x61f   : > { %4204 = vst.msk [vmem:[%s333_s8] sm:$0xff] %vm7634_vm7, %v4180_v51 }
 0x627   : > { %v4183_v1 = vpop.f32.mrf.mxu2 }
 0x628   : > { %4205 = vst.msk [vmem:[%s333_s8 + $0x8] sm:$0xff] %vm7604_vm0, %v4183_v1 }
 0x62f   : > { %v4186_v16 = vpop.f32.mrf.mxu2 }
 0x630   : > { %4206 = vst.msk [vmem:[%s333_s8 + $0x10] sm:$0xff] %vm7635_vm9, %v4186_v16 }
 0x637   : > { %v4189_v46 = vpop.f32.mrf.mxu2 }
 0x638   : > { %4207 = vst.msk [vmem:[%s333_s8 + $0x18] sm:$0xff] %vm7636_vm8, %v4189_v46 }
 0x63f   : > { %v4192_v22 = vpop.f32.mrf.mxu2 }
 0x640   : > { %4208 = vst.msk [vmem:[%s333_s8 + $0x20] sm:$0xff] %vm7637_vm15, %v4192_v22 }
 0x647   : > { %v4195_v0 = vpop.f32.mrf.mxu2 }
 0x648   : > { %4209 = vst.msk [vmem:[%s333_s8 + $0x28] sm:$0xff] %vm7638_vm14, %v4195_v0 }
 0x652   : > { %v4198_v41 = vpop.f32.mrf.mxu2 }
 0x653   : > { %4210 = vst.msk [vmem:[%s333_s8 + $0x30] sm:$0xff] %vm7639_vm12, %v4198_v41 }
 0x65a   : > { %v4201_v45 = vpop.f32.mrf.mxu2 }
 0x65b   : > { %4211 = vst.msk [vmem:[%s333_s8 + $0x38] sm:$0xff] %vm7640_vm5, %v4201_v45 }
 0x65c   : > { %4732 = shalt.err (!%p4729_p12)
}
 0x65d   : > { %s4792_s9 = smov 128   ;;  %s4793_s8 = smov 8  }
 0x65e   : > { %4471 = dma.vmem_to_hbm [thread:$0]  (%p4901_p3), %s4227_s27, 1024, %s4229_s19, %s4213_s10, %s4792_s9, %s4792_s9, %s4793_s8  }
 0x65f PF: > { %s4243_s14 = sand.u32 1, %s4763_s21   ;;  %p7641_p13 = scmp.ge.s32.totalorder %s4775_s24, 2 }
 0x660   : > { %s4244_s16 = scalar_lea.sflag [#allocation4], %s4243_s14 }
 0x661   : > { %p4485_p0 = pnand %p7641_p13, %p4864_p6 }
 0x663   : > { %p4486_p5 = pneg %p4485_p0 }
 0x665   : > { %4758 = dma.done.wait (%p4486_p5), %s4244_s16, 1024  }
 0x666   : > { %4760 = vsyncadd (%p4486_p5), %s4244_s16, 4294966272  ;;  %p20_p7 = scmp.ge.s32.totalorder %s4891_s18, 4   ;;  %s7642_s21 = smov %s4767_s22 }
 0x667   : > { %s7643_s22 = smov %s4771_s23  ;;  %s7644_s23 = smov %s4907_s29 }
 0x668   : > { %s7645_s24 = smov %s4891_s18  ;;  %22 = sbr.rel (!%p20_p7) target bundleno = 6 (0x6), region = 103 }
 0x66d   :  { %4250 = vsyncpa [#allocation3], 1 }
 0x66e   :  { %4252 = vsyncpa [#allocation3 + $0x1], 1 }
 0x66f   :  { %4253 = vsyncpa [#allocation6], 1 }
 0x670   :  { %4254 = vsyncpa [#allocation4], 1 }
 0x671   :  { %4256 = vsyncpa [#allocation4 + $0x1], 1 }

</bundles_post_ra>
